<compile_context>
chip_gen: v5e
topology: v5e:2x2
jax: 0.10.0
libtpu: 0.0.40
codegen_flags: <defaults>
</compile_context>

<pallas_src>
import functools
import math

import jax
import jax.numpy as jnp
from jax.experimental import pallas as pl
from jax.experimental.pallas import tpu as pltpu


_LN_EPS = 1e-5

# Row indices inside the packed per-feature vector slab.
_B_Q, _B_K, _B_V, _B_O, _G1, _BE1, _B_C1, _B_C2, _G2, _BE2 = range(10)


def _layer_norm(x, gamma, beta, eps=_LN_EPS):
    mean = jnp.mean(x, axis=-1, keepdims=True)
    xc = x - mean
    var = jnp.mean(xc * xc, axis=-1, keepdims=True)
    inv = jax.lax.rsqrt(var + eps)
    return xc * inv * gamma + beta


def _fft_block_kernel(lens_ref,      # SMEM (B,) int32        (scalar prefetch)
                      x_ref,         # VMEM (Bb, L, H) bf16
                      film_ref,      # VMEM (Bb, 1, 2H) f32
                      w_qkv_ref,     # VMEM (H, 3H) bf16      (resident)
                      w_o_ref,       # VMEM (H, H)  bf16      (resident)
                      vecs_ref,      # VMEM (16, H) f32       (resident, packed biases/LN)
                      w_c1_ref,      # VMEM (3H, H) bf16      (resident, fused conv taps)
                      w_c2_ref,      # VMEM (3H, H) bf16      (resident, fused conv taps)
                      out_ref,       # VMEM (Bb, L, H) f32
                      ctx_ref,       # VMEM scratch (Bb*L, H) f32
                      *, num_heads, shift_impl):
    Bb, L, H = x_ref.shape
    R = Bb * L
    dh = H // num_heads
    scale = 1.0 / math.sqrt(dh)
    f32, bf16 = jnp.float32, jnp.bfloat16

    vecs = vecs_ref[...]
    b_q, b_k, b_v = vecs[_B_Q:_B_Q + 1], vecs[_B_K:_B_K + 1], vecs[_B_V:_B_V + 1]
    b_o = vecs[_B_O:_B_O + 1]
    g1, be1 = vecs[_G1:_G1 + 1], vecs[_BE1:_BE1 + 1]
    b_c1, b_c2 = vecs[_B_C1:_B_C1 + 1], vecs[_B_C2:_B_C2 + 1]
    g2, be2 = vecs[_G2:_G2 + 1], vecs[_BE2:_BE2 + 1]

    x_bf = x_ref[...].reshape(R, H)          # bf16, merge leading dims (free)
    x_f32 = x_bf.astype(f32)

    # ---- masks built in-kernel from the scalar-prefetched sequence lengths ----
    base = pl.program_id(0) * Bb
    key_pos = jax.lax.broadcasted_iota(jnp.int32, (1, L), 1)   # key position  (1, L)
    row_pos = jax.lax.broadcasted_iota(jnp.int32, (L, 1), 0)   # row position  (L, 1)
    key_bias, keep_cols = [], []
    for e in range(Bb):
        ln = lens_ref[base + e]
        key_bias.append(jnp.where(key_pos < ln, 0.0, -1e9).astype(f32))   # (1, L)
        keep_cols.append((row_pos < ln).astype(f32))                       # (L, 1)
    keep_col = keep_cols[0] if Bb == 1 else jnp.concatenate(keep_cols, axis=0)  # (R,1)

    # ---- packed QKV projection over all Bb*L rows: one bf16 MXU pass ----
    qkv = jnp.dot(x_bf, w_qkv_ref[...], preferred_element_type=f32)      # (R, 3H) f32
    q = ((qkv[:, 0:H] + b_q) * scale).astype(bf16)
    k = (qkv[:, H:2 * H] + b_k).astype(bf16)
    v = (qkv[:, 2 * H:3 * H] + b_v).astype(bf16)

    # ---- multi-head attention (per element: its own key bias) ----
    for e in range(Bb):
        r0 = e * L
        kb = key_bias[e]
        for h in range(num_heads):
            c0 = h * dh
            qh = q[r0:r0 + L, c0:c0 + dh]
            kh = k[r0:r0 + L, c0:c0 + dh]
            vh = v[r0:r0 + L, c0:c0 + dh]
            s = jax.lax.dot_general(qh, kh, (((1,), (1,)), ((), ())),
                                    preferred_element_type=f32)          # (L, L) f32
            s = s + kb
            s = s - jnp.max(s, axis=-1, keepdims=True)
            p = jnp.exp(s)
            p = p * pl.reciprocal(jnp.sum(p, axis=-1, keepdims=True), approx=True)
            # head output written straight to scratch: no lane concatenate.
            ctx_ref[r0:r0 + L, c0:c0 + dh] = jnp.dot(
                p.astype(bf16), vh, preferred_element_type=f32)

    attn = jnp.dot(ctx_ref[...].astype(bf16), w_o_ref[...],
                   preferred_element_type=f32) + b_o
    # nn.Dropout(0.1) on attention output: identity (eval / inference mode).
    y = _layer_norm(attn + x_f32, g1, be1)
    y = y * keep_col                                     # masked_fill(mask, 0)

    # ---- position-wise conv FF: Conv1d(k=3, pad=1) as ONE fused K=3H matmul ----
    pos_col = row_pos if Bb == 1 else jnp.concatenate([row_pos] * Bb, axis=0)  # (R,1)
    if shift_impl == "roll":
        # Neighbour rows via circular sublane roll; validity masks come from an
        # identically-rolled position column, so the code is independent of the
        # rotate direction convention and also zeroes cross-element leakage.
        pos_a = pltpu.roll(pos_col, 1, axis=0)
        pos_b = pltpu.roll(pos_col, R - 1, axis=0)
        sel_prev_a = (pos_a == pos_col - 1).astype(f32)
        sel_prev_b = (pos_b == pos_col - 1).astype(f32)
        sel_next_a = (pos_a == pos_col + 1).astype(f32)
        sel_next_b = (pos_b == pos_col + 1).astype(f32)
    else:  # "concat" fallback (always lowers)
        not_first = (pos_col > 0).astype(f32)
        not_last = (pos_col < (L - 1)).astype(f32)

    def conv3(inp, w_ref, bias):
        if shift_impl == "roll":
            ra = pltpu.roll(inp, 1, axis=0)
            rb = pltpu.roll(inp, R - 1, axis=0)
            prev = ra * sel_prev_a + rb * sel_prev_b
            nxt = ra * sel_next_a + rb * sel_next_b
        else:
            zrow = jnp.zeros((1, H), dtype=f32)
            prev = jnp.concatenate([zrow, inp[:R - 1, :]], axis=0) * not_first
            nxt = jnp.concatenate([inp[1:, :], zrow], axis=0) * not_last
        packed = jnp.concatenate([prev, inp, nxt], axis=-1).astype(bf16)   # (R, 3H)
        return jnp.dot(packed, w_ref[...], preferred_element_type=f32) + bias

    c1 = jnp.maximum(conv3(y, w_c1_ref, b_c1), 0.0)      # ReLU
    c2 = conv3(c1, w_c2_ref, b_c2)
    # nn.Dropout(0.1) after conv2: identity (eval / inference mode).
    z = _layer_norm(c2 + y, g2, be2)

    # ---- FiLM conditioning + final masked_fill, per element ----
    for e in range(Bb):
        r0 = e * L
        fe = film_ref[e]                                  # (1, 2H) f32
        gam, bet = fe[:, 0:H], fe[:, H:2 * H]
        out_ref[e] = (z[r0:r0 + L, :] * gam + bet) * keep_cols[e]


def _choose_block_b(B, L, H):
    """Largest divisor of B keeping grid >= 2 (v7x's 2 TCs) and slab <= ~4 MiB."""
    best = 1
    for bb in range(1, B + 1):
        if B % bb:
            continue
        if B >= 2 and (B // bb) < 2:
            continue
        if bb * L * H * 4 > (4 << 20):
            continue
        best = bb
    return best


def fft_block(x, film_params, mask, params, *, num_heads=4, block_b=None,
              shift_impl="roll"):
    """Pallas implementation of FFTBlock.forward (eval / inference mode)."""
    B, L, H = x.shape
    assert H % num_heads == 0
    if block_b is None:
        block_b = _choose_block_b(B, L, H)
    assert B % block_b == 0
    grid_b = B // block_b
    if L < 3:
        shift_impl = "concat"

    # key_padding_mask -> per-sequence valid length (ZEGGS masks are suffix padding).
    lengths = jnp.sum(jnp.logical_not(mask), axis=-1).astype(jnp.int32)      # (B,)

    x_bf = x.astype(jnp.bfloat16)
    film = film_params.astype(jnp.float32).reshape(B, 1, 2 * H)

    w_qkv = params["w_qkv"].astype(jnp.bfloat16)
    w_o = params["w_o"].astype(jnp.bfloat16)
    w_c1 = params["conv1_w"].astype(jnp.bfloat16).reshape(3 * H, H)          # fused taps
    w_c2 = params["conv2_w"].astype(jnp.bfloat16).reshape(3 * H, H)

    b_qkv = params["b_qkv"]
    vec_rows = jnp.stack([
        b_qkv[:H], b_qkv[H:2 * H], b_qkv[2 * H:],
        params["b_o"], params["ln1_g"], params["ln1_b"],
        params["conv1_b"], params["conv2_b"],
        params["ln2_g"], params["ln2_b"],
    ]).astype(jnp.float32)                                                    # [10, H]
    vecs = jnp.pad(vec_rows, ((0, 16 - vec_rows.shape[0]), (0, 0)))          # [16, H]

    kernel = functools.partial(_fft_block_kernel, num_heads=num_heads,
                               shift_impl=shift_impl)

    def nbytes(shape, dt):
        n = 1
        for s in shape:
            n *= s
        return n * jnp.dtype(dt).itemsize

    block_bytes = (
        2 * (nbytes((block_b, L, H), jnp.bfloat16)            # x (double buffered)
             + nbytes((block_b, 1, 2 * H), jnp.float32)       # film
             + nbytes((H, 3 * H), jnp.bfloat16)               # w_qkv
             + nbytes((H, H), jnp.bfloat16)                   # w_o
             + nbytes((16, H), jnp.float32)                   # vecs
             + 2 * nbytes((3 * H, H), jnp.bfloat16)           # conv weights
             + nbytes((block_b, L, H), jnp.float32))          # out
        + nbytes((block_b * L, H), jnp.float32))               # ctx scratch
    vmem_limit = int(max(32 << 20, min(60 << 20, 4 * block_bytes + (8 << 20))))

    grid_spec = pltpu.PrefetchScalarGridSpec(
        num_scalar_prefetch=1,
        grid=(grid_b,),
        in_specs=[
            pl.BlockSpec((block_b, L, H), lambda g, lens: (g, 0, 0)),        # x
            pl.BlockSpec((block_b, 1, 2 * H), lambda g, lens: (g, 0, 0)),    # film
            pl.BlockSpec((H, 3 * H), lambda g, lens: (0, 0)),                # w_qkv
            pl.BlockSpec((H, H), lambda g, lens: (0, 0)),                    # w_o
            pl.BlockSpec((16, H), lambda g, lens: (0, 0)),                   # packed vecs
            pl.BlockSpec((3 * H, H), lambda g, lens: (0, 0)),                # conv1 (fused)
            pl.BlockSpec((3 * H, H), lambda g, lens: (0, 0)),                # conv2 (fused)
        ],
        out_specs=pl.BlockSpec((block_b, L, H), lambda g, lens: (g, 0, 0)),
        scratch_shapes=[pltpu.VMEM((block_b * L, H), jnp.float32)],
    )

    return pl.pallas_call(
        kernel,
        out_shape=jax.ShapeDtypeStruct((B, L, H), jnp.float32),
        grid_spec=grid_spec,
        compiler_params=pltpu.CompilerParams(
            dimension_semantics=("parallel",),
            vmem_limit_bytes=vmem_limit),
    )(lengths, x_bf, film, w_qkv, w_o, vecs, w_c1, w_c2)


def reference_forward(x, film_params, mask, params, *, num_heads=4):
    """Pure-JAX f32 reference mirroring the PyTorch module (eval mode)."""
    B, L, H = x.shape
    dh = H // num_heads
    qkv = x @ params["w_qkv"] + params["b_qkv"]
    q, k, v = qkv[..., :H], qkv[..., H:2 * H], qkv[..., 2 * H:]
    q = q / math.sqrt(dh)

    def split_heads(t):
        return t.reshape(B, L, num_heads, dh).transpose(0, 2, 1, 3)

    qh, kh, vh = split_heads(q), split_heads(k), split_heads(v)
    scores = jnp.einsum("bhqd,bhkd->bhqk", qh, kh)
    scores = scores + jnp.where(mask[:, None, None, :], -1e9, 0.0)
    p = jax.nn.softmax(scores, axis=-1)
    ctx = jnp.einsum("bhqk,bhkd->bhqd", p, vh)
    ctx = ctx.transpose(0, 2, 1, 3).reshape(B, L, H)
    attn = ctx @ params["w_o"] + params["b_o"]
    y = _layer_norm(attn + x, params["ln1_g"], params["ln1_b"])
    y = jnp.where(mask[:, :, None], 0.0, y)

    def conv3(inp, w, b):
        pad = jnp.pad(inp, ((0, 0), (1, 1), (0, 0)))
        return pad[:, :-2] @ w[0] + pad[:, 1:-1] @ w[1] + pad[:, 2:] @ w[2] + b

    c1 = jax.nn.relu(conv3(y, params["conv1_w"], params["conv1_b"]))
    c2 = conv3(c1, params["conv2_w"], params["conv2_b"])
    z = _layer_norm(c2 + y, params["ln2_g"], params["ln2_b"])
    gammas = film_params[:, None, :H]
    betas = film_params[:, None, H:]
    z = gammas * z + betas
    return jnp.where(mask[:, :, None], 0.0, z)


def init_params(key, hidden_size):
    H = hidden_size
    ks = iter(jax.random.split(key, 16))

    def w(shape, scale=0.2):
        return (scale * jax.random.normal(next(ks), shape)).astype(jnp.float32)

    return {
        "w_qkv": w((H, 3 * H)),          # [in, out] layout (x @ W)
        "b_qkv": w((3 * H,)),
        "w_o": w((H, H)),
        "b_o": w((H,)),
        "ln1_g": 1.0 + w((H,), 0.05),
        "ln1_b": w((H,), 0.05),
        "conv1_w": w((3, H, H)),         # [kernel_tap, in, out]
        "conv1_b": w((H,)),
        "conv2_w": w((3, H, H)),
        "conv2_b": w((H,)),
        "ln2_g": 1.0 + w((H,), 0.05),
        "ln2_b": w((H,), 0.05),
    }


if __name__ == "__main__":
    B, L, H = 4, 16, 32
    num_heads = 4

    key = jax.random.PRNGKey(0)
    kp, kx, kf = jax.random.split(key, 3)
    params = init_params(kp, H)

    x = jax.random.normal(kx, (B, L, H), dtype=jnp.float32)
    film = jax.random.normal(kf, (B, 2 * H), dtype=jnp.float32)
    lengths = jnp.array([L, 12, L, 9])
    mask = jnp.arange(L)[None, :] >= lengths[:, None]      # True = padded position

    try:
        out = jax.block_until_ready(
            fft_block(x, film, mask, params, num_heads=num_heads))
    except Exception:
        # Fall back to the slicing-based conv shift if this Mosaic build rejects
        # pltpu.roll along the sublane axis.
        out = jax.block_until_ready(
            fft_block(x, film, mask, params, num_heads=num_heads,
                      shift_impl="concat"))

    ref = reference_forward(x, film, mask, params, num_heads=num_heads)
    assert out.shape == (B, L, H)
    err = jnp.abs(out - ref)
    max_err = float(jnp.max(err))
    rel_err = float(jnp.mean(err) / (jnp.mean(jnp.abs(ref)) + 1e-6))
    # bf16 matmuls (f32 accumulation) compared against an all-f32 reference.
    assert max_err < 2e-1 and rel_err < 2e-2, (max_err, rel_err)

    print("KERNEL_OK")
</pallas_src>

<mosaic_0001>
module attributes {stable_mosaic.version = 11 : i64} {
  func.func @_fft_block_kernel(%arg0: i32, %arg1: memref<4xi32, #tpu.memory_space<smem>>, %arg2: memref<2x16x32xbf16, #tpu.memory_space<vmem>>, %arg3: memref<2x1x64xf32, #tpu.memory_space<vmem>>, %arg4: memref<32x96xbf16, #tpu.memory_space<vmem>>, %arg5: memref<32x32xbf16, #tpu.memory_space<vmem>>, %arg6: memref<16x32xf32, #tpu.memory_space<vmem>>, %arg7: memref<96x32xbf16, #tpu.memory_space<vmem>>, %arg8: memref<96x32xbf16, #tpu.memory_space<vmem>>, %arg9: memref<2x16x32xf32, #tpu.memory_space<vmem>>, %arg10: memref<32x32xf32, #tpu.memory_space<vmem>>) attributes {dimension_semantics = [#tpu.dimension_semantics<parallel>], iteration_bounds = array<i64: 2>, scalar_prefetch = 1 : i64, scratch_operands = 1 : i64, tpu.core_type = #tpu.core_type<tc>, window_params = [{transform_indices = @transform_0, window_bounds = array<i64: 2, 16, 32>}, {transform_indices = @transform_1, window_bounds = array<i64: 2, 1, 64>}, {pipeline_mode = #tpu.pipeline_mode<synchronous>, transform_indices = @transform_2, window_bounds = array<i64: 32, 96>}, {pipeline_mode = #tpu.pipeline_mode<synchronous>, transform_indices = @transform_3, window_bounds = array<i64: 32, 32>}, {pipeline_mode = #tpu.pipeline_mode<synchronous>, transform_indices = @transform_4, window_bounds = array<i64: 16, 32>}, {pipeline_mode = #tpu.pipeline_mode<synchronous>, transform_indices = @transform_5, window_bounds = array<i64: 96, 32>}, {pipeline_mode = #tpu.pipeline_mode<synchronous>, transform_indices = @transform_6, window_bounds = array<i64: 96, 32>}, {transform_indices = @transform_7, window_bounds = array<i64: 2, 16, 32>}]} {
    %c0 = arith.constant 0 : index
    %c0_0 = arith.constant 0 : index
    %0 = vector.load %arg6[%c0, %c0_0] : memref<16x32xf32, #tpu.memory_space<vmem>>, vector<16x32xf32>
    %1 = vector.extract_strided_slice %0 {offsets = [0, 0], sizes = [1, 32], strides = [1, 1]} : vector<16x32xf32> to vector<1x32xf32>
    %2 = vector.extract_strided_slice %0 {offsets = [1, 0], sizes = [1, 32], strides = [1, 1]} : vector<16x32xf32> to vector<1x32xf32>
    %3 = vector.extract_strided_slice %0 {offsets = [2, 0], sizes = [1, 32], strides = [1, 1]} : vector<16x32xf32> to vector<1x32xf32>
    %4 = vector.extract_strided_slice %0 {offsets = [3, 0], sizes = [1, 32], strides = [1, 1]} : vector<16x32xf32> to vector<1x32xf32>
    %5 = vector.extract_strided_slice %0 {offsets = [4, 0], sizes = [1, 32], strides = [1, 1]} : vector<16x32xf32> to vector<1x32xf32>
    %6 = vector.extract_strided_slice %0 {offsets = [5, 0], sizes = [1, 32], strides = [1, 1]} : vector<16x32xf32> to vector<1x32xf32>
    %7 = vector.extract_strided_slice %0 {offsets = [6, 0], sizes = [1, 32], strides = [1, 1]} : vector<16x32xf32> to vector<1x32xf32>
    %8 = vector.extract_strided_slice %0 {offsets = [7, 0], sizes = [1, 32], strides = [1, 1]} : vector<16x32xf32> to vector<1x32xf32>
    %9 = vector.extract_strided_slice %0 {offsets = [8, 0], sizes = [1, 32], strides = [1, 1]} : vector<16x32xf32> to vector<1x32xf32>
    %10 = vector.extract_strided_slice %0 {offsets = [9, 0], sizes = [1, 32], strides = [1, 1]} : vector<16x32xf32> to vector<1x32xf32>
    %c0_1 = arith.constant 0 : index
    %c0_2 = arith.constant 0 : index
    %c0_3 = arith.constant 0 : index
    %11 = vector.load %arg2[%c0_1, %c0_2, %c0_3] : memref<2x16x32xbf16, #tpu.memory_space<vmem>>, vector<2x16x32xbf16>
    %12 = vector.shape_cast %11 : vector<2x16x32xbf16> to vector<32x32xbf16>
    %13 = arith.extf %12 : vector<32x32xbf16> to vector<32x32xf32>
    %c2_i32 = arith.constant 2 : i32
    %14 = arith.muli %arg0, %c2_i32 : i32
    %15 = tpu.iota {dimensions = array<i32: 1>} : vector<1x16xi32>
    %16 = tpu.iota {dimensions = array<i32: 0>} : vector<16x1xi32>
    %c0_i32 = arith.constant 0 : i32
    %17 = arith.addi %14, %c0_i32 : i32
    %18 = arith.index_cast %17 : i32 to index
    %19 = memref.load %arg1[%18] : memref<4xi32, #tpu.memory_space<smem>>
    %20 = vector.broadcast %19 : i32 to vector<1x16xi32>
    %21 = arith.cmpi slt, %15, %20 : vector<1x16xi32>
    %cst = arith.constant 0.000000e+00 : f32
    %cst_4 = arith.constant -1.000000e+09 : f32
    %22 = vector.broadcast %cst : f32 to vector<1x16xf32>
    %23 = vector.broadcast %cst_4 : f32 to vector<1x16xf32>
    %24 = arith.select %21, %22, %23 : vector<1x16xi1>, vector<1x16xf32>
    %25 = vector.broadcast %19 : i32 to vector<16x1xi32>
    %26 = arith.cmpi slt, %16, %25 : vector<16x1xi32>
    %27 = arith.extui %26 : vector<16x1xi1> to vector<16x1xi32>
    %28 = arith.sitofp %27 : vector<16x1xi32> to vector<16x1xf32>
    %c1_i32 = arith.constant 1 : i32
    %29 = arith.addi %14, %c1_i32 : i32
    %30 = arith.index_cast %29 : i32 to index
    %31 = memref.load %arg1[%30] : memref<4xi32, #tpu.memory_space<smem>>
    %32 = vector.broadcast %31 : i32 to vector<1x16xi32>
    %33 = arith.cmpi slt, %15, %32 : vector<1x16xi32>
    %cst_5 = arith.constant 0.000000e+00 : f32
    %cst_6 = arith.constant -1.000000e+09 : f32
    %34 = vector.broadcast %cst_5 : f32 to vector<1x16xf32>
    %35 = vector.broadcast %cst_6 : f32 to vector<1x16xf32>
    %36 = arith.select %33, %34, %35 : vector<1x16xi1>, vector<1x16xf32>
    %37 = vector.broadcast %31 : i32 to vector<16x1xi32>
    %38 = arith.cmpi slt, %16, %37 : vector<16x1xi32>
    %39 = arith.extui %38 : vector<16x1xi1> to vector<16x1xi32>
    %40 = arith.sitofp %39 : vector<16x1xi32> to vector<16x1xf32>
    %41 = tpu.concatenate %28, %40 in 0 : vector<16x1xf32>, vector<16x1xf32> -> vector<32x1xf32>
    %c0_7 = arith.constant 0 : index
    %c0_8 = arith.constant 0 : index
    %42 = vector.load %arg4[%c0_7, %c0_8] : memref<32x96xbf16, #tpu.memory_space<vmem>>, vector<32x96xbf16>
    %cst_9 = arith.constant dense<0.000000e+00> : vector<32x96xf32>
    %43 = tpu.matmul %12, %42, %cst_9 {dimension_numbers = #tpu.dot_dimension_numbers<[1], [0], [0], [1], [0, 0, 1, 1], [], []>} : vector<32x32xbf16>, vector<32x96xbf16>, vector<32x96xf32> -> vector<32x96xf32>
    %44 = vector.extract_strided_slice %43 {offsets = [0, 0], sizes = [32, 32], strides = [1, 1]} : vector<32x96xf32> to vector<32x32xf32>
    %45 = vector.broadcast %1 : vector<1x32xf32> to vector<32x32xf32>
    %46 = arith.addf %44, %45 : vector<32x32xf32>
    %cst_10 = arith.constant 0.353553385 : f32
    %47 = vector.broadcast %cst_10 : f32 to vector<32x32xf32>
    %48 = arith.mulf %46, %47 : vector<32x32xf32>
    %49 = arith.truncf %48 : vector<32x32xf32> to vector<32x32xbf16>
    %50 = vector.extract_strided_slice %43 {offsets = [0, 32], sizes = [32, 32], strides = [1, 1]} : vector<32x96xf32> to vector<32x32xf32>
    %51 = vector.broadcast %2 : vector<1x32xf32> to vector<32x32xf32>
    %52 = arith.addf %50, %51 : vector<32x32xf32>
    %53 = arith.truncf %52 : vector<32x32xf32> to vector<32x32xbf16>
    %54 = vector.extract_strided_slice %43 {offsets = [0, 64], sizes = [32, 32], strides = [1, 1]} : vector<32x96xf32> to vector<32x32xf32>
    %55 = vector.broadcast %3 : vector<1x32xf32> to vector<32x32xf32>
    %56 = arith.addf %54, %55 : vector<32x32xf32>
    %57 = arith.truncf %56 : vector<32x32xf32> to vector<32x32xbf16>
    %58 = vector.extract_strided_slice %49 {offsets = [0, 0], sizes = [16, 8], strides = [1, 1]} : vector<32x32xbf16> to vector<16x8xbf16>
    %59 = vector.extract_strided_slice %53 {offsets = [0, 0], sizes = [16, 8], strides = [1, 1]} : vector<32x32xbf16> to vector<16x8xbf16>
    %60 = vector.extract_strided_slice %57 {offsets = [0, 0], sizes = [16, 8], strides = [1, 1]} : vector<32x32xbf16> to vector<16x8xbf16>
    %cst_11 = arith.constant dense<0.000000e+00> : vector<16x16xf32>
    %61 = tpu.matmul %58, %59, %cst_11 {dimension_numbers = #tpu.dot_dimension_numbers<[1], [1], [0], [0], [0, 0, 1, 0], [], []>} : vector<16x8xbf16>, vector<16x8xbf16>, vector<16x16xf32> -> vector<16x16xf32>
    %62 = vector.broadcast %24 : vector<1x16xf32> to vector<16x16xf32>
    %63 = arith.addf %61, %62 : vector<16x16xf32>
    %cst_12 = arith.constant dense<0xFF800000> : vector<16xf32>
    %64 = vector.multi_reduction <maximumf>, %63, %cst_12 [1] : vector<16x16xf32> to vector<16xf32>
    %65 = vector.shape_cast %64 : vector<16xf32> to vector<16x1xf32>
    %66 = vector.broadcast %65 : vector<16x1xf32> to vector<16x16xf32>
    %67 = arith.subf %63, %66 : vector<16x16xf32>
    %68 = math.exp %67 : vector<16x16xf32>
    %cst_13 = arith.constant dense<0.000000e+00> : vector<16xf32>
    %69 = vector.multi_reduction <add>, %68, %cst_13 [1] : vector<16x16xf32> to vector<16xf32>
    %70 = vector.shape_cast %69 : vector<16xf32> to vector<16x1xf32>
    %71 = tpu.reciprocal %70 {approx = true} : vector<16x1xf32> -> vector<16x1xf32>
    %72 = vector.broadcast %71 : vector<16x1xf32> to vector<16x16xf32>
    %73 = arith.mulf %68, %72 : vector<16x16xf32>
    %74 = arith.truncf %73 : vector<16x16xf32> to vector<16x16xbf16>
    %cst_14 = arith.constant dense<0.000000e+00> : vector<16x8xf32>
    %75 = tpu.matmul %74, %60, %cst_14 {dimension_numbers = #tpu.dot_dimension_numbers<[1], [0], [0], [1], [0, 0, 1, 1], [], []>} : vector<16x16xbf16>, vector<16x8xbf16>, vector<16x8xf32> -> vector<16x8xf32>
    %c0_15 = arith.constant 0 : index
    %c0_16 = arith.constant 0 : index
    %76 = vector.load %arg10[%c0_15, %c0_16] : memref<32x32xf32, #tpu.memory_space<vmem>>, vector<16x8xf32>
    tpu.vector_store %arg10[%c0_15, %c0_16], %75 {strides = array<i32>} : memref<32x32xf32, #tpu.memory_space<vmem>>, vector<16x8xf32>,
    %77 = vector.extract_strided_slice %49 {offsets = [0, 8], sizes = [16, 8], strides = [1, 1]} : vector<32x32xbf16> to vector<16x8xbf16>
    %78 = vector.extract_strided_slice %53 {offsets = [0, 8], sizes = [16, 8], strides = [1, 1]} : vector<32x32xbf16> to vector<16x8xbf16>
    %79 = vector.extract_strided_slice %57 {offsets = [0, 8], sizes = [16, 8], strides = [1, 1]} : vector<32x32xbf16> to vector<16x8xbf16>
    %cst_17 = arith.constant dense<0.000000e+00> : vector<16x16xf32>
    %80 = tpu.matmul %77, %78, %cst_17 {dimension_numbers = #tpu.dot_dimension_numbers<[1], [1], [0], [0], [0, 0, 1, 0], [], []>} : vector<16x8xbf16>, vector<16x8xbf16>, vector<16x16xf32> -> vector<16x16xf32>
    %81 = vector.broadcast %24 : vector<1x16xf32> to vector<16x16xf32>
    %82 = arith.addf %80, %81 : vector<16x16xf32>
    %cst_18 = arith.constant dense<0xFF800000> : vector<16xf32>
    %83 = vector.multi_reduction <maximumf>, %82, %cst_18 [1] : vector<16x16xf32> to vector<16xf32>
    %84 = vector.shape_cast %83 : vector<16xf32> to vector<16x1xf32>
    %85 = vector.broadcast %84 : vector<16x1xf32> to vector<16x16xf32>
    %86 = arith.subf %82, %85 : vector<16x16xf32>
    %87 = math.exp %86 : vector<16x16xf32>
    %cst_19 = arith.constant dense<0.000000e+00> : vector<16xf32>
    %88 = vector.multi_reduction <add>, %87, %cst_19 [1] : vector<16x16xf32> to vector<16xf32>
    %89 = vector.shape_cast %88 : vector<16xf32> to vector<16x1xf32>
    %90 = tpu.reciprocal %89 {approx = true} : vector<16x1xf32> -> vector<16x1xf32>
    %91 = vector.broadcast %90 : vector<16x1xf32> to vector<16x16xf32>
    %92 = arith.mulf %87, %91 : vector<16x16xf32>
    %93 = arith.truncf %92 : vector<16x16xf32> to vector<16x16xbf16>
    %cst_20 = arith.constant dense<0.000000e+00> : vector<16x8xf32>
    %94 = tpu.matmul %93, %79, %cst_20 {dimension_numbers = #tpu.dot_dimension_numbers<[1], [0], [0], [1], [0, 0, 1, 1], [], []>} : vector<16x16xbf16>, vector<16x8xbf16>, vector<16x8xf32> -> vector<16x8xf32>
    %c0_21 = arith.constant 0 : index
    %c8 = arith.constant 8 : index
    %95 = vector.load %arg10[%c0_21, %c8] : memref<32x32xf32, #tpu.memory_space<vmem>>, vector<16x8xf32>
    tpu.vector_store %arg10[%c0_21, %c8], %94 {strides = array<i32>} : memref<32x32xf32, #tpu.memory_space<vmem>>, vector<16x8xf32>,
    %96 = vector.extract_strided_slice %49 {offsets = [0, 16], sizes = [16, 8], strides = [1, 1]} : vector<32x32xbf16> to vector<16x8xbf16>
    %97 = vector.extract_strided_slice %53 {offsets = [0, 16], sizes = [16, 8], strides = [1, 1]} : vector<32x32xbf16> to vector<16x8xbf16>
    %98 = vector.extract_strided_slice %57 {offsets = [0, 16], sizes = [16, 8], strides = [1, 1]} : vector<32x32xbf16> to vector<16x8xbf16>
    %cst_22 = arith.constant dense<0.000000e+00> : vector<16x16xf32>
    %99 = tpu.matmul %96, %97, %cst_22 {dimension_numbers = #tpu.dot_dimension_numbers<[1], [1], [0], [0], [0, 0, 1, 0], [], []>} : vector<16x8xbf16>, vector<16x8xbf16>, vector<16x16xf32> -> vector<16x16xf32>
    %100 = vector.broadcast %24 : vector<1x16xf32> to vector<16x16xf32>
    %101 = arith.addf %99, %100 : vector<16x16xf32>
    %cst_23 = arith.constant dense<0xFF800000> : vector<16xf32>
    %102 = vector.multi_reduction <maximumf>, %101, %cst_23 [1] : vector<16x16xf32> to vector<16xf32>
    %103 = vector.shape_cast %102 : vector<16xf32> to vector<16x1xf32>
    %104 = vector.broadcast %103 : vector<16x1xf32> to vector<16x16xf32>
    %105 = arith.subf %101, %104 : vector<16x16xf32>
    %106 = math.exp %105 : vector<16x16xf32>
    %cst_24 = arith.constant dense<0.000000e+00> : vector<16xf32>
    %107 = vector.multi_reduction <add>, %106, %cst_24 [1] : vector<16x16xf32> to vector<16xf32>
    %108 = vector.shape_cast %107 : vector<16xf32> to vector<16x1xf32>
    %109 = tpu.reciprocal %108 {approx = true} : vector<16x1xf32> -> vector<16x1xf32>
    %110 = vector.broadcast %109 : vector<16x1xf32> to vector<16x16xf32>
    %111 = arith.mulf %106, %110 : vector<16x16xf32>
    %112 = arith.truncf %111 : vector<16x16xf32> to vector<16x16xbf16>
    %cst_25 = arith.constant dense<0.000000e+00> : vector<16x8xf32>
    %113 = tpu.matmul %112, %98, %cst_25 {dimension_numbers = #tpu.dot_dimension_numbers<[1], [0], [0], [1], [0, 0, 1, 1], [], []>} : vector<16x16xbf16>, vector<16x8xbf16>, vector<16x8xf32> -> vector<16x8xf32>
    %c0_26 = arith.constant 0 : index
    %c16 = arith.constant 16 : index
    %114 = vector.load %arg10[%c0_26, %c16] : memref<32x32xf32, #tpu.memory_space<vmem>>, vector<16x8xf32>
    tpu.vector_store %arg10[%c0_26, %c16], %113 {strides = array<i32>} : memref<32x32xf32, #tpu.memory_space<vmem>>, vector<16x8xf32>,
    %115 = vector.extract_strided_slice %49 {offsets = [0, 24], sizes = [16, 8], strides = [1, 1]} : vector<32x32xbf16> to vector<16x8xbf16>
    %116 = vector.extract_strided_slice %53 {offsets = [0, 24], sizes = [16, 8], strides = [1, 1]} : vector<32x32xbf16> to vector<16x8xbf16>
    %117 = vector.extract_strided_slice %57 {offsets = [0, 24], sizes = [16, 8], strides = [1, 1]} : vector<32x32xbf16> to vector<16x8xbf16>
    %cst_27 = arith.constant dense<0.000000e+00> : vector<16x16xf32>
    %118 = tpu.matmul %115, %116, %cst_27 {dimension_numbers = #tpu.dot_dimension_numbers<[1], [1], [0], [0], [0, 0, 1, 0], [], []>} : vector<16x8xbf16>, vector<16x8xbf16>, vector<16x16xf32> -> vector<16x16xf32>
    %119 = vector.broadcast %24 : vector<1x16xf32> to vector<16x16xf32>
    %120 = arith.addf %118, %119 : vector<16x16xf32>
    %cst_28 = arith.constant dense<0xFF800000> : vector<16xf32>
    %121 = vector.multi_reduction <maximumf>, %120, %cst_28 [1] : vector<16x16xf32> to vector<16xf32>
    %122 = vector.shape_cast %121 : vector<16xf32> to vector<16x1xf32>
    %123 = vector.broadcast %122 : vector<16x1xf32> to vector<16x16xf32>
    %124 = arith.subf %120, %123 : vector<16x16xf32>
    %125 = math.exp %124 : vector<16x16xf32>
    %cst_29 = arith.constant dense<0.000000e+00> : vector<16xf32>
    %126 = vector.multi_reduction <add>, %125, %cst_29 [1] : vector<16x16xf32> to vector<16xf32>
    %127 = vector.shape_cast %126 : vector<16xf32> to vector<16x1xf32>
    %128 = tpu.reciprocal %127 {approx = true} : vector<16x1xf32> -> vector<16x1xf32>
    %129 = vector.broadcast %128 : vector<16x1xf32> to vector<16x16xf32>
    %130 = arith.mulf %125, %129 : vector<16x16xf32>
    %131 = arith.truncf %130 : vector<16x16xf32> to vector<16x16xbf16>
    %cst_30 = arith.constant dense<0.000000e+00> : vector<16x8xf32>
    %132 = tpu.matmul %131, %117, %cst_30 {dimension_numbers = #tpu.dot_dimension_numbers<[1], [0], [0], [1], [0, 0, 1, 1], [], []>} : vector<16x16xbf16>, vector<16x8xbf16>, vector<16x8xf32> -> vector<16x8xf32>
    %c0_31 = arith.constant 0 : index
    %c24 = arith.constant 24 : index
    %133 = vector.load %arg10[%c0_31, %c24] : memref<32x32xf32, #tpu.memory_space<vmem>>, vector<16x8xf32>
    tpu.vector_store %arg10[%c0_31, %c24], %132 {strides = array<i32>} : memref<32x32xf32, #tpu.memory_space<vmem>>, vector<16x8xf32>,
    %134 = vector.extract_strided_slice %49 {offsets = [16, 0], sizes = [16, 8], strides = [1, 1]} : vector<32x32xbf16> to vector<16x8xbf16>
    %135 = vector.extract_strided_slice %53 {offsets = [16, 0], sizes = [16, 8], strides = [1, 1]} : vector<32x32xbf16> to vector<16x8xbf16>
    %136 = vector.extract_strided_slice %57 {offsets = [16, 0], sizes = [16, 8], strides = [1, 1]} : vector<32x32xbf16> to vector<16x8xbf16>
    %cst_32 = arith.constant dense<0.000000e+00> : vector<16x16xf32>
    %137 = tpu.matmul %134, %135, %cst_32 {dimension_numbers = #tpu.dot_dimension_numbers<[1], [1], [0], [0], [0, 0, 1, 0], [], []>} : vector<16x8xbf16>, vector<16x8xbf16>, vector<16x16xf32> -> vector<16x16xf32>
    %138 = vector.broadcast %36 : vector<1x16xf32> to vector<16x16xf32>
    %139 = arith.addf %137, %138 : vector<16x16xf32>
    %cst_33 = arith.constant dense<0xFF800000> : vector<16xf32>
    %140 = vector.multi_reduction <maximumf>, %139, %cst_33 [1] : vector<16x16xf32> to vector<16xf32>
    %141 = vector.shape_cast %140 : vector<16xf32> to vector<16x1xf32>
    %142 = vector.broadcast %141 : vector<16x1xf32> to vector<16x16xf32>
    %143 = arith.subf %139, %142 : vector<16x16xf32>
    %144 = math.exp %143 : vector<16x16xf32>
    %cst_34 = arith.constant dense<0.000000e+00> : vector<16xf32>
    %145 = vector.multi_reduction <add>, %144, %cst_34 [1] : vector<16x16xf32> to vector<16xf32>
    %146 = vector.shape_cast %145 : vector<16xf32> to vector<16x1xf32>
    %147 = tpu.reciprocal %146 {approx = true} : vector<16x1xf32> -> vector<16x1xf32>
    %148 = vector.broadcast %147 : vector<16x1xf32> to vector<16x16xf32>
    %149 = arith.mulf %144, %148 : vector<16x16xf32>
    %150 = arith.truncf %149 : vector<16x16xf32> to vector<16x16xbf16>
    %cst_35 = arith.constant dense<0.000000e+00> : vector<16x8xf32>
    %151 = tpu.matmul %150, %136, %cst_35 {dimension_numbers = #tpu.dot_dimension_numbers<[1], [0], [0], [1], [0, 0, 1, 1], [], []>} : vector<16x16xbf16>, vector<16x8xbf16>, vector<16x8xf32> -> vector<16x8xf32>
    %c16_36 = arith.constant 16 : index
    %c0_37 = arith.constant 0 : index
    %152 = vector.load %arg10[%c16_36, %c0_37] : memref<32x32xf32, #tpu.memory_space<vmem>>, vector<16x8xf32>
    tpu.vector_store %arg10[%c16_36, %c0_37], %151 {strides = array<i32>} : memref<32x32xf32, #tpu.memory_space<vmem>>, vector<16x8xf32>,
    %153 = vector.extract_strided_slice %49 {offsets = [16, 8], sizes = [16, 8], strides = [1, 1]} : vector<32x32xbf16> to vector<16x8xbf16>
    %154 = vector.extract_strided_slice %53 {offsets = [16, 8], sizes = [16, 8], strides = [1, 1]} : vector<32x32xbf16> to vector<16x8xbf16>
    %155 = vector.extract_strided_slice %57 {offsets = [16, 8], sizes = [16, 8], strides = [1, 1]} : vector<32x32xbf16> to vector<16x8xbf16>
    %cst_38 = arith.constant dense<0.000000e+00> : vector<16x16xf32>
    %156 = tpu.matmul %153, %154, %cst_38 {dimension_numbers = #tpu.dot_dimension_numbers<[1], [1], [0], [0], [0, 0, 1, 0], [], []>} : vector<16x8xbf16>, vector<16x8xbf16>, vector<16x16xf32> -> vector<16x16xf32>
    %157 = vector.broadcast %36 : vector<1x16xf32> to vector<16x16xf32>
    %158 = arith.addf %156, %157 : vector<16x16xf32>
    %cst_39 = arith.constant dense<0xFF800000> : vector<16xf32>
    %159 = vector.multi_reduction <maximumf>, %158, %cst_39 [1] : vector<16x16xf32> to vector<16xf32>
    %160 = vector.shape_cast %159 : vector<16xf32> to vector<16x1xf32>
    %161 = vector.broadcast %160 : vector<16x1xf32> to vector<16x16xf32>
    %162 = arith.subf %158, %161 : vector<16x16xf32>
    %163 = math.exp %162 : vector<16x16xf32>
    %cst_40 = arith.constant dense<0.000000e+00> : vector<16xf32>
    %164 = vector.multi_reduction <add>, %163, %cst_40 [1] : vector<16x16xf32> to vector<16xf32>
    %165 = vector.shape_cast %164 : vector<16xf32> to vector<16x1xf32>
    %166 = tpu.reciprocal %165 {approx = true} : vector<16x1xf32> -> vector<16x1xf32>
    %167 = vector.broadcast %166 : vector<16x1xf32> to vector<16x16xf32>
    %168 = arith.mulf %163, %167 : vector<16x16xf32>
    %169 = arith.truncf %168 : vector<16x16xf32> to vector<16x16xbf16>
    %cst_41 = arith.constant dense<0.000000e+00> : vector<16x8xf32>
    %170 = tpu.matmul %169, %155, %cst_41 {dimension_numbers = #tpu.dot_dimension_numbers<[1], [0], [0], [1], [0, 0, 1, 1], [], []>} : vector<16x16xbf16>, vector<16x8xbf16>, vector<16x8xf32> -> vector<16x8xf32>
    %c16_42 = arith.constant 16 : index
    %c8_43 = arith.constant 8 : index
    %171 = vector.load %arg10[%c16_42, %c8_43] : memref<32x32xf32, #tpu.memory_space<vmem>>, vector<16x8xf32>
    tpu.vector_store %arg10[%c16_42, %c8_43], %170 {strides = array<i32>} : memref<32x32xf32, #tpu.memory_space<vmem>>, vector<16x8xf32>,
    %172 = vector.extract_strided_slice %49 {offsets = [16, 16], sizes = [16, 8], strides = [1, 1]} : vector<32x32xbf16> to vector<16x8xbf16>
    %173 = vector.extract_strided_slice %53 {offsets = [16, 16], sizes = [16, 8], strides = [1, 1]} : vector<32x32xbf16> to vector<16x8xbf16>
    %174 = vector.extract_strided_slice %57 {offsets = [16, 16], sizes = [16, 8], strides = [1, 1]} : vector<32x32xbf16> to vector<16x8xbf16>
    %cst_44 = arith.constant dense<0.000000e+00> : vector<16x16xf32>
    %175 = tpu.matmul %172, %173, %cst_44 {dimension_numbers = #tpu.dot_dimension_numbers<[1], [1], [0], [0], [0, 0, 1, 0], [], []>} : vector<16x8xbf16>, vector<16x8xbf16>, vector<16x16xf32> -> vector<16x16xf32>
    %176 = vector.broadcast %36 : vector<1x16xf32> to vector<16x16xf32>
    %177 = arith.addf %175, %176 : vector<16x16xf32>
    %cst_45 = arith.constant dense<0xFF800000> : vector<16xf32>
    %178 = vector.multi_reduction <maximumf>, %177, %cst_45 [1] : vector<16x16xf32> to vector<16xf32>
    %179 = vector.shape_cast %178 : vector<16xf32> to vector<16x1xf32>
    %180 = vector.broadcast %179 : vector<16x1xf32> to vector<16x16xf32>
    %181 = arith.subf %177, %180 : vector<16x16xf32>
    %182 = math.exp %181 : vector<16x16xf32>
    %cst_46 = arith.constant dense<0.000000e+00> : vector<16xf32>
    %183 = vector.multi_reduction <add>, %182, %cst_46 [1] : vector<16x16xf32> to vector<16xf32>
    %184 = vector.shape_cast %183 : vector<16xf32> to vector<16x1xf32>
    %185 = tpu.reciprocal %184 {approx = true} : vector<16x1xf32> -> vector<16x1xf32>
    %186 = vector.broadcast %185 : vector<16x1xf32> to vector<16x16xf32>
    %187 = arith.mulf %182, %186 : vector<16x16xf32>
    %188 = arith.truncf %187 : vector<16x16xf32> to vector<16x16xbf16>
    %cst_47 = arith.constant dense<0.000000e+00> : vector<16x8xf32>
    %189 = tpu.matmul %188, %174, %cst_47 {dimension_numbers = #tpu.dot_dimension_numbers<[1], [0], [0], [1], [0, 0, 1, 1], [], []>} : vector<16x16xbf16>, vector<16x8xbf16>, vector<16x8xf32> -> vector<16x8xf32>
    %c16_48 = arith.constant 16 : index
    %c16_49 = arith.constant 16 : index
    %190 = vector.load %arg10[%c16_48, %c16_49] : memref<32x32xf32, #tpu.memory_space<vmem>>, vector<16x8xf32>
    tpu.vector_store %arg10[%c16_48, %c16_49], %189 {strides = array<i32>} : memref<32x32xf32, #tpu.memory_space<vmem>>, vector<16x8xf32>,
    %191 = vector.extract_strided_slice %49 {offsets = [16, 24], sizes = [16, 8], strides = [1, 1]} : vector<32x32xbf16> to vector<16x8xbf16>
    %192 = vector.extract_strided_slice %53 {offsets = [16, 24], sizes = [16, 8], strides = [1, 1]} : vector<32x32xbf16> to vector<16x8xbf16>
    %193 = vector.extract_strided_slice %57 {offsets = [16, 24], sizes = [16, 8], strides = [1, 1]} : vector<32x32xbf16> to vector<16x8xbf16>
    %cst_50 = arith.constant dense<0.000000e+00> : vector<16x16xf32>
    %194 = tpu.matmul %191, %192, %cst_50 {dimension_numbers = #tpu.dot_dimension_numbers<[1], [1], [0], [0], [0, 0, 1, 0], [], []>} : vector<16x8xbf16>, vector<16x8xbf16>, vector<16x16xf32> -> vector<16x16xf32>
    %195 = vector.broadcast %36 : vector<1x16xf32> to vector<16x16xf32>
    %196 = arith.addf %194, %195 : vector<16x16xf32>
    %cst_51 = arith.constant dense<0xFF800000> : vector<16xf32>
    %197 = vector.multi_reduction <maximumf>, %196, %cst_51 [1] : vector<16x16xf32> to vector<16xf32>
    %198 = vector.shape_cast %197 : vector<16xf32> to vector<16x1xf32>
    %199 = vector.broadcast %198 : vector<16x1xf32> to vector<16x16xf32>
    %200 = arith.subf %196, %199 : vector<16x16xf32>
    %201 = math.exp %200 : vector<16x16xf32>
    %cst_52 = arith.constant dense<0.000000e+00> : vector<16xf32>
    %202 = vector.multi_reduction <add>, %201, %cst_52 [1] : vector<16x16xf32> to vector<16xf32>
    %203 = vector.shape_cast %202 : vector<16xf32> to vector<16x1xf32>
    %204 = tpu.reciprocal %203 {approx = true} : vector<16x1xf32> -> vector<16x1xf32>
    %205 = vector.broadcast %204 : vector<16x1xf32> to vector<16x16xf32>
    %206 = arith.mulf %201, %205 : vector<16x16xf32>
    %207 = arith.truncf %206 : vector<16x16xf32> to vector<16x16xbf16>
    %cst_53 = arith.constant dense<0.000000e+00> : vector<16x8xf32>
    %208 = tpu.matmul %207, %193, %cst_53 {dimension_numbers = #tpu.dot_dimension_numbers<[1], [0], [0], [1], [0, 0, 1, 1], [], []>} : vector<16x16xbf16>, vector<16x8xbf16>, vector<16x8xf32> -> vector<16x8xf32>
    %c16_54 = arith.constant 16 : index
    %c24_55 = arith.constant 24 : index
    %209 = vector.load %arg10[%c16_54, %c24_55] : memref<32x32xf32, #tpu.memory_space<vmem>>, vector<16x8xf32>
    tpu.vector_store %arg10[%c16_54, %c24_55], %208 {strides = array<i32>} : memref<32x32xf32, #tpu.memory_space<vmem>>, vector<16x8xf32>,
    %c0_56 = arith.constant 0 : index
    %c0_57 = arith.constant 0 : index
    %210 = vector.load %arg10[%c0_56, %c0_57] : memref<32x32xf32, #tpu.memory_space<vmem>>, vector<32x32xf32>
    %211 = arith.truncf %210 : vector<32x32xf32> to vector<32x32xbf16>
    %c0_58 = arith.constant 0 : index
    %c0_59 = arith.constant 0 : index
    %212 = vector.load %arg5[%c0_58, %c0_59] : memref<32x32xbf16, #tpu.memory_space<vmem>>, vector<32x32xbf16>
    %cst_60 = arith.constant dense<0.000000e+00> : vector<32x32xf32>
    %213 = tpu.matmul %211, %212, %cst_60 {dimension_numbers = #tpu.dot_dimension_numbers<[1], [0], [0], [1], [0, 0, 1, 1], [], []>} : vector<32x32xbf16>, vector<32x32xbf16>, vector<32x32xf32> -> vector<32x32xf32>
    %214 = vector.broadcast %4 : vector<1x32xf32> to vector<32x32xf32>
    %215 = arith.addf %213, %214 : vector<32x32xf32>
    %216 = arith.addf %215, %13 : vector<32x32xf32>
    %cst_61 = arith.constant dense<0.000000e+00> : vector<32xf32>
    %217 = vector.multi_reduction <add>, %216, %cst_61 [1] : vector<32x32xf32> to vector<32xf32>
    %218 = vector.shape_cast %217 : vector<32xf32> to vector<32x1xf32>
    %cst_62 = arith.constant 3.200000e+01 : f32
    %219 = vector.broadcast %cst_62 : f32 to vector<32x1xf32>
    %220 = arith.divf %218, %219 : vector<32x1xf32>
    %221 = vector.broadcast %220 : vector<32x1xf32> to vector<32x32xf32>
    %222 = arith.subf %216, %221 : vector<32x32xf32>
    %223 = arith.mulf %222, %222 : vector<32x32xf32>
    %cst_63 = arith.constant dense<0.000000e+00> : vector<32xf32>
    %224 = vector.multi_reduction <add>, %223, %cst_63 [1] : vector<32x32xf32> to vector<32xf32>
    %225 = vector.shape_cast %224 : vector<32xf32> to vector<32x1xf32>
    %cst_64 = arith.constant 3.200000e+01 : f32
    %226 = vector.broadcast %cst_64 : f32 to vector<32x1xf32>
    %227 = arith.divf %225, %226 : vector<32x1xf32>
    %cst_65 = arith.constant 9.99999974E-6 : f32
    %228 = vector.broadcast %cst_65 : f32 to vector<32x1xf32>
    %229 = arith.addf %227, %228 : vector<32x1xf32>
    %230 = math.rsqrt %229 : vector<32x1xf32>
    %231 = vector.broadcast %230 : vector<32x1xf32> to vector<32x32xf32>
    %232 = arith.mulf %222, %231 : vector<32x32xf32>
    %233 = vector.broadcast %5 : vector<1x32xf32> to vector<32x32xf32>
    %234 = arith.mulf %232, %233 : vector<32x32xf32>
    %235 = vector.broadcast %6 : vector<1x32xf32> to vector<32x32xf32>
    %236 = arith.addf %234, %235 : vector<32x32xf32>
    %237 = vector.broadcast %41 : vector<32x1xf32> to vector<32x32xf32>
    %238 = arith.mulf %236, %237 : vector<32x32xf32>
    %239 = tpu.concatenate %16, %16 in 0 : vector<16x1xi32>, vector<16x1xi32> -> vector<32x1xi32>
    %c1_i32_66 = arith.constant 1 : i32
    %240 = tpu.dynamic_rotate %239 by %c1_i32_66 dim 0 : vector<32x1xi32>, i32 -> vector<32x1xi32>
    %c31_i32 = arith.constant 31 : i32
    %241 = tpu.dynamic_rotate %239 by %c31_i32 dim 0 : vector<32x1xi32>, i32 -> vector<32x1xi32>
    %c1_i32_67 = arith.constant 1 : i32
    %242 = vector.broadcast %c1_i32_67 : i32 to vector<32x1xi32>
    %243 = arith.subi %239, %242 : vector<32x1xi32>
    %244 = arith.cmpi eq, %240, %243 : vector<32x1xi32>
    %245 = arith.extui %244 : vector<32x1xi1> to vector<32x1xi32>
    %246 = arith.sitofp %245 : vector<32x1xi32> to vector<32x1xf32>
    %c1_i32_68 = arith.constant 1 : i32
    %247 = vector.broadcast %c1_i32_68 : i32 to vector<32x1xi32>
    %248 = arith.subi %239, %247 : vector<32x1xi32>
    %249 = arith.cmpi eq, %241, %248 : vector<32x1xi32>
    %250 = arith.extui %249 : vector<32x1xi1> to vector<32x1xi32>
    %251 = arith.sitofp %250 : vector<32x1xi32> to vector<32x1xf32>
    %c1_i32_69 = arith.constant 1 : i32
    %252 = vector.broadcast %c1_i32_69 : i32 to vector<32x1xi32>
    %253 = arith.addi %239, %252 : vector<32x1xi32>
    %254 = arith.cmpi eq, %240, %253 : vector<32x1xi32>
    %255 = arith.extui %254 : vector<32x1xi1> to vector<32x1xi32>
    %256 = arith.sitofp %255 : vector<32x1xi32> to vector<32x1xf32>
    %c1_i32_70 = arith.constant 1 : i32
    %257 = vector.broadcast %c1_i32_70 : i32 to vector<32x1xi32>
    %258 = arith.addi %239, %257 : vector<32x1xi32>
    %259 = arith.cmpi eq, %241, %258 : vector<32x1xi32>
    %260 = arith.extui %259 : vector<32x1xi1> to vector<32x1xi32>
    %261 = arith.sitofp %260 : vector<32x1xi32> to vector<32x1xf32>
    %c1_i32_71 = arith.constant 1 : i32
    %262 = tpu.dynamic_rotate %238 by %c1_i32_71 dim 0 : vector<32x32xf32>, i32 -> vector<32x32xf32>
    %c31_i32_72 = arith.constant 31 : i32
    %263 = tpu.dynamic_rotate %238 by %c31_i32_72 dim 0 : vector<32x32xf32>, i32 -> vector<32x32xf32>
    %264 = vector.broadcast %246 : vector<32x1xf32> to vector<32x32xf32>
    %265 = arith.mulf %262, %264 : vector<32x32xf32>
    %266 = vector.broadcast %251 : vector<32x1xf32> to vector<32x32xf32>
    %267 = arith.mulf %263, %266 : vector<32x32xf32>
    %268 = arith.addf %265, %267 : vector<32x32xf32>
    %269 = vector.broadcast %256 : vector<32x1xf32> to vector<32x32xf32>
    %270 = arith.mulf %262, %269 : vector<32x32xf32>
    %271 = vector.broadcast %261 : vector<32x1xf32> to vector<32x32xf32>
    %272 = arith.mulf %263, %271 : vector<32x32xf32>
    %273 = arith.addf %270, %272 : vector<32x32xf32>
    %274 = tpu.concatenate %268, %238, %273 in 1 : vector<32x32xf32>, vector<32x32xf32>, vector<32x32xf32> -> vector<32x96xf32>
    %275 = arith.truncf %274 : vector<32x96xf32> to vector<32x96xbf16>
    %c0_73 = arith.constant 0 : index
    %c0_74 = arith.constant 0 : index
    %276 = vector.load %arg7[%c0_73, %c0_74] : memref<96x32xbf16, #tpu.memory_space<vmem>>, vector<96x32xbf16>
    %cst_75 = arith.constant dense<0.000000e+00> : vector<32x32xf32>
    %277 = tpu.matmul %275, %276, %cst_75 {dimension_numbers = #tpu.dot_dimension_numbers<[1], [0], [0], [1], [0, 0, 1, 1], [], []>} : vector<32x96xbf16>, vector<96x32xbf16>, vector<32x32xf32> -> vector<32x32xf32>
    %278 = vector.broadcast %7 : vector<1x32xf32> to vector<32x32xf32>
    %279 = arith.addf %277, %278 : vector<32x32xf32>
    %cst_76 = arith.constant 0.000000e+00 : f32
    %280 = vector.broadcast %cst_76 : f32 to vector<32x32xf32>
    %281 = arith.maximumf %279, %280 : vector<32x32xf32>
    %c1_i32_77 = arith.constant 1 : i32
    %282 = tpu.dynamic_rotate %281 by %c1_i32_77 dim 0 : vector<32x32xf32>, i32 -> vector<32x32xf32>
    %c31_i32_78 = arith.constant 31 : i32
    %283 = tpu.dynamic_rotate %281 by %c31_i32_78 dim 0 : vector<32x32xf32>, i32 -> vector<32x32xf32>
    %284 = vector.broadcast %246 : vector<32x1xf32> to vector<32x32xf32>
    %285 = arith.mulf %282, %284 : vector<32x32xf32>
    %286 = vector.broadcast %251 : vector<32x1xf32> to vector<32x32xf32>
    %287 = arith.mulf %283, %286 : vector<32x32xf32>
    %288 = arith.addf %285, %287 : vector<32x32xf32>
    %289 = vector.broadcast %256 : vector<32x1xf32> to vector<32x32xf32>
    %290 = arith.mulf %282, %289 : vector<32x32xf32>
    %291 = vector.broadcast %261 : vector<32x1xf32> to vector<32x32xf32>
    %292 = arith.mulf %283, %291 : vector<32x32xf32>
    %293 = arith.addf %290, %292 : vector<32x32xf32>
    %294 = tpu.concatenate %288, %281, %293 in 1 : vector<32x32xf32>, vector<32x32xf32>, vector<32x32xf32> -> vector<32x96xf32>
    %295 = arith.truncf %294 : vector<32x96xf32> to vector<32x96xbf16>
    %c0_79 = arith.constant 0 : index
    %c0_80 = arith.constant 0 : index
    %296 = vector.load %arg8[%c0_79, %c0_80] : memref<96x32xbf16, #tpu.memory_space<vmem>>, vector<96x32xbf16>
    %cst_81 = arith.constant dense<0.000000e+00> : vector<32x32xf32>
    %297 = tpu.matmul %295, %296, %cst_81 {dimension_numbers = #tpu.dot_dimension_numbers<[1], [0], [0], [1], [0, 0, 1, 1], [], []>} : vector<32x96xbf16>, vector<96x32xbf16>, vector<32x32xf32> -> vector<32x32xf32>
    %298 = vector.broadcast %8 : vector<1x32xf32> to vector<32x32xf32>
    %299 = arith.addf %297, %298 : vector<32x32xf32>
    %300 = arith.addf %299, %238 : vector<32x32xf32>
    %cst_82 = arith.constant dense<0.000000e+00> : vector<32xf32>
    %301 = vector.multi_reduction <add>, %300, %cst_82 [1] : vector<32x32xf32> to vector<32xf32>
    %302 = vector.shape_cast %301 : vector<32xf32> to vector<32x1xf32>
    %cst_83 = arith.constant 3.200000e+01 : f32
    %303 = vector.broadcast %cst_83 : f32 to vector<32x1xf32>
    %304 = arith.divf %302, %303 : vector<32x1xf32>
    %305 = vector.broadcast %304 : vector<32x1xf32> to vector<32x32xf32>
    %306 = arith.subf %300, %305 : vector<32x32xf32>
    %307 = arith.mulf %306, %306 : vector<32x32xf32>
    %cst_84 = arith.constant dense<0.000000e+00> : vector<32xf32>
    %308 = vector.multi_reduction <add>, %307, %cst_84 [1] : vector<32x32xf32> to vector<32xf32>
    %309 = vector.shape_cast %308 : vector<32xf32> to vector<32x1xf32>
    %cst_85 = arith.constant 3.200000e+01 : f32
    %310 = vector.broadcast %cst_85 : f32 to vector<32x1xf32>
    %311 = arith.divf %309, %310 : vector<32x1xf32>
    %cst_86 = arith.constant 9.99999974E-6 : f32
    %312 = vector.broadcast %cst_86 : f32 to vector<32x1xf32>
    %313 = arith.addf %311, %312 : vector<32x1xf32>
    %314 = math.rsqrt %313 : vector<32x1xf32>
    %315 = vector.broadcast %314 : vector<32x1xf32> to vector<32x32xf32>
    %316 = arith.mulf %306, %315 : vector<32x32xf32>
    %317 = vector.broadcast %9 : vector<1x32xf32> to vector<32x32xf32>
    %318 = arith.mulf %316, %317 : vector<32x32xf32>
    %319 = vector.broadcast %10 : vector<1x32xf32> to vector<32x32xf32>
    %320 = arith.addf %318, %319 : vector<32x32xf32>
    %c0_87 = arith.constant 0 : index
    %c0_88 = arith.constant 0 : index
    %c0_89 = arith.constant 0 : index
    %321 = vector.load %arg3[%c0_87, %c0_88, %c0_89] : memref<2x1x64xf32, #tpu.memory_space<vmem>>, vector<1x1x64xf32>
    %322 = vector.shape_cast %321 : vector<1x1x64xf32> to vector<1x64xf32>
    %323 = vector.extract_strided_slice %322 {offsets = [0, 0], sizes = [1, 32], strides = [1, 1]} : vector<1x64xf32> to vector<1x32xf32>
    %324 = vector.extract_strided_slice %322 {offsets = [0, 32], sizes = [1, 32], strides = [1, 1]} : vector<1x64xf32> to vector<1x32xf32>
    %325 = vector.extract_strided_slice %320 {offsets = [0, 0], sizes = [16, 32], strides = [1, 1]} : vector<32x32xf32> to vector<16x32xf32>
    %326 = vector.broadcast %323 : vector<1x32xf32> to vector<16x32xf32>
    %327 = arith.mulf %325, %326 : vector<16x32xf32>
    %328 = vector.broadcast %324 : vector<1x32xf32> to vector<16x32xf32>
    %329 = arith.addf %327, %328 : vector<16x32xf32>
    %330 = vector.broadcast %28 : vector<16x1xf32> to vector<16x32xf32>
    %331 = arith.mulf %329, %330 : vector<16x32xf32>
    %c0_90 = arith.constant 0 : index
    %c0_91 = arith.constant 0 : index
    %c0_92 = arith.constant 0 : index
    %332 = vector.load %arg9[%c0_90, %c0_91, %c0_92] : memref<2x16x32xf32, #tpu.memory_space<vmem>>, vector<1x16x32xf32>
    %333 = vector.shape_cast %332 : vector<1x16x32xf32> to vector<16x32xf32>
    %334 = vector.shape_cast %331 : vector<16x32xf32> to vector<1x16x32xf32>
    tpu.vector_store %arg9[%c0_90, %c0_91, %c0_92], %334 {strides = array<i32>} : memref<2x16x32xf32, #tpu.memory_space<vmem>>, vector<1x16x32xf32>,
    %c1 = arith.constant 1 : index
    %c0_93 = arith.constant 0 : index
    %c0_94 = arith.constant 0 : index
    %335 = vector.load %arg3[%c1, %c0_93, %c0_94] : memref<2x1x64xf32, #tpu.memory_space<vmem>>, vector<1x1x64xf32>
    %336 = vector.shape_cast %335 : vector<1x1x64xf32> to vector<1x64xf32>
    %337 = vector.extract_strided_slice %336 {offsets = [0, 0], sizes = [1, 32], strides = [1, 1]} : vector<1x64xf32> to vector<1x32xf32>
    %338 = vector.extract_strided_slice %336 {offsets = [0, 32], sizes = [1, 32], strides = [1, 1]} : vector<1x64xf32> to vector<1x32xf32>
    %339 = vector.extract_strided_slice %320 {offsets = [16, 0], sizes = [16, 32], strides = [1, 1]} : vector<32x32xf32> to vector<16x32xf32>
    %340 = vector.broadcast %337 : vector<1x32xf32> to vector<16x32xf32>
    %341 = arith.mulf %339, %340 : vector<16x32xf32>
    %342 = vector.broadcast %338 : vector<1x32xf32> to vector<16x32xf32>
    %343 = arith.addf %341, %342 : vector<16x32xf32>
    %344 = vector.broadcast %40 : vector<16x1xf32> to vector<16x32xf32>
    %345 = arith.mulf %343, %344 : vector<16x32xf32>
    %c1_95 = arith.constant 1 : index
    %c0_96 = arith.constant 0 : index
    %c0_97 = arith.constant 0 : index
    %346 = vector.load %arg9[%c1_95, %c0_96, %c0_97] : memref<2x16x32xf32, #tpu.memory_space<vmem>>, vector<1x16x32xf32>
    %347 = vector.shape_cast %346 : vector<1x16x32xf32> to vector<16x32xf32>
    %348 = vector.shape_cast %345 : vector<16x32xf32> to vector<1x16x32xf32>
    tpu.vector_store %arg9[%c1_95, %c0_96, %c0_97], %348 {strides = array<i32>} : memref<2x16x32xf32, #tpu.memory_space<vmem>>, vector<1x16x32xf32>,
    return
  }
  func.func @transform_0(%arg0: i32, %arg1: memref<4xi32, #tpu.memory_space<smem>>) -> (i32, i32, i32) {
    %c0_i32 = arith.constant 0 : i32
    %c0_i32_0 = arith.constant 0 : i32
    %c0_i32_1 = arith.constant 0 : i32
    return %arg0, %c0_i32, %c0_i32_0 : i32, i32, i32
  }
  func.func @transform_1(%arg0: i32, %arg1: memref<4xi32, #tpu.memory_space<smem>>) -> (i32, i32, i32) {
    %c0_i32 = arith.constant 0 : i32
    %c0_i32_0 = arith.constant 0 : i32
    %c0_i32_1 = arith.constant 0 : i32
    return %arg0, %c0_i32, %c0_i32_0 : i32, i32, i32
  }
  func.func @transform_2(%arg0: i32, %arg1: memref<4xi32, #tpu.memory_space<smem>>) -> (i32, i32) {
    %c0_i32 = arith.constant 0 : i32
    %c0_i32_0 = arith.constant 0 : i32
    %c0_i32_1 = arith.constant 0 : i32
    return %c0_i32, %c0_i32_0 : i32, i32
  }
  func.func @transform_3(%arg0: i32, %arg1: memref<4xi32, #tpu.memory_space<smem>>) -> (i32, i32) {
    %c0_i32 = arith.constant 0 : i32
    %c0_i32_0 = arith.constant 0 : i32
    %c0_i32_1 = arith.constant 0 : i32
    return %c0_i32, %c0_i32_0 : i32, i32
  }
  func.func @transform_4(%arg0: i32, %arg1: memref<4xi32, #tpu.memory_space<smem>>) -> (i32, i32) {
    %c0_i32 = arith.constant 0 : i32
    %c0_i32_0 = arith.constant 0 : i32
    %c0_i32_1 = arith.constant 0 : i32
    return %c0_i32, %c0_i32_0 : i32, i32
  }
  func.func @transform_5(%arg0: i32, %arg1: memref<4xi32, #tpu.memory_space<smem>>) -> (i32, i32) {
    %c0_i32 = arith.constant 0 : i32
    %c0_i32_0 = arith.constant 0 : i32
    %c0_i32_1 = arith.constant 0 : i32
    return %c0_i32, %c0_i32_0 : i32, i32
  }
  func.func @transform_6(%arg0: i32, %arg1: memref<4xi32, #tpu.memory_space<smem>>) -> (i32, i32) {
    %c0_i32 = arith.constant 0 : i32
    %c0_i32_0 = arith.constant 0 : i32
    %c0_i32_1 = arith.constant 0 : i32
    return %c0_i32, %c0_i32_0 : i32, i32
  }
  func.func @transform_7(%arg0: i32, %arg1: memref<4xi32, #tpu.memory_space<smem>>) -> (i32, i32, i32) {
    %c0_i32 = arith.constant 0 : i32
    %c0_i32_0 = arith.constant 0 : i32
    %c0_i32_1 = arith.constant 0 : i32
    return %arg0, %c0_i32, %c0_i32_0 : i32, i32, i32
  }
}

module attributes {stable_mosaic.version = 11 : i64} {
  func.func @_fft_block_kernel(%arg0: i32, %arg1: memref<4xi32, #tpu.memory_space<smem>>, %arg2: memref<2x16x32xbf16, #tpu.memory_space<vmem>>, %arg3: memref<2x1x64xf32, #tpu.memory_space<vmem>>, %arg4: memref<32x96xbf16, #tpu.memory_space<vmem>>, %arg5: memref<32x32xbf16, #tpu.memory_space<vmem>>, %arg6: memref<16x32xf32, #tpu.memory_space<vmem>>, %arg7: memref<96x32xbf16, #tpu.memory_space<vmem>>, %arg8: memref<96x32xbf16, #tpu.memory_space<vmem>>, %arg9: memref<2x16x32xf32, #tpu.memory_space<vmem>>, %arg10: memref<32x32xf32, #tpu.memory_space<vmem>>) attributes {dimension_semantics = [#tpu.dimension_semantics<parallel>], iteration_bounds = array<i64: 2>, scalar_prefetch = 1 : i64, scratch_operands = 1 : i64, tpu.core_type = #tpu.core_type<tc>, window_params = [{transform_indices = @transform_0, window_bounds = array<i64: 2, 16, 32>}, {transform_indices = @transform_1, window_bounds = array<i64: 2, 1, 64>}, {pipeline_mode = #tpu.pipeline_mode<synchronous>, transform_indices = @transform_2, window_bounds = array<i64: 32, 96>}, {pipeline_mode = #tpu.pipeline_mode<synchronous>, transform_indices = @transform_3, window_bounds = array<i64: 32, 32>}, {pipeline_mode = #tpu.pipeline_mode<synchronous>, transform_indices = @transform_4, window_bounds = array<i64: 16, 32>}, {pipeline_mode = #tpu.pipeline_mode<synchronous>, transform_indices = @transform_5, window_bounds = array<i64: 96, 32>}, {pipeline_mode = #tpu.pipeline_mode<synchronous>, transform_indices = @transform_6, window_bounds = array<i64: 96, 32>}, {transform_indices = @transform_7, window_bounds = array<i64: 2, 16, 32>}]} {
    %c0 = arith.constant 0 : index
    %c0_0 = arith.constant 0 : index
    %0 = vector.load %arg6[%c0, %c0_0] : memref<16x32xf32, #tpu.memory_space<vmem>>, vector<16x32xf32>
    %1 = vector.extract_strided_slice %0 {offsets = [0, 0], sizes = [1, 32], strides = [1, 1]} : vector<16x32xf32> to vector<1x32xf32>
    %2 = vector.extract_strided_slice %0 {offsets = [1, 0], sizes = [1, 32], strides = [1, 1]} : vector<16x32xf32> to vector<1x32xf32>
    %3 = vector.extract_strided_slice %0 {offsets = [2, 0], sizes = [1, 32], strides = [1, 1]} : vector<16x32xf32> to vector<1x32xf32>
    %4 = vector.extract_strided_slice %0 {offsets = [3, 0], sizes = [1, 32], strides = [1, 1]} : vector<16x32xf32> to vector<1x32xf32>
    %5 = vector.extract_strided_slice %0 {offsets = [4, 0], sizes = [1, 32], strides = [1, 1]} : vector<16x32xf32> to vector<1x32xf32>
    %6 = vector.extract_strided_slice %0 {offsets = [5, 0], sizes = [1, 32], strides = [1, 1]} : vector<16x32xf32> to vector<1x32xf32>
    %7 = vector.extract_strided_slice %0 {offsets = [6, 0], sizes = [1, 32], strides = [1, 1]} : vector<16x32xf32> to vector<1x32xf32>
    %8 = vector.extract_strided_slice %0 {offsets = [7, 0], sizes = [1, 32], strides = [1, 1]} : vector<16x32xf32> to vector<1x32xf32>
    %9 = vector.extract_strided_slice %0 {offsets = [8, 0], sizes = [1, 32], strides = [1, 1]} : vector<16x32xf32> to vector<1x32xf32>
    %10 = vector.extract_strided_slice %0 {offsets = [9, 0], sizes = [1, 32], strides = [1, 1]} : vector<16x32xf32> to vector<1x32xf32>
    %c0_1 = arith.constant 0 : index
    %c0_2 = arith.constant 0 : index
    %c0_3 = arith.constant 0 : index
    %11 = vector.load %arg2[%c0_1, %c0_2, %c0_3] : memref<2x16x32xbf16, #tpu.memory_space<vmem>>, vector<2x16x32xbf16>
    %12 = vector.shape_cast %11 : vector<2x16x32xbf16> to vector<32x32xbf16>
    %13 = arith.extf %12 : vector<32x32xbf16> to vector<32x32xf32>
    %c2_i32 = arith.constant 2 : i32
    %14 = arith.muli %arg0, %c2_i32 : i32
    %15 = tpu.iota {dimensions = array<i32: 1>} : vector<1x16xi32>
    %16 = tpu.iota {dimensions = array<i32: 0>} : vector<16x1xi32>
    %c0_i32 = arith.constant 0 : i32
    %17 = arith.addi %14, %c0_i32 : i32
    %18 = arith.index_cast %17 : i32 to index
    %19 = memref.load %arg1[%18] : memref<4xi32, #tpu.memory_space<smem>>
    %20 = vector.broadcast %19 : i32 to vector<1x16xi32>
    %21 = arith.cmpi slt, %15, %20 : vector<1x16xi32>
    %cst = arith.constant 0.000000e+00 : f32
    %cst_4 = arith.constant -1.000000e+09 : f32
    %22 = vector.broadcast %cst : f32 to vector<1x16xf32>
    %23 = vector.broadcast %cst_4 : f32 to vector<1x16xf32>
    %24 = arith.select %21, %22, %23 : vector<1x16xi1>, vector<1x16xf32>
    %25 = vector.broadcast %19 : i32 to vector<16x1xi32>
    %26 = arith.cmpi slt, %16, %25 : vector<16x1xi32>
    %27 = arith.extui %26 : vector<16x1xi1> to vector<16x1xi32>
    %28 = arith.sitofp %27 : vector<16x1xi32> to vector<16x1xf32>
    %c1_i32 = arith.constant 1 : i32
    %29 = arith.addi %14, %c1_i32 : i32
    %30 = arith.index_cast %29 : i32 to index
    %31 = memref.load %arg1[%30] : memref<4xi32, #tpu.memory_space<smem>>
    %32 = vector.broadcast %31 : i32 to vector<1x16xi32>
    %33 = arith.cmpi slt, %15, %32 : vector<1x16xi32>
    %cst_5 = arith.constant 0.000000e+00 : f32
    %cst_6 = arith.constant -1.000000e+09 : f32
    %34 = vector.broadcast %cst_5 : f32 to vector<1x16xf32>
    %35 = vector.broadcast %cst_6 : f32 to vector<1x16xf32>
    %36 = arith.select %33, %34, %35 : vector<1x16xi1>, vector<1x16xf32>
    %37 = vector.broadcast %31 : i32 to vector<16x1xi32>
    %38 = arith.cmpi slt, %16, %37 : vector<16x1xi32>
    %39 = arith.extui %38 : vector<16x1xi1> to vector<16x1xi32>
    %40 = arith.sitofp %39 : vector<16x1xi32> to vector<16x1xf32>
    %41 = tpu.concatenate %28, %40 in 0 : vector<16x1xf32>, vector<16x1xf32> -> vector<32x1xf32>
    %c0_7 = arith.constant 0 : index
    %c0_8 = arith.constant 0 : index
    %42 = vector.load %arg4[%c0_7, %c0_8] : memref<32x96xbf16, #tpu.memory_space<vmem>>, vector<32x96xbf16>
    %cst_9 = arith.constant dense<0.000000e+00> : vector<32x96xf32>
    %43 = tpu.matmul %12, %42, %cst_9 {dimension_numbers = #tpu.dot_dimension_numbers<[1], [0], [0], [1], [0, 0, 1, 1], [], []>} : vector<32x32xbf16>, vector<32x96xbf16>, vector<32x96xf32> -> vector<32x96xf32>
    %44 = vector.extract_strided_slice %43 {offsets = [0, 0], sizes = [32, 32], strides = [1, 1]} : vector<32x96xf32> to vector<32x32xf32>
    %45 = vector.broadcast %1 : vector<1x32xf32> to vector<32x32xf32>
    %46 = arith.addf %44, %45 : vector<32x32xf32>
    %cst_10 = arith.constant 0.353553385 : f32
    %47 = vector.broadcast %cst_10 : f32 to vector<32x32xf32>
    %48 = arith.mulf %46, %47 : vector<32x32xf32>
    %49 = arith.truncf %48 : vector<32x32xf32> to vector<32x32xbf16>
    %50 = vector.extract_strided_slice %43 {offsets = [0, 32], sizes = [32, 32], strides = [1, 1]} : vector<32x96xf32> to vector<32x32xf32>
    %51 = vector.broadcast %2 : vector<1x32xf32> to vector<32x32xf32>
    %52 = arith.addf %50, %51 : vector<32x32xf32>
    %53 = arith.truncf %52 : vector<32x32xf32> to vector<32x32xbf16>
    %54 = vector.extract_strided_slice %43 {offsets = [0, 64], sizes = [32, 32], strides = [1, 1]} : vector<32x96xf32> to vector<32x32xf32>
    %55 = vector.broadcast %3 : vector<1x32xf32> to vector<32x32xf32>
    %56 = arith.addf %54, %55 : vector<32x32xf32>
    %57 = arith.truncf %56 : vector<32x32xf32> to vector<32x32xbf16>
    %58 = vector.extract_strided_slice %49 {offsets = [0, 0], sizes = [16, 8], strides = [1, 1]} : vector<32x32xbf16> to vector<16x8xbf16>
    %59 = vector.extract_strided_slice %53 {offsets = [0, 0], sizes = [16, 8], strides = [1, 1]} : vector<32x32xbf16> to vector<16x8xbf16>
    %60 = vector.extract_strided_slice %57 {offsets = [0, 0], sizes = [16, 8], strides = [1, 1]} : vector<32x32xbf16> to vector<16x8xbf16>
    %cst_11 = arith.constant dense<0.000000e+00> : vector<16x16xf32>
    %61 = tpu.matmul %58, %59, %cst_11 {dimension_numbers = #tpu.dot_dimension_numbers<[1], [1], [0], [0], [0, 0, 1, 0], [], []>} : vector<16x8xbf16>, vector<16x8xbf16>, vector<16x16xf32> -> vector<16x16xf32>
    %62 = vector.broadcast %24 : vector<1x16xf32> to vector<16x16xf32>
    %63 = arith.addf %61, %62 : vector<16x16xf32>
    %cst_12 = arith.constant dense<0xFF800000> : vector<16xf32>
    %64 = vector.multi_reduction <maximumf>, %63, %cst_12 [1] : vector<16x16xf32> to vector<16xf32>
    %65 = vector.shape_cast %64 : vector<16xf32> to vector<16x1xf32>
    %66 = vector.broadcast %65 : vector<16x1xf32> to vector<16x16xf32>
    %67 = arith.subf %63, %66 : vector<16x16xf32>
    %68 = math.exp %67 : vector<16x16xf32>
    %cst_13 = arith.constant dense<0.000000e+00> : vector<16xf32>
    %69 = vector.multi_reduction <add>, %68, %cst_13 [1] : vector<16x16xf32> to vector<16xf32>
    %70 = vector.shape_cast %69 : vector<16xf32> to vector<16x1xf32>
    %71 = tpu.reciprocal %70 {approx = true} : vector<16x1xf32> -> vector<16x1xf32>
    %72 = vector.broadcast %71 : vector<16x1xf32> to vector<16x16xf32>
    %73 = arith.mulf %68, %72 : vector<16x16xf32>
    %74 = arith.truncf %73 : vector<16x16xf32> to vector<16x16xbf16>
    %cst_14 = arith.constant dense<0.000000e+00> : vector<16x8xf32>
    %75 = tpu.matmul %74, %60, %cst_14 {dimension_numbers = #tpu.dot_dimension_numbers<[1], [0], [0], [1], [0, 0, 1, 1], [], []>} : vector<16x16xbf16>, vector<16x8xbf16>, vector<16x8xf32> -> vector<16x8xf32>
    %c0_15 = arith.constant 0 : index
    %c0_16 = arith.constant 0 : index
    %76 = vector.load %arg10[%c0_15, %c0_16] : memref<32x32xf32, #tpu.memory_space<vmem>>, vector<16x8xf32>
    tpu.vector_store %arg10[%c0_15, %c0_16], %75 {strides = array<i32>} : memref<32x32xf32, #tpu.memory_space<vmem>>, vector<16x8xf32>,
    %77 = vector.extract_strided_slice %49 {offsets = [0, 8], sizes = [16, 8], strides = [1, 1]} : vector<32x32xbf16> to vector<16x8xbf16>
    %78 = vector.extract_strided_slice %53 {offsets = [0, 8], sizes = [16, 8], strides = [1, 1]} : vector<32x32xbf16> to vector<16x8xbf16>
    %79 = vector.extract_strided_slice %57 {offsets = [0, 8], sizes = [16, 8], strides = [1, 1]} : vector<32x32xbf16> to vector<16x8xbf16>
    %cst_17 = arith.constant dense<0.000000e+00> : vector<16x16xf32>
    %80 = tpu.matmul %77, %78, %cst_17 {dimension_numbers = #tpu.dot_dimension_numbers<[1], [1], [0], [0], [0, 0, 1, 0], [], []>} : vector<16x8xbf16>, vector<16x8xbf16>, vector<16x16xf32> -> vector<16x16xf32>
    %81 = vector.broadcast %24 : vector<1x16xf32> to vector<16x16xf32>
    %82 = arith.addf %80, %81 : vector<16x16xf32>
    %cst_18 = arith.constant dense<0xFF800000> : vector<16xf32>
    %83 = vector.multi_reduction <maximumf>, %82, %cst_18 [1] : vector<16x16xf32> to vector<16xf32>
    %84 = vector.shape_cast %83 : vector<16xf32> to vector<16x1xf32>
    %85 = vector.broadcast %84 : vector<16x1xf32> to vector<16x16xf32>
    %86 = arith.subf %82, %85 : vector<16x16xf32>
    %87 = math.exp %86 : vector<16x16xf32>
    %cst_19 = arith.constant dense<0.000000e+00> : vector<16xf32>
    %88 = vector.multi_reduction <add>, %87, %cst_19 [1] : vector<16x16xf32> to vector<16xf32>
    %89 = vector.shape_cast %88 : vector<16xf32> to vector<16x1xf32>
    %90 = tpu.reciprocal %89 {approx = true} : vector<16x1xf32> -> vector<16x1xf32>
    %91 = vector.broadcast %90 : vector<16x1xf32> to vector<16x16xf32>
    %92 = arith.mulf %87, %91 : vector<16x16xf32>
    %93 = arith.truncf %92 : vector<16x16xf32> to vector<16x16xbf16>
    %cst_20 = arith.constant dense<0.000000e+00> : vector<16x8xf32>
    %94 = tpu.matmul %93, %79, %cst_20 {dimension_numbers = #tpu.dot_dimension_numbers<[1], [0], [0], [1], [0, 0, 1, 1], [], []>} : vector<16x16xbf16>, vector<16x8xbf16>, vector<16x8xf32> -> vector<16x8xf32>
    %c0_21 = arith.constant 0 : index
    %c8 = arith.constant 8 : index
    %95 = vector.load %arg10[%c0_21, %c8] : memref<32x32xf32, #tpu.memory_space<vmem>>, vector<16x8xf32>
    tpu.vector_store %arg10[%c0_21, %c8], %94 {strides = array<i32>} : memref<32x32xf32, #tpu.memory_space<vmem>>, vector<16x8xf32>,
    %96 = vector.extract_strided_slice %49 {offsets = [0, 16], sizes = [16, 8], strides = [1, 1]} : vector<32x32xbf16> to vector<16x8xbf16>
    %97 = vector.extract_strided_slice %53 {offsets = [0, 16], sizes = [16, 8], strides = [1, 1]} : vector<32x32xbf16> to vector<16x8xbf16>
    %98 = vector.extract_strided_slice %57 {offsets = [0, 16], sizes = [16, 8], strides = [1, 1]} : vector<32x32xbf16> to vector<16x8xbf16>
    %cst_22 = arith.constant dense<0.000000e+00> : vector<16x16xf32>
    %99 = tpu.matmul %96, %97, %cst_22 {dimension_numbers = #tpu.dot_dimension_numbers<[1], [1], [0], [0], [0, 0, 1, 0], [], []>} : vector<16x8xbf16>, vector<16x8xbf16>, vector<16x16xf32> -> vector<16x16xf32>
    %100 = vector.broadcast %24 : vector<1x16xf32> to vector<16x16xf32>
    %101 = arith.addf %99, %100 : vector<16x16xf32>
    %cst_23 = arith.constant dense<0xFF800000> : vector<16xf32>
    %102 = vector.multi_reduction <maximumf>, %101, %cst_23 [1] : vector<16x16xf32> to vector<16xf32>
    %103 = vector.shape_cast %102 : vector<16xf32> to vector<16x1xf32>
    %104 = vector.broadcast %103 : vector<16x1xf32> to vector<16x16xf32>
    %105 = arith.subf %101, %104 : vector<16x16xf32>
    %106 = math.exp %105 : vector<16x16xf32>
    %cst_24 = arith.constant dense<0.000000e+00> : vector<16xf32>
    %107 = vector.multi_reduction <add>, %106, %cst_24 [1] : vector<16x16xf32> to vector<16xf32>
    %108 = vector.shape_cast %107 : vector<16xf32> to vector<16x1xf32>
    %109 = tpu.reciprocal %108 {approx = true} : vector<16x1xf32> -> vector<16x1xf32>
    %110 = vector.broadcast %109 : vector<16x1xf32> to vector<16x16xf32>
    %111 = arith.mulf %106, %110 : vector<16x16xf32>
    %112 = arith.truncf %111 : vector<16x16xf32> to vector<16x16xbf16>
    %cst_25 = arith.constant dense<0.000000e+00> : vector<16x8xf32>
    %113 = tpu.matmul %112, %98, %cst_25 {dimension_numbers = #tpu.dot_dimension_numbers<[1], [0], [0], [1], [0, 0, 1, 1], [], []>} : vector<16x16xbf16>, vector<16x8xbf16>, vector<16x8xf32> -> vector<16x8xf32>
    %c0_26 = arith.constant 0 : index
    %c16 = arith.constant 16 : index
    %114 = vector.load %arg10[%c0_26, %c16] : memref<32x32xf32, #tpu.memory_space<vmem>>, vector<16x8xf32>
    tpu.vector_store %arg10[%c0_26, %c16], %113 {strides = array<i32>} : memref<32x32xf32, #tpu.memory_space<vmem>>, vector<16x8xf32>,
    %115 = vector.extract_strided_slice %49 {offsets = [0, 24], sizes = [16, 8], strides = [1, 1]} : vector<32x32xbf16> to vector<16x8xbf16>
    %116 = vector.extract_strided_slice %53 {offsets = [0, 24], sizes = [16, 8], strides = [1, 1]} : vector<32x32xbf16> to vector<16x8xbf16>
    %117 = vector.extract_strided_slice %57 {offsets = [0, 24], sizes = [16, 8], strides = [1, 1]} : vector<32x32xbf16> to vector<16x8xbf16>
    %cst_27 = arith.constant dense<0.000000e+00> : vector<16x16xf32>
    %118 = tpu.matmul %115, %116, %cst_27 {dimension_numbers = #tpu.dot_dimension_numbers<[1], [1], [0], [0], [0, 0, 1, 0], [], []>} : vector<16x8xbf16>, vector<16x8xbf16>, vector<16x16xf32> -> vector<16x16xf32>
    %119 = vector.broadcast %24 : vector<1x16xf32> to vector<16x16xf32>
    %120 = arith.addf %118, %119 : vector<16x16xf32>
    %cst_28 = arith.constant dense<0xFF800000> : vector<16xf32>
    %121 = vector.multi_reduction <maximumf>, %120, %cst_28 [1] : vector<16x16xf32> to vector<16xf32>
    %122 = vector.shape_cast %121 : vector<16xf32> to vector<16x1xf32>
    %123 = vector.broadcast %122 : vector<16x1xf32> to vector<16x16xf32>
    %124 = arith.subf %120, %123 : vector<16x16xf32>
    %125 = math.exp %124 : vector<16x16xf32>
    %cst_29 = arith.constant dense<0.000000e+00> : vector<16xf32>
    %126 = vector.multi_reduction <add>, %125, %cst_29 [1] : vector<16x16xf32> to vector<16xf32>
    %127 = vector.shape_cast %126 : vector<16xf32> to vector<16x1xf32>
    %128 = tpu.reciprocal %127 {approx = true} : vector<16x1xf32> -> vector<16x1xf32>
    %129 = vector.broadcast %128 : vector<16x1xf32> to vector<16x16xf32>
    %130 = arith.mulf %125, %129 : vector<16x16xf32>
    %131 = arith.truncf %130 : vector<16x16xf32> to vector<16x16xbf16>
    %cst_30 = arith.constant dense<0.000000e+00> : vector<16x8xf32>
    %132 = tpu.matmul %131, %117, %cst_30 {dimension_numbers = #tpu.dot_dimension_numbers<[1], [0], [0], [1], [0, 0, 1, 1], [], []>} : vector<16x16xbf16>, vector<16x8xbf16>, vector<16x8xf32> -> vector<16x8xf32>
    %c0_31 = arith.constant 0 : index
    %c24 = arith.constant 24 : index
    %133 = vector.load %arg10[%c0_31, %c24] : memref<32x32xf32, #tpu.memory_space<vmem>>, vector<16x8xf32>
    tpu.vector_store %arg10[%c0_31, %c24], %132 {strides = array<i32>} : memref<32x32xf32, #tpu.memory_space<vmem>>, vector<16x8xf32>,
    %134 = vector.extract_strided_slice %49 {offsets = [16, 0], sizes = [16, 8], strides = [1, 1]} : vector<32x32xbf16> to vector<16x8xbf16>
    %135 = vector.extract_strided_slice %53 {offsets = [16, 0], sizes = [16, 8], strides = [1, 1]} : vector<32x32xbf16> to vector<16x8xbf16>
    %136 = vector.extract_strided_slice %57 {offsets = [16, 0], sizes = [16, 8], strides = [1, 1]} : vector<32x32xbf16> to vector<16x8xbf16>
    %cst_32 = arith.constant dense<0.000000e+00> : vector<16x16xf32>
    %137 = tpu.matmul %134, %135, %cst_32 {dimension_numbers = #tpu.dot_dimension_numbers<[1], [1], [0], [0], [0, 0, 1, 0], [], []>} : vector<16x8xbf16>, vector<16x8xbf16>, vector<16x16xf32> -> vector<16x16xf32>
    %138 = vector.broadcast %36 : vector<1x16xf32> to vector<16x16xf32>
    %139 = arith.addf %137, %138 : vector<16x16xf32>
    %cst_33 = arith.constant dense<0xFF800000> : vector<16xf32>
    %140 = vector.multi_reduction <maximumf>, %139, %cst_33 [1] : vector<16x16xf32> to vector<16xf32>
    %141 = vector.shape_cast %140 : vector<16xf32> to vector<16x1xf32>
    %142 = vector.broadcast %141 : vector<16x1xf32> to vector<16x16xf32>
    %143 = arith.subf %139, %142 : vector<16x16xf32>
    %144 = math.exp %143 : vector<16x16xf32>
    %cst_34 = arith.constant dense<0.000000e+00> : vector<16xf32>
    %145 = vector.multi_reduction <add>, %144, %cst_34 [1] : vector<16x16xf32> to vector<16xf32>
    %146 = vector.shape_cast %145 : vector<16xf32> to vector<16x1xf32>
    %147 = tpu.reciprocal %146 {approx = true} : vector<16x1xf32> -> vector<16x1xf32>
    %148 = vector.broadcast %147 : vector<16x1xf32> to vector<16x16xf32>
    %149 = arith.mulf %144, %148 : vector<16x16xf32>
    %150 = arith.truncf %149 : vector<16x16xf32> to vector<16x16xbf16>
    %cst_35 = arith.constant dense<0.000000e+00> : vector<16x8xf32>
    %151 = tpu.matmul %150, %136, %cst_35 {dimension_numbers = #tpu.dot_dimension_numbers<[1], [0], [0], [1], [0, 0, 1, 1], [], []>} : vector<16x16xbf16>, vector<16x8xbf16>, vector<16x8xf32> -> vector<16x8xf32>
    %c16_36 = arith.constant 16 : index
    %c0_37 = arith.constant 0 : index
    %152 = vector.load %arg10[%c16_36, %c0_37] : memref<32x32xf32, #tpu.memory_space<vmem>>, vector<16x8xf32>
    tpu.vector_store %arg10[%c16_36, %c0_37], %151 {strides = array<i32>} : memref<32x32xf32, #tpu.memory_space<vmem>>, vector<16x8xf32>,
    %153 = vector.extract_strided_slice %49 {offsets = [16, 8], sizes = [16, 8], strides = [1, 1]} : vector<32x32xbf16> to vector<16x8xbf16>
    %154 = vector.extract_strided_slice %53 {offsets = [16, 8], sizes = [16, 8], strides = [1, 1]} : vector<32x32xbf16> to vector<16x8xbf16>
    %155 = vector.extract_strided_slice %57 {offsets = [16, 8], sizes = [16, 8], strides = [1, 1]} : vector<32x32xbf16> to vector<16x8xbf16>
    %cst_38 = arith.constant dense<0.000000e+00> : vector<16x16xf32>
    %156 = tpu.matmul %153, %154, %cst_38 {dimension_numbers = #tpu.dot_dimension_numbers<[1], [1], [0], [0], [0, 0, 1, 0], [], []>} : vector<16x8xbf16>, vector<16x8xbf16>, vector<16x16xf32> -> vector<16x16xf32>
    %157 = vector.broadcast %36 : vector<1x16xf32> to vector<16x16xf32>
    %158 = arith.addf %156, %157 : vector<16x16xf32>
    %cst_39 = arith.constant dense<0xFF800000> : vector<16xf32>
    %159 = vector.multi_reduction <maximumf>, %158, %cst_39 [1] : vector<16x16xf32> to vector<16xf32>
    %160 = vector.shape_cast %159 : vector<16xf32> to vector<16x1xf32>
    %161 = vector.broadcast %160 : vector<16x1xf32> to vector<16x16xf32>
    %162 = arith.subf %158, %161 : vector<16x16xf32>
    %163 = math.exp %162 : vector<16x16xf32>
    %cst_40 = arith.constant dense<0.000000e+00> : vector<16xf32>
    %164 = vector.multi_reduction <add>, %163, %cst_40 [1] : vector<16x16xf32> to vector<16xf32>
    %165 = vector.shape_cast %164 : vector<16xf32> to vector<16x1xf32>
    %166 = tpu.reciprocal %165 {approx = true} : vector<16x1xf32> -> vector<16x1xf32>
    %167 = vector.broadcast %166 : vector<16x1xf32> to vector<16x16xf32>
    %168 = arith.mulf %163, %167 : vector<16x16xf32>
    %169 = arith.truncf %168 : vector<16x16xf32> to vector<16x16xbf16>
    %cst_41 = arith.constant dense<0.000000e+00> : vector<16x8xf32>
    %170 = tpu.matmul %169, %155, %cst_41 {dimension_numbers = #tpu.dot_dimension_numbers<[1], [0], [0], [1], [0, 0, 1, 1], [], []>} : vector<16x16xbf16>, vector<16x8xbf16>, vector<16x8xf32> -> vector<16x8xf32>
    %c16_42 = arith.constant 16 : index
    %c8_43 = arith.constant 8 : index
    %171 = vector.load %arg10[%c16_42, %c8_43] : memref<32x32xf32, #tpu.memory_space<vmem>>, vector<16x8xf32>
    tpu.vector_store %arg10[%c16_42, %c8_43], %170 {strides = array<i32>} : memref<32x32xf32, #tpu.memory_space<vmem>>, vector<16x8xf32>,
    %172 = vector.extract_strided_slice %49 {offsets = [16, 16], sizes = [16, 8], strides = [1, 1]} : vector<32x32xbf16> to vector<16x8xbf16>
    %173 = vector.extract_strided_slice %53 {offsets = [16, 16], sizes = [16, 8], strides = [1, 1]} : vector<32x32xbf16> to vector<16x8xbf16>
    %174 = vector.extract_strided_slice %57 {offsets = [16, 16], sizes = [16, 8], strides = [1, 1]} : vector<32x32xbf16> to vector<16x8xbf16>
    %cst_44 = arith.constant dense<0.000000e+00> : vector<16x16xf32>
    %175 = tpu.matmul %172, %173, %cst_44 {dimension_numbers = #tpu.dot_dimension_numbers<[1], [1], [0], [0], [0, 0, 1, 0], [], []>} : vector<16x8xbf16>, vector<16x8xbf16>, vector<16x16xf32> -> vector<16x16xf32>
    %176 = vector.broadcast %36 : vector<1x16xf32> to vector<16x16xf32>
    %177 = arith.addf %175, %176 : vector<16x16xf32>
    %cst_45 = arith.constant dense<0xFF800000> : vector<16xf32>
    %178 = vector.multi_reduction <maximumf>, %177, %cst_45 [1] : vector<16x16xf32> to vector<16xf32>
    %179 = vector.shape_cast %178 : vector<16xf32> to vector<16x1xf32>
    %180 = vector.broadcast %179 : vector<16x1xf32> to vector<16x16xf32>
    %181 = arith.subf %177, %180 : vector<16x16xf32>
    %182 = math.exp %181 : vector<16x16xf32>
    %cst_46 = arith.constant dense<0.000000e+00> : vector<16xf32>
    %183 = vector.multi_reduction <add>, %182, %cst_46 [1] : vector<16x16xf32> to vector<16xf32>
    %184 = vector.shape_cast %183 : vector<16xf32> to vector<16x1xf32>
    %185 = tpu.reciprocal %184 {approx = true} : vector<16x1xf32> -> vector<16x1xf32>
    %186 = vector.broadcast %185 : vector<16x1xf32> to vector<16x16xf32>
    %187 = arith.mulf %182, %186 : vector<16x16xf32>
    %188 = arith.truncf %187 : vector<16x16xf32> to vector<16x16xbf16>
    %cst_47 = arith.constant dense<0.000000e+00> : vector<16x8xf32>
    %189 = tpu.matmul %188, %174, %cst_47 {dimension_numbers = #tpu.dot_dimension_numbers<[1], [0], [0], [1], [0, 0, 1, 1], [], []>} : vector<16x16xbf16>, vector<16x8xbf16>, vector<16x8xf32> -> vector<16x8xf32>
    %c16_48 = arith.constant 16 : index
    %c16_49 = arith.constant 16 : index
    %190 = vector.load %arg10[%c16_48, %c16_49] : memref<32x32xf32, #tpu.memory_space<vmem>>, vector<16x8xf32>
    tpu.vector_store %arg10[%c16_48, %c16_49], %189 {strides = array<i32>} : memref<32x32xf32, #tpu.memory_space<vmem>>, vector<16x8xf32>,
    %191 = vector.extract_strided_slice %49 {offsets = [16, 24], sizes = [16, 8], strides = [1, 1]} : vector<32x32xbf16> to vector<16x8xbf16>
    %192 = vector.extract_strided_slice %53 {offsets = [16, 24], sizes = [16, 8], strides = [1, 1]} : vector<32x32xbf16> to vector<16x8xbf16>
    %193 = vector.extract_strided_slice %57 {offsets = [16, 24], sizes = [16, 8], strides = [1, 1]} : vector<32x32xbf16> to vector<16x8xbf16>
    %cst_50 = arith.constant dense<0.000000e+00> : vector<16x16xf32>
    %194 = tpu.matmul %191, %192, %cst_50 {dimension_numbers = #tpu.dot_dimension_numbers<[1], [1], [0], [0], [0, 0, 1, 0], [], []>} : vector<16x8xbf16>, vector<16x8xbf16>, vector<16x16xf32> -> vector<16x16xf32>
    %195 = vector.broadcast %36 : vector<1x16xf32> to vector<16x16xf32>
    %196 = arith.addf %194, %195 : vector<16x16xf32>
    %cst_51 = arith.constant dense<0xFF800000> : vector<16xf32>
    %197 = vector.multi_reduction <maximumf>, %196, %cst_51 [1] : vector<16x16xf32> to vector<16xf32>
    %198 = vector.shape_cast %197 : vector<16xf32> to vector<16x1xf32>
    %199 = vector.broadcast %198 : vector<16x1xf32> to vector<16x16xf32>
    %200 = arith.subf %196, %199 : vector<16x16xf32>
    %201 = math.exp %200 : vector<16x16xf32>
    %cst_52 = arith.constant dense<0.000000e+00> : vector<16xf32>
    %202 = vector.multi_reduction <add>, %201, %cst_52 [1] : vector<16x16xf32> to vector<16xf32>
    %203 = vector.shape_cast %202 : vector<16xf32> to vector<16x1xf32>
    %204 = tpu.reciprocal %203 {approx = true} : vector<16x1xf32> -> vector<16x1xf32>
    %205 = vector.broadcast %204 : vector<16x1xf32> to vector<16x16xf32>
    %206 = arith.mulf %201, %205 : vector<16x16xf32>
    %207 = arith.truncf %206 : vector<16x16xf32> to vector<16x16xbf16>
    %cst_53 = arith.constant dense<0.000000e+00> : vector<16x8xf32>
    %208 = tpu.matmul %207, %193, %cst_53 {dimension_numbers = #tpu.dot_dimension_numbers<[1], [0], [0], [1], [0, 0, 1, 1], [], []>} : vector<16x16xbf16>, vector<16x8xbf16>, vector<16x8xf32> -> vector<16x8xf32>
    %c16_54 = arith.constant 16 : index
    %c24_55 = arith.constant 24 : index
    %209 = vector.load %arg10[%c16_54, %c24_55] : memref<32x32xf32, #tpu.memory_space<vmem>>, vector<16x8xf32>
    tpu.vector_store %arg10[%c16_54, %c24_55], %208 {strides = array<i32>} : memref<32x32xf32, #tpu.memory_space<vmem>>, vector<16x8xf32>,
    %c0_56 = arith.constant 0 : index
    %c0_57 = arith.constant 0 : index
    %210 = vector.load %arg10[%c0_56, %c0_57] : memref<32x32xf32, #tpu.memory_space<vmem>>, vector<32x32xf32>
    %211 = arith.truncf %210 : vector<32x32xf32> to vector<32x32xbf16>
    %c0_58 = arith.constant 0 : index
    %c0_59 = arith.constant 0 : index
    %212 = vector.load %arg5[%c0_58, %c0_59] : memref<32x32xbf16, #tpu.memory_space<vmem>>, vector<32x32xbf16>
    %cst_60 = arith.constant dense<0.000000e+00> : vector<32x32xf32>
    %213 = tpu.matmul %211, %212, %cst_60 {dimension_numbers = #tpu.dot_dimension_numbers<[1], [0], [0], [1], [0, 0, 1, 1], [], []>} : vector<32x32xbf16>, vector<32x32xbf16>, vector<32x32xf32> -> vector<32x32xf32>
    %214 = vector.broadcast %4 : vector<1x32xf32> to vector<32x32xf32>
    %215 = arith.addf %213, %214 : vector<32x32xf32>
    %216 = arith.addf %215, %13 : vector<32x32xf32>
    %cst_61 = arith.constant dense<0.000000e+00> : vector<32xf32>
    %217 = vector.multi_reduction <add>, %216, %cst_61 [1] : vector<32x32xf32> to vector<32xf32>
    %218 = vector.shape_cast %217 : vector<32xf32> to vector<32x1xf32>
    %cst_62 = arith.constant 3.200000e+01 : f32
    %219 = vector.broadcast %cst_62 : f32 to vector<32x1xf32>
    %220 = arith.divf %218, %219 : vector<32x1xf32>
    %221 = vector.broadcast %220 : vector<32x1xf32> to vector<32x32xf32>
    %222 = arith.subf %216, %221 : vector<32x32xf32>
    %223 = arith.mulf %222, %222 : vector<32x32xf32>
    %cst_63 = arith.constant dense<0.000000e+00> : vector<32xf32>
    %224 = vector.multi_reduction <add>, %223, %cst_63 [1] : vector<32x32xf32> to vector<32xf32>
    %225 = vector.shape_cast %224 : vector<32xf32> to vector<32x1xf32>
    %cst_64 = arith.constant 3.200000e+01 : f32
    %226 = vector.broadcast %cst_64 : f32 to vector<32x1xf32>
    %227 = arith.divf %225, %226 : vector<32x1xf32>
    %cst_65 = arith.constant 9.99999974E-6 : f32
    %228 = vector.broadcast %cst_65 : f32 to vector<32x1xf32>
    %229 = arith.addf %227, %228 : vector<32x1xf32>
    %230 = math.rsqrt %229 : vector<32x1xf32>
    %231 = vector.broadcast %230 : vector<32x1xf32> to vector<32x32xf32>
    %232 = arith.mulf %222, %231 : vector<32x32xf32>
    %233 = vector.broadcast %5 : vector<1x32xf32> to vector<32x32xf32>
    %234 = arith.mulf %232, %233 : vector<32x32xf32>
    %235 = vector.broadcast %6 : vector<1x32xf32> to vector<32x32xf32>
    %236 = arith.addf %234, %235 : vector<32x32xf32>
    %237 = vector.broadcast %41 : vector<32x1xf32> to vector<32x32xf32>
    %238 = arith.mulf %236, %237 : vector<32x32xf32>
    %239 = tpu.concatenate %16, %16 in 0 : vector<16x1xi32>, vector<16x1xi32> -> vector<32x1xi32>
    %c0_i32_66 = arith.constant 0 : i32
    %240 = vector.broadcast %c0_i32_66 : i32 to vector<32x1xi32>
    %241 = arith.cmpi sgt, %239, %240 : vector<32x1xi32>
    %242 = arith.extui %241 : vector<32x1xi1> to vector<32x1xi32>
    %243 = arith.sitofp %242 : vector<32x1xi32> to vector<32x1xf32>
    %c15_i32 = arith.constant 15 : i32
    %244 = vector.broadcast %c15_i32 : i32 to vector<32x1xi32>
    %245 = arith.cmpi slt, %239, %244 : vector<32x1xi32>
    %246 = arith.extui %245 : vector<32x1xi1> to vector<32x1xi32>
    %247 = arith.sitofp %246 : vector<32x1xi32> to vector<32x1xf32>
    %cst_67 = arith.constant 0.000000e+00 : f32
    %248 = vector.broadcast %cst_67 : f32 to vector<1x32xf32>
    %249 = vector.extract_strided_slice %238 {offsets = [0, 0], sizes = [31, 32], strides = [1, 1]} : vector<32x32xf32> to vector<31x32xf32>
    %250 = tpu.concatenate %248, %249 in 0 : vector<1x32xf32>, vector<31x32xf32> -> vector<32x32xf32>
    %251 = vector.broadcast %243 : vector<32x1xf32> to vector<32x32xf32>
    %252 = arith.mulf %250, %251 : vector<32x32xf32>
    %253 = vector.extract_strided_slice %238 {offsets = [1, 0], sizes = [31, 32], strides = [1, 1]} : vector<32x32xf32> to vector<31x32xf32>
    %254 = tpu.concatenate %253, %248 in 0 : vector<31x32xf32>, vector<1x32xf32> -> vector<32x32xf32>
    %255 = vector.broadcast %247 : vector<32x1xf32> to vector<32x32xf32>
    %256 = arith.mulf %254, %255 : vector<32x32xf32>
    %257 = tpu.concatenate %252, %238, %256 in 1 : vector<32x32xf32>, vector<32x32xf32>, vector<32x32xf32> -> vector<32x96xf32>
    %258 = arith.truncf %257 : vector<32x96xf32> to vector<32x96xbf16>
    %c0_68 = arith.constant 0 : index
    %c0_69 = arith.constant 0 : index
    %259 = vector.load %arg7[%c0_68, %c0_69] : memref<96x32xbf16, #tpu.memory_space<vmem>>, vector<96x32xbf16>
    %cst_70 = arith.constant dense<0.000000e+00> : vector<32x32xf32>
    %260 = tpu.matmul %258, %259, %cst_70 {dimension_numbers = #tpu.dot_dimension_numbers<[1], [0], [0], [1], [0, 0, 1, 1], [], []>} : vector<32x96xbf16>, vector<96x32xbf16>, vector<32x32xf32> -> vector<32x32xf32>
    %261 = vector.broadcast %7 : vector<1x32xf32> to vector<32x32xf32>
    %262 = arith.addf %260, %261 : vector<32x32xf32>
    %cst_71 = arith.constant 0.000000e+00 : f32
    %263 = vector.broadcast %cst_71 : f32 to vector<32x32xf32>
    %264 = arith.maximumf %262, %263 : vector<32x32xf32>
    %cst_72 = arith.constant 0.000000e+00 : f32
    %265 = vector.broadcast %cst_72 : f32 to vector<1x32xf32>
    %266 = vector.extract_strided_slice %264 {offsets = [0, 0], sizes = [31, 32], strides = [1, 1]} : vector<32x32xf32> to vector<31x32xf32>
    %267 = tpu.concatenate %265, %266 in 0 : vector<1x32xf32>, vector<31x32xf32> -> vector<32x32xf32>
    %268 = vector.broadcast %243 : vector<32x1xf32> to vector<32x32xf32>
    %269 = arith.mulf %267, %268 : vector<32x32xf32>
    %270 = vector.extract_strided_slice %264 {offsets = [1, 0], sizes = [31, 32], strides = [1, 1]} : vector<32x32xf32> to vector<31x32xf32>
    %271 = tpu.concatenate %270, %265 in 0 : vector<31x32xf32>, vector<1x32xf32> -> vector<32x32xf32>
    %272 = vector.broadcast %247 : vector<32x1xf32> to vector<32x32xf32>
    %273 = arith.mulf %271, %272 : vector<32x32xf32>
    %274 = tpu.concatenate %269, %264, %273 in 1 : vector<32x32xf32>, vector<32x32xf32>, vector<32x32xf32> -> vector<32x96xf32>
    %275 = arith.truncf %274 : vector<32x96xf32> to vector<32x96xbf16>
    %c0_73 = arith.constant 0 : index
    %c0_74 = arith.constant 0 : index
    %276 = vector.load %arg8[%c0_73, %c0_74] : memref<96x32xbf16, #tpu.memory_space<vmem>>, vector<96x32xbf16>
    %cst_75 = arith.constant dense<0.000000e+00> : vector<32x32xf32>
    %277 = tpu.matmul %275, %276, %cst_75 {dimension_numbers = #tpu.dot_dimension_numbers<[1], [0], [0], [1], [0, 0, 1, 1], [], []>} : vector<32x96xbf16>, vector<96x32xbf16>, vector<32x32xf32> -> vector<32x32xf32>
    %278 = vector.broadcast %8 : vector<1x32xf32> to vector<32x32xf32>
    %279 = arith.addf %277, %278 : vector<32x32xf32>
    %280 = arith.addf %279, %238 : vector<32x32xf32>
    %cst_76 = arith.constant dense<0.000000e+00> : vector<32xf32>
    %281 = vector.multi_reduction <add>, %280, %cst_76 [1] : vector<32x32xf32> to vector<32xf32>
    %282 = vector.shape_cast %281 : vector<32xf32> to vector<32x1xf32>
    %cst_77 = arith.constant 3.200000e+01 : f32
    %283 = vector.broadcast %cst_77 : f32 to vector<32x1xf32>
    %284 = arith.divf %282, %283 : vector<32x1xf32>
    %285 = vector.broadcast %284 : vector<32x1xf32> to vector<32x32xf32>
    %286 = arith.subf %280, %285 : vector<32x32xf32>
    %287 = arith.mulf %286, %286 : vector<32x32xf32>
    %cst_78 = arith.constant dense<0.000000e+00> : vector<32xf32>
    %288 = vector.multi_reduction <add>, %287, %cst_78 [1] : vector<32x32xf32> to vector<32xf32>
    %289 = vector.shape_cast %288 : vector<32xf32> to vector<32x1xf32>
    %cst_79 = arith.constant 3.200000e+01 : f32
    %290 = vector.broadcast %cst_79 : f32 to vector<32x1xf32>
    %291 = arith.divf %289, %290 : vector<32x1xf32>
    %cst_80 = arith.constant 9.99999974E-6 : f32
    %292 = vector.broadcast %cst_80 : f32 to vector<32x1xf32>
    %293 = arith.addf %291, %292 : vector<32x1xf32>
    %294 = math.rsqrt %293 : vector<32x1xf32>
    %295 = vector.broadcast %294 : vector<32x1xf32> to vector<32x32xf32>
    %296 = arith.mulf %286, %295 : vector<32x32xf32>
    %297 = vector.broadcast %9 : vector<1x32xf32> to vector<32x32xf32>
    %298 = arith.mulf %296, %297 : vector<32x32xf32>
    %299 = vector.broadcast %10 : vector<1x32xf32> to vector<32x32xf32>
    %300 = arith.addf %298, %299 : vector<32x32xf32>
    %c0_81 = arith.constant 0 : index
    %c0_82 = arith.constant 0 : index
    %c0_83 = arith.constant 0 : index
    %301 = vector.load %arg3[%c0_81, %c0_82, %c0_83] : memref<2x1x64xf32, #tpu.memory_space<vmem>>, vector<1x1x64xf32>
    %302 = vector.shape_cast %301 : vector<1x1x64xf32> to vector<1x64xf32>
    %303 = vector.extract_strided_slice %302 {offsets = [0, 0], sizes = [1, 32], strides = [1, 1]} : vector<1x64xf32> to vector<1x32xf32>
    %304 = vector.extract_strided_slice %302 {offsets = [0, 32], sizes = [1, 32], strides = [1, 1]} : vector<1x64xf32> to vector<1x32xf32>
    %305 = vector.extract_strided_slice %300 {offsets = [0, 0], sizes = [16, 32], strides = [1, 1]} : vector<32x32xf32> to vector<16x32xf32>
    %306 = vector.broadcast %303 : vector<1x32xf32> to vector<16x32xf32>
    %307 = arith.mulf %305, %306 : vector<16x32xf32>
    %308 = vector.broadcast %304 : vector<1x32xf32> to vector<16x32xf32>
    %309 = arith.addf %307, %308 : vector<16x32xf32>
    %310 = vector.broadcast %28 : vector<16x1xf32> to vector<16x32xf32>
    %311 = arith.mulf %309, %310 : vector<16x32xf32>
    %c0_84 = arith.constant 0 : index
    %c0_85 = arith.constant 0 : index
    %c0_86 = arith.constant 0 : index
    %312 = vector.load %arg9[%c0_84, %c0_85, %c0_86] : memref<2x16x32xf32, #tpu.memory_space<vmem>>, vector<1x16x32xf32>
    %313 = vector.shape_cast %312 : vector<1x16x32xf32> to vector<16x32xf32>
    %314 = vector.shape_cast %311 : vector<16x32xf32> to vector<1x16x32xf32>
    tpu.vector_store %arg9[%c0_84, %c0_85, %c0_86], %314 {strides = array<i32>} : memref<2x16x32xf32, #tpu.memory_space<vmem>>, vector<1x16x32xf32>,
    %c1 = arith.constant 1 : index
    %c0_87 = arith.constant 0 : index
    %c0_88 = arith.constant 0 : index
    %315 = vector.load %arg3[%c1, %c0_87, %c0_88] : memref<2x1x64xf32, #tpu.memory_space<vmem>>, vector<1x1x64xf32>
    %316 = vector.shape_cast %315 : vector<1x1x64xf32> to vector<1x64xf32>
    %317 = vector.extract_strided_slice %316 {offsets = [0, 0], sizes = [1, 32], strides = [1, 1]} : vector<1x64xf32> to vector<1x32xf32>
    %318 = vector.extract_strided_slice %316 {offsets = [0, 32], sizes = [1, 32], strides = [1, 1]} : vector<1x64xf32> to vector<1x32xf32>
    %319 = vector.extract_strided_slice %300 {offsets = [16, 0], sizes = [16, 32], strides = [1, 1]} : vector<32x32xf32> to vector<16x32xf32>
    %320 = vector.broadcast %317 : vector<1x32xf32> to vector<16x32xf32>
    %321 = arith.mulf %319, %320 : vector<16x32xf32>
    %322 = vector.broadcast %318 : vector<1x32xf32> to vector<16x32xf32>
    %323 = arith.addf %321, %322 : vector<16x32xf32>
    %324 = vector.broadcast %40 : vector<16x1xf32> to vector<16x32xf32>
    %325 = arith.mulf %323, %324 : vector<16x32xf32>
    %c1_89 = arith.constant 1 : index
    %c0_90 = arith.constant 0 : index
    %c0_91 = arith.constant 0 : index
    %326 = vector.load %arg9[%c1_89, %c0_90, %c0_91] : memref<2x16x32xf32, #tpu.memory_space<vmem>>, vector<1x16x32xf32>
    %327 = vector.shape_cast %326 : vector<1x16x32xf32> to vector<16x32xf32>
    %328 = vector.shape_cast %325 : vector<16x32xf32> to vector<1x16x32xf32>
    tpu.vector_store %arg9[%c1_89, %c0_90, %c0_91], %328 {strides = array<i32>} : memref<2x16x32xf32, #tpu.memory_space<vmem>>, vector<1x16x32xf32>,
    return
  }
  func.func @transform_0(%arg0: i32, %arg1: memref<4xi32, #tpu.memory_space<smem>>) -> (i32, i32, i32) {
    %c0_i32 = arith.constant 0 : i32
    %c0_i32_0 = arith.constant 0 : i32
    %c0_i32_1 = arith.constant 0 : i32
    return %arg0, %c0_i32, %c0_i32_0 : i32, i32, i32
  }
  func.func @transform_1(%arg0: i32, %arg1: memref<4xi32, #tpu.memory_space<smem>>) -> (i32, i32, i32) {
    %c0_i32 = arith.constant 0 : i32
    %c0_i32_0 = arith.constant 0 : i32
    %c0_i32_1 = arith.constant 0 : i32
    return %arg0, %c0_i32, %c0_i32_0 : i32, i32, i32
  }
  func.func @transform_2(%arg0: i32, %arg1: memref<4xi32, #tpu.memory_space<smem>>) -> (i32, i32) {
    %c0_i32 = arith.constant 0 : i32
    %c0_i32_0 = arith.constant 0 : i32
    %c0_i32_1 = arith.constant 0 : i32
    return %c0_i32, %c0_i32_0 : i32, i32
  }
  func.func @transform_3(%arg0: i32, %arg1: memref<4xi32, #tpu.memory_space<smem>>) -> (i32, i32) {
    %c0_i32 = arith.constant 0 : i32
    %c0_i32_0 = arith.constant 0 : i32
    %c0_i32_1 = arith.constant 0 : i32
    return %c0_i32, %c0_i32_0 : i32, i32
  }
  func.func @transform_4(%arg0: i32, %arg1: memref<4xi32, #tpu.memory_space<smem>>) -> (i32, i32) {
    %c0_i32 = arith.constant 0 : i32
    %c0_i32_0 = arith.constant 0 : i32
    %c0_i32_1 = arith.constant 0 : i32
    return %c0_i32, %c0_i32_0 : i32, i32
  }
  func.func @transform_5(%arg0: i32, %arg1: memref<4xi32, #tpu.memory_space<smem>>) -> (i32, i32) {
    %c0_i32 = arith.constant 0 : i32
    %c0_i32_0 = arith.constant 0 : i32
    %c0_i32_1 = arith.constant 0 : i32
    return %c0_i32, %c0_i32_0 : i32, i32
  }
  func.func @transform_6(%arg0: i32, %arg1: memref<4xi32, #tpu.memory_space<smem>>) -> (i32, i32) {
    %c0_i32 = arith.constant 0 : i32
    %c0_i32_0 = arith.constant 0 : i32
    %c0_i32_1 = arith.constant 0 : i32
    return %c0_i32, %c0_i32_0 : i32, i32
  }
  func.func @transform_7(%arg0: i32, %arg1: memref<4xi32, #tpu.memory_space<smem>>) -> (i32, i32, i32) {
    %c0_i32 = arith.constant 0 : i32
    %c0_i32_0 = arith.constant 0 : i32
    %c0_i32_1 = arith.constant 0 : i32
    return %arg0, %c0_i32, %c0_i32_0 : i32, i32, i32
  }
}

</mosaic_0001>

<bundles_post_ra>
// kernel: tpu_custom_call.1
= control target key start
LH: loop header
LB: loop body
LE: loop exit
PB: predicated region body
PF: predicated region fallthrough
CT: control target
= control target key end

     0   :  { %s2316_s30 = smov [#allocation4]   ;;  %s3138_s0 = inlined_call_operand.vmem [shape: s32[4], index: 0, kind: input, shape index: {}]   ;;  %s3139_s1 = inlined_call_operand.vmem [shape: bf16[4,16,32], index: 1, kind: input, shape index: {}]   ;;  %s3140_s2 = inlined_call_operand.vmem [shape: f32[4,1,64], index: 2, kind: input, shape index: {}]   ;;  %s3141_s3 = inlined_call_operand.vmem [shape: bf16[32,96], index: 3, kind: input, shape index: {}]   ;;  %s3142_s4 = inlined_call_operand.vmem [shape: bf16[32,32], index: 4, kind: input, shape index: {}]   ;;  %s3143_s5 = inlined_call_operand.vmem [shape: f32[16,32], index: 5, kind: input, shape index: {}]   ;;  %s3144_s6 = inlined_call_operand.vmem [shape: bf16[96,32], index: 6, kind: input, shape index: {}]   ;;  %s3145_s7 = inlined_call_operand.vmem [shape: bf16[96,32], index: 7, kind: input, shape index: {}]   ;;  %s3146_s8 = inlined_call_operand.hbm [shape: f32[4,16,32], index: 8, kind: output, shape index: {}]  }
   0x1   :  { %s14_s29 = sshll.u32 %s3138_s0, 4  ;;  %s15_s29 = int_to_ptr.vmem [resolvable:$true] %s14_s29 }
   0x2   :  { %17 = dma.vmem_to_smem %s15_s29, 16, %s2316_s30, [#allocation3] }
   0x3   :  { %2294 = dma.done.wait [#allocation3], 16 }
   0x4   :  { %2295 = vsyncadd [#allocation3], 4294967280 }
   0x5   :  { %20 = sfence }
   0x6   :  { %21 = vsyncpa [#allocation6], 0 }
   0x7   :  { %23 = vsyncpa [#allocation6 + $0x1], 0  ;;  %s2385_s9 = smov 0   ;;  %s2387_s10 = smov 0  }
   0x8   :  { %s2389_s11 = smov 0   ;;  %s2391_s12 = smov 0  }
   0x9 LB: > { %s2406_s0 = sadd.s32 4294967295, %s2314_s12   ;;  %s1870_s13 = sadd.s32 4294967294, %s2314_s12   ;;  %s2314_s12 = sphi %s2391_s12, %s3154_s12   ;;  %s2310_s11 = sphi %s2389_s11, %s3153_s11   ;;  %s2306_s10 = sphi %s2387_s10, %s3152_s10   ;;  %s2302_s9 = sphi %s2385_s9, %s3151_s9  }
   0xa   : > { %s2410_s14 = sadd.s32 1, %s2314_s12   ;;  %s193_s15 = sadd.s32 1, %s2310_s11 }
   0xb   : > { %s190_s16 = ssub.s32 %s2314_s12, %s2410_s14  ;;  %p203_p0 = scmp.ne.s32.totalorder %s2310_s11, %s2306_s10 }
   0xc   : > { %p191_p1 = scmp.eq.s32.totalorder %s190_s16, 0  ;;  %p204_p2 = scmp.eq.s32.totalorder %s2406_s0, 1 }
   0xd   : > { %p209_p3 = scmp.ne.s32.totalorder %s2306_s10, %s2302_s9  ;;  %p210_p4 = scmp.eq.s32.totalorder %s1870_s13, 1 }
   0xe   : > { %s2421_s17 = scalar_select %p191_p1, %s2310_s11, %s193_s15  }
   0xf   : > { %p2423_p5 = por %p204_p2, %p203_p0  ;;  %p2427_p6 = por %p210_p4, %p209_p3 }
  0x10   : > { %p1873_p7 = scmp.ge.s32.totalorder %s2314_s12, 1  ;;  %p261_p8 = scmp.lt.s32.totalorder %s2314_s12, 3 }
  0x12   : > { %p262_p9 = pnand %p1873_p7, %p261_p8 }
  0x13   : > { %s2437_s22 = sshll.u32 (!%p262_p9), %s2406_s0, 1  ;;  %s2317_s28 = smov (!%p262_p9), 32  }
  0x14   : > { %265 = sbr.rel (%p262_p9) target bundleno = 2876 (0xb3c), region = 48  ;;  %p299_p10 = scmp.lt.s32.totalorder (!%p262_p9), %s2437_s22, 3 }
  0x15   : > { %s2318_s16 = smov (!%p262_p9), 88   ;;  %s2319_s20 = smov (!%p262_p9), 120  }
  0x16   : > { %s328_s21 = sld [smem:[#allocation4 + %s2437_s22]] (!%p262_p9)  ;;  %s2321_s23 = smov (!%p262_p9), 96  }
  0x17   : > { %s2322_s24 = smov (!%p262_p9), 64   ;;  %s2323_s25 = smov (!%p262_p9), 72  }
  0x18   : > { %s2324_s26 = smov (!%p262_p9), 104   ;;  %s2326_s30 = smov (!%p262_p9), 80  }
  0x19   : > { %v2003_v0 = vld [vmem:[%s3141_s3 + $0x8] sm:$0xff]  ;;  %v2442_v1 = vld [vmem:[%s3143_s5] sm:$0xff]  ;;  %s2450_s27 = scalar_select %p299_p10, %s2437_s22, 3  ;;  %vm375_vm0 = vcmask 261120   ;;  %vm452_vm1 = vcmask 64512   ;;  %v323_v29 = vlaneseq  ;;  %vm473_vm3 = vcmask 130048  }
  0x1a   : > { %v414_v2 = vperm.slane %v2442_v1, 1  ;;  %388 = vmatpush.bf16.msra.mxu0 %v2003_v0  ;;  %v2002_v3 = vld [vmem:[%s3141_s3] sm:$0xff]  ;;  %v2464_v6 = vperm.slane %v2442_v1, 0  ;;  %v2320_v32 = vmov -1e+09   ;;  %v427_v41 = vperm.slane %v2442_v1, 2 }
  0x1b   : > { %s1999_s29 = sshll.u32 %s2450_s27, 3  ;;  %v2488_v30 = vand.u32 127, %v323_v29  ;;  %s2327_s13 = smov 112   ;;  %vm599_vm5 = vcmask 130112   ;;  %vm677_vm6 = vcmask 195712   ;;  %vm755_vm7 = vcmask 261312  }
  0x1c   : > { %416 = vrot.lane.b32.xlu0 %v414_v2, %s2317_s28  ;;  %s2457_s15 = scalar_lea.vmem %s3139_s1, %s1999_s29  ;;  %v2490_v31 = vstv %s328_s21  ;;  %s2325_s29 = smov 56  }
  0x1d   : > { %v2000_v4 = vld [vmem:[%s2457_s15] sm:$0xff]  ;;  %v2001_v5 = vld [vmem:[%s2457_s15 + $0x8] sm:$0xff]  ;;  %vm330_vm2 = vcmp.lt.s32.totalorder %v2488_v30, %v2490_v31  ;;  %s2329_s21 = smov 40  }
  0x1e   : > { %389 = vmatpush.bf16.msra.mxu0 %v2002_v3  ;;  %v2495_v33 = vsel %vm330_vm2, 0.0, %v2320_v32 }
  0x21   : > { %1900 = vmatmul.msk.bf16.vlgmr.msra.gmra.mxu0 %vm375_vm0, %v2000_v4 }
  0x31   : > { %1901 = vmatmul.msk.bf16.gmra.mxu0 %vm375_vm0, %v2001_v5 }
  0x8e   : > { %v417_v8 = vpop.permute.xlu0 %416 }
  0x9e   : > { %v2466_v7 = vpop.f32.mrf.mxu0 }
  0x9f   : > { %v402_v9 = vadd.f32 %v2464_v6, %v2466_v7  ;;  %v419_v10 = vadd.f32 %v417_v8, %v2466_v7 }
  0xa1   : > { %v406_v11 = vmul.f32 0.35355338, %v402_v9  ;;  %v423_v13 = vpack.c.bf16 %v419_v10, %v419_v10 }
  0xa3   : > { %v410_v16 = vpack.c.bf16 %v406_v11, %v406_v11  ;;  %v447_v19 = vunpack.c.l.b16 %v423_v13 }
  0xa5   : > { %v442_v22 = vunpack.c.l.b16 %v410_v16 }
  0xa6   : > { %v2471_v12 = vpop.f32.mrf.mxu0 }
  0xa7   : > { %v403_v14 = vadd.f32 %v2464_v6, %v2471_v12  ;;  %v420_v15 = vadd.f32 %v417_v8, %v2471_v12 }
  0xa9   : > { %v407_v17 = vmul.f32 0.35355338, %v403_v14  ;;  %v424_v18 = vpack.c.bf16 %v420_v15, %v420_v15 }
  0xab   : > { %v411_v20 = vpack.c.bf16 %v407_v17, %v407_v17  ;;  %v448_v21 = vunpack.c.l.b16 %v424_v18 }
  0xad   : > { %v443_v23 = vunpack.c.l.b16 %v411_v20  ;;  %v2476_v24 = vpack.c.b16 %v448_v21, %v447_v19 }
  0xae   : > { %v2501_v40 = vpop.f32.mrf.mxu0 }
  0xaf   : > { %v2478_v25 = vpack.c.b16 %v443_v23, %v442_v22  ;;  %526 = vrot.lane.b32.xlu0 %v2476_v24, %s2318_s16  ;;  %v421_v44 = vadd.f32 %v417_v8, %v2501_v40  ;;  %v404_v3 = vadd.f32 %v2464_v6, %v2501_v40 }
  0xb1   : > { %524 = vrot.lane.b32.xlu1 %v2478_v25, %s2319_s20  ;;  %v425_v46 = vpack.c.bf16 %v421_v44, %v421_v44  ;;  %v408_v5 = vmul.f32 0.35355338, %v404_v3 }
  0xb3   : > { %v765_v48 = vunpack.c.l.b16 %v425_v46 }
  0xb6   : > { %v2506_v42 = vpop.f32.mrf.mxu0 }
  0xb7   : > { %v422_v43 = vadd.f32 %v417_v8, %v2506_v42  ;;  %v405_v4 = vadd.f32 %v2464_v6, %v2506_v42  ;;  %v412_v8 = vpack.c.bf16 %v408_v5, %v408_v5 }
  0xb9   : > { %v426_v45 = vpack.c.bf16 %v422_v43, %v422_v43  ;;  %v760_v11 = vunpack.c.l.b16 %v412_v8 }
  0xbb   : > { %v766_v47 = vunpack.c.l.b16 %v426_v45 }
  0xbd   : > { %v767_v49 = vpack.c.b16 %v766_v47, %v765_v48 }
 0x121   : > { %v527_v26 = vpop.permute.xlu0 %526 }
 0x122   : > { %v532_v27 = vsel %vm452_vm1, %v527_v26, 0 }
 0x123   : > { %541 = vmatpush.bf16.xpose.msra.mxu3 %v532_v27  ;;  %v525_v28 = vpop.permute.xlu1 %524 }
 0x12a   : > { %1904 = vmatmul.msk.bf16.vlgmr.msra.gmra.mxu3 %vm452_vm1, %v525_v28 }
 0x1ad   : > { %v543_v34 = vpop.f32.mrf.mxu3 }
 0x1ae   : > { %v544_v35 = vadd.f32 %v543_v34, %v2495_v33 }
 0x1b0   : > { %v548_v36 = vsel %vm473_vm3, %v544_v35, -inf }
 0x1b1   : > { %549 = vmax.xlane.f32.xlu1 %v548_v36 }
 0x1b5   : > { %v545_v37 = vpop.f32.mrf.mxu3 }
 0x1b6   : > { %v546_v38 = vadd.f32 %v545_v37, %v2495_v33 }
 0x1b8   : > { %v551_v39 = vsel %vm473_vm3, %v546_v38, -inf }
 0x1b9   : > { %552 = vmax.xlane.f32.xlu2 %v551_v39 }
 0x1ca   : > { %450 = vrot.lane.b32.xlu1 %v2476_v24, %s2321_s23 }
 0x1d1   : > { %429 = vrot.lane.b32.xlu2 %v427_v41, %s2322_s24 }
 0x1d2   : > { %682 = vrot.lane.b32.xlu1 %v2476_v24, %s2323_s25 }
 0x1da   : > { %680 = vrot.lane.b32.xlu1 %v2478_v25, %s2324_s26 }
 0x1e2   : > { %842 = vrot.lane.b32.xlu1 %v767_v49, %s2318_s16  ;;  %s338_s16 = sadd.s32 1, %s2437_s22  ;;  %s2328_s22 = smov 48  }
 0x1ea   : > { %996 = vrot.lane.b32.xlu1 %v767_v49, %s2323_s25  ;;  %s3147_s25 = smov 8  }
 0x224   : > { %v550_v53 = vpop.xlane.xlu1 %549 }
 0x225   : > { %v554_v10 = vsub.f32 %v544_v35, %v550_v53 }
 0x227   : > { %v556_v13 = vmul.f32 1.442695, %v554_v10 }
 0x22c   : > { %v553_v50 = vpop.xlane.xlu2 %552 }
 0x22d   : > { %v555_v51 = vsub.f32 %v546_v38, %v553_v50 }
 0x22f   : > { %v558_v52 = vmul.f32 1.442695, %v555_v51 }
 0x231   : > { %2155 = vpow2.f32 %v558_v52 }
 0x232   : > { %2157 = vpow2.f32 %v556_v13 }
 0x234   : > { %v2515_v54 = vpop.permute.xlu2 %429 }
 0x235   : > { %v432_v55 = vadd.f32 %v2515_v54, %v2466_v7  ;;  %v433_v56 = vadd.f32 %v2515_v54, %v2471_v12  ;;  %v409_v7 = vmul.f32 0.35355338, %v405_v4 }
 0x237   : > { %v2156_v57 = vpop.eup %2155  ;;  %v436_v58 = vpack.c.bf16 %v432_v55, %v432_v55  ;;  %v437_v59 = vpack.c.bf16 %v433_v56, %v433_v56  ;;  %v413_v9 = vpack.c.bf16 %v409_v7, %v409_v7 }
 0x238   : > { %v563_v60 = vsel %vm473_vm3, %v2156_v57, 0.0  ;;  %v2158_v15 = vpop.eup %2157 }
 0x239   : > { %v499_v61 = vunpack.c.l.b16 %v436_v58  ;;  %v500_v62 = vunpack.c.l.b16 %v437_v59  ;;  %564 = vadd.xlane.f32.xlu2 %v563_v60  ;;  %v761_v12 = vunpack.c.l.b16 %v413_v9  ;;  %v560_v16 = vsel %vm473_vm3, %v2158_v15, 0.0 }
 0x23b   : > { %v2522_v63 = vpack.c.b16 %v500_v62, %v499_v61  ;;  %v762_v14 = vpack.c.b16 %v761_v12, %v760_v11 }
 0x23c   : > { %v451_v0 = vpop.permute.xlu1 %450 }
 0x23d   : > { %571 = vrot.lane.b32.xlu0 %v2522_v63, %s2325_s29  ;;  %v457_v2 = vsel %vm452_vm1, %v451_v0, 0 }
 0x23e   : > { %466 = vmatpush.bf16.xpose.msra.mxu1 %v457_v2 }
 0x244   : > { %v683_v17 = vpop.permute.xlu1 %682 }
 0x245   : > { %1902 = vmatmul.msk.bf16.vlgmr.msra.gmra.mxu1 %vm452_vm1, %v2478_v25  ;;  %v688_v19 = vsel %vm452_vm1, %v683_v17, 0 }
 0x24c   : > { %v681_v28 = vpop.permute.xlu1 %680 }
 0x251   : > { %604 = vrot.lane.b32.xlu2 %v2476_v24, %s2326_s30 }
 0x254   : > { %v843_v39 = vpop.permute.xlu1 %842 }
 0x255   : > { %v848_v43 = vsel %vm452_vm1, %v843_v39, 0 }
 0x259   : > { %919 = vrot.lane.b32.xlu2 %v767_v49, %s2326_s30  ;;  %s295_s30 = sand.u32 1, %s2306_s10  }
 0x25c   : > { %v997_v45 = vpop.permute.xlu1 %996 }
 0x25d   : > { %v1002_v48 = vsel %vm452_vm1, %v997_v45, 0 }
 0x261   : > { %994 = vrot.lane.b32.xlu2 %v762_v14, %s2324_s26  ;;  %s2331_s26 = smov 16  }
 0x267   : > { %561 = vadd.xlane.f32.xlu0 %v560_v16 }
 0x27b   : > { %602 = vrot.lane.b32.xlu0 %v2478_v25, %s2327_s13 }
 0x283   : > { %768 = vrot.lane.b32.xlu0 %v767_v49, %s2321_s23 }
 0x28b   : > { %840 = vrot.lane.b32.xlu0 %v762_v14, %s2319_s20  ;;  %s339_s20 = sld [smem:[#allocation4 + %s338_s16]] }
 0x291   : > { %v2562_v60 = vstv %s339_s20  ;;  %s2019_s20 = sshll.u32 %s2406_s0, 5  ;;  %s1783_s0 = scalar_lea.sflag [#allocation6], %s295_s30 }
 0x292   : > { %vm341_vm4 = vcmp.lt.s32.totalorder %v2488_v30, %v2562_v60 }
 0x293   : > { %917 = vrot.lane.b32.xlu0 %v762_v14, %s2327_s13  ;;  %v2569_v3 = vsel %vm341_vm4, 0.0, %v2320_v32  ;;  %s1874_s13 = sshll.u32 %s295_s30, 5 }
 0x294   : > { %s3085_s16 = scalar_lea.vmem [#allocation5], %s1874_s13 }
 0x2ac   : > { %v565_v6 = vpop.xlane.xlu2 %564 }
 0x2ad   : > { %2159 = vrcp.f32 %v565_v6 }
 0x2af   : > { %v572_v18 = vpop.permute.xlu0 %571 }
 0x2b0   : > { %584 = vmatpush.bf16.msra.mxu2 %v572_v18 }
 0x2b3   : > { %v2160_v35 = vpop.eup %2159 }
 0x2b4   : > { %697 = vmatpush.bf16.xpose.msrb.mxu2 %v688_v19  ;;  %v605_v20 = vpop.permute.xlu2 %604  ;;  %v569_v38 = vmul.f32 %v2160_v35, %v2156_v57 }
 0x2b5   : > { %v610_v21 = vsel %vm452_vm1, %v605_v20, 0 }
 0x2b6   : > { %619 = vmatpush.bf16.xpose.msrb.mxu1 %v610_v21 }
 0x2bc   : > { %v920_v46 = vpop.permute.xlu2 %919 }
 0x2bd   : > { %v925_v50 = vsel %vm452_vm1, %v920_v46, 0 }
 0x2c2   : > { %v468_v22 = vpop.f32.mrf.mxu1 }
 0x2c3   : > { %v2542_v23 = vadd.f32 %v468_v22, %v2495_v33 }
 0x2c4   : > { %v995_v53 = vpop.permute.xlu2 %994 }
 0x2c5   : > { %v474_v24 = vsel %vm473_vm3, %v2542_v23, -inf }
 0x2c6   : > { %475 = vmax.xlane.f32.xlu1 %v474_v24 }
 0x2ca   : > { %v470_v25 = vpop.f32.mrf.mxu1 }
 0x2cb   : > { %v471_v26 = vadd.f32 %v470_v25, %v2495_v33 }
 0x2cd   : > { %v477_v27 = vsel %vm473_vm3, %v471_v26, -inf }
 0x2ce   : > { %478 = vmax.xlane.f32.xlu0 %v477_v27 }
 0x2da   : > { %v562_v34 = vpop.xlane.xlu0 %561 }
 0x2db   : > { %2161 = vrcp.f32 %v562_v34 }
 0x2e1   : > { %v2162_v36 = vpop.eup %2161 }
 0x2e2   : > { %v568_v37 = vmul.f32 %v2162_v36, %v2158_v15 }
 0x2e4   : > { %v570_v41 = vpack.c.bf16 %v569_v38, %v568_v37 }
 0x2e6   : > { %1905 = vmatmul.msk.bf16.vlgmr.msra.gmra.mxu2 %vm473_vm3, %v570_v41 }
 0x2e7   : > { %857 = vmatpush.bf16.xpose.msra.mxu2 %v848_v43 }
 0x2ed   : > { %v603_v44 = vpop.permute.xlu0 %602 }
 0x2ee   : > { %1906 = vmatmul.msk.bf16.vlgmr.msrb.gmra.mxu1 %vm452_vm1, %v603_v44 }
 0x2f5   : > { %v769_v47 = vpop.permute.xlu0 %768 }
 0x2f6   : > { %v774_v49 = vsel %vm452_vm1, %v769_v47, 0  ;;  %1908 = vmatmul.msk.bf16.vlgmr.msrb.gmra.mxu2 %vm452_vm1, %v681_v28 }
 0x2f7   : > { %1011 = vmatpush.bf16.xpose.msrb.mxu2 %v1002_v48  ;;  %783 = vmatpush.bf16.xpose.msra.mxu1 %v774_v49 }
 0x2fd   : > { %v841_v51 = vpop.permute.xlu0 %840 }
 0x2fe   : > { %1910 = vmatmul.msk.bf16.vlgmr.msra.gmra.mxu1 %vm452_vm1, %v762_v14 }
 0x2ff   : > { %934 = vmatpush.bf16.xpose.msrb.mxu1 %v925_v50 }
 0x305   : > { %v918_v52 = vpop.permute.xlu0 %917 }
 0x306   : > { %1912 = vmatmul.msk.bf16.vlgmr.msra.gmra.mxu2 %vm452_vm1, %v841_v51 }
 0x30e   : > { %1914 = vmatmul.msk.bf16.vlgmr.msrb.gmra.mxu1 %vm452_vm1, %v918_v52 }
 0x316   : > { %1916 = vmatmul.msk.bf16.vlgmr.msrb.gmra.mxu2 %vm452_vm1, %v995_v53 }
 0x339   : > { %v476_v32 = vpop.xlane.xlu1 %475 }
 0x33a   : > { %v480_v14 = vsub.f32 %v2542_v23, %v476_v32 }
 0x33c   : > { %v482_v16 = vmul.f32 1.442695, %v480_v14 }
 0x341   : > { %v479_v58 = vpop.xlane.xlu0 %478 }
 0x342   : > { %v481_v62 = vsub.f32 %v471_v26, %v479_v58 }
 0x344   : > { %v484_v2 = vmul.f32 1.442695, %v481_v62  ;;  %v434_v62 = vadd.f32 %v2515_v54, %v2501_v40 }
 0x346   : > { %2163 = vpow2.f32 %v484_v2 }
 0x347   : > { %2165 = vpow2.f32 %v482_v16 }
 0x34c   : > { %v2573_v8 = vpop.eup %2163 }
 0x34d   : > { %v489_v30 = vsel %vm473_vm3, %v2573_v8, 0.0  ;;  %v2590_v19 = vpop.eup %2165 }
 0x34e   : > { %v486_v20 = vsel %vm473_vm3, %v2590_v19, 0.0 }
 0x369   : > { %v2596_v21 = vpop.f32.mrf.mxu2 }
 0x36b   : > { %v621_v55 = vpop.f32.mrf.mxu1 }
 0x36c   : > { %v622_v56 = vadd.f32 %v621_v55, %v2495_v33 }
 0x36e   : > { %v626_v57 = vsel %vm473_vm3, %v622_v56, -inf }
 0x36f   : > { %627 = vmax.xlane.f32.xlu2 %v626_v57 }
 0x371   : > { %v2600_v22 = vpop.f32.mrf.mxu2 }
 0x373   : > { %v623_v59 = vpop.f32.mrf.mxu1 }
 0x374   : > { %v624_v61 = vadd.f32 %v623_v59, %v2495_v33 }
 0x376   : > { %v629_v0 = vsel %vm473_vm3, %v624_v61, -inf }
 0x377   : > { %630 = vmax.xlane.f32.xlu1 %v629_v0  ;;  %v435_v0 = vadd.f32 %v2515_v54, %v2506_v42 }
 0x379   : > { %v699_v23 = vpop.f32.mrf.mxu2 }
 0x37a   : > { %v2603_v24 = vadd.f32 %v699_v23, %v2495_v33 }
 0x37b   : > { %v785_v4 = vpop.f32.mrf.mxu1 }
 0x37c   : > { %v786_v5 = vadd.f32 %v785_v4, %v2569_v3  ;;  %v704_v25 = vsel %vm473_vm3, %v2603_v24, -inf }
 0x37e   : > { %v790_v7 = vsel %vm473_vm3, %v786_v5, -inf }
 0x37f   : > { %791 = vmax.xlane.f32.xlu1 %v790_v7 }
 0x381   : > { %v701_v27 = vpop.f32.mrf.mxu2 }
 0x382   : > { %v2614_v43 = vadd.f32 %v701_v27, %v2495_v33 }
 0x383   : > { %v787_v9 = vpop.f32.mrf.mxu1 }
 0x384   : > { %v788_v10 = vadd.f32 %v787_v9, %v2569_v3  ;;  %v707_v47 = vsel %vm473_vm3, %v2614_v43, -inf }
 0x386   : > { %v793_v11 = vsel %vm473_vm3, %v788_v10, -inf }
 0x387   : > { %794 = vmax.xlane.f32.xlu0 %v793_v11  ;;  %490 = vadd.xlane.f32.xlu1 %v489_v30  ;;  %v439_v11 = vpack.c.bf16 %v435_v0, %v435_v0 }
 0x389   : > { %v859_v38 = vpop.f32.mrf.mxu2  ;;  %v816_v14 = vunpack.c.l.b16 %v439_v11 }
 0x38a   : > { %v2623_v50 = vadd.f32 %v859_v38, %v2569_v3 }
 0x38b   : > { %v936_v12 = vpop.f32.mrf.mxu1 }
 0x38c   : > { %v2580_v13 = vadd.f32 %v936_v12, %v2569_v3  ;;  %v864_v55 = vsel %vm473_vm3, %v2623_v50, -inf }
 0x38e   : > { %v941_v15 = vsel %vm473_vm3, %v2580_v13, -inf }
 0x38f   : > { %942 = vmax.xlane.f32.xlu0 %v941_v15 }
 0x391   : > { %v861_v49 = vpop.f32.mrf.mxu2 }
 0x392   : > { %v2632_v58 = vadd.f32 %v861_v49, %v2569_v3 }
 0x393   : > { %v938_v6 = vpop.f32.mrf.mxu1 }
 0x394   : > { %v2586_v17 = vadd.f32 %v938_v6, %v2569_v3  ;;  %v867_v59 = vsel %vm473_vm3, %v2632_v58, -inf }
 0x396   : > { %v944_v18 = vsel %vm473_vm3, %v2586_v17, -inf }
 0x397   : > { %945 = vmax.xlane.f32.xlu2 %v944_v18 }
 0x399   : > { %v1013_v57 = vpop.f32.mrf.mxu2 }
 0x39a   : > { %v2643_v2 = vadd.f32 %v1013_v57, %v2569_v3 }
 0x39c   : > { %v1018_v42 = vsel %vm473_vm3, %v2643_v2, -inf }
 0x39f   : > { %487 = vadd.xlane.f32.xlu2 %v486_v20 }
 0x3a1   : > { %v1015_v7 = vpop.f32.mrf.mxu2 }
 0x3a2   : > { %v2649_v40 = vadd.f32 %v1015_v7, %v2569_v3 }
 0x3a3   : > { %502 = vrot.lane.b32.xlu0 %v2522_v63, %s2322_s24 }
 0x3a4   : > { %v1021_v16 = vsel %vm473_vm3, %v2649_v40, -inf }
 0x3b7   : > { %649 = vrot.lane.b32.xlu2 %v2522_v63, %s2328_s22 }
 0x3cd   : > { %705 = vmax.xlane.f32.xlu0 %v704_v25 }
 0x3e1   : > { %727 = vrot.lane.b32.xlu0 %v2522_v63, %s2329_s21 }
 0x3e2   : > { %v628_v26 = vpop.xlane.xlu2 %627 }
 0x3e3   : > { %v632_v28 = vsub.f32 %v622_v56, %v628_v26 }
 0x3e5   : > { %v634_v34 = vmul.f32 1.442695, %v632_v28 }
 0x3e7   : > { %2167 = vpow2.f32 %v634_v34 }
 0x3ea   : > { %v631_v35 = vpop.xlane.xlu1 %630 }
 0x3eb   : > { %v633_v36 = vsub.f32 %v624_v61, %v631_v35 }
 0x3ed   : > { %v2609_v37 = vpop.eup %2167  ;;  %v636_v39 = vmul.f32 1.442695, %v633_v36 }
 0x3ee   : > { %v638_v41 = vsel %vm473_vm3, %v2609_v37, 0.0 }
 0x3ef   : > { %2169 = vpow2.f32 %v636_v39  ;;  %639 = vadd.xlane.f32.xlu2 %v638_v41 }
 0x3f2   : > { %v792_v63 = vpop.xlane.xlu1 %791 }
 0x3f3   : > { %v796_v44 = vsub.f32 %v786_v5, %v792_v63 }
 0x3f5   : > { %v2616_v45 = vpop.eup %2169  ;;  %v798_v46 = vmul.f32 1.442695, %v796_v44 }
 0x3f6   : > { %v641_v48 = vsel %vm473_vm3, %v2616_v45, 0.0 }
 0x3f7   : > { %2171 = vpow2.f32 %v798_v46  ;;  %708 = vmax.xlane.f32.xlu2 %v707_v47  ;;  %642 = vadd.xlane.f32.xlu1 %v641_v48 }
 0x3fa   : > { %v795_v33 = vpop.xlane.xlu0 %794  ;;  %v491_v30 = vpop.xlane.xlu1 %490 }
 0x3fb   : > { %v797_v51 = vsub.f32 %v788_v10, %v795_v33  ;;  %v438_v10 = vpack.c.bf16 %v434_v62, %v434_v62 }
 0x3fd   : > { %v2625_v52 = vpop.eup %2171  ;;  %v800_v53 = vmul.f32 1.442695, %v797_v51  ;;  %v815_v54 = vunpack.c.l.b16 %v438_v10 }
 0x3fe   : > { %v802_v56 = vsel %vm473_vm3, %v2625_v52, 0.0 }
 0x3ff   : > { %865 = vmax.xlane.f32.xlu2 %v864_v55  ;;  %803 = vadd.xlane.f32.xlu1 %v802_v56  ;;  %2173 = vpow2.f32 %v800_v53 }
 0x400   : > { %2175 = vrcp.f32 %v491_v30 }
 0x402   : > { %v943_v32 = vpop.xlane.xlu0 %942 }
 0x403   : > { %v947_v36 = vsub.f32 %v2580_v13, %v943_v32 }
 0x405   : > { %v2636_v61 = vpop.eup %2173  ;;  %v949_v39 = vmul.f32 1.442695, %v947_v36 }
 0x406   : > { %v805_v5 = vsel %vm473_vm3, %v2636_v61, 0.0  ;;  %v2176_v18 = vpop.eup %2175 }
 0x407   : > { %868 = vmax.xlane.f32.xlu1 %v867_v59  ;;  %v495_v23 = vmul.f32 %v2176_v18, %v2573_v8 }
 0x40a   : > { %v946_v4 = vpop.xlane.xlu2 %945 }
 0x40b   : > { %v948_v9 = vsub.f32 %v2586_v17, %v946_v4  ;;  %806 = vadd.xlane.f32.xlu0 %v805_v5  ;;  %v2655_v17 = vpack.c.b16 %v816_v14, %v815_v54 }
 0x40d   : > { %v951_v12 = vmul.f32 1.442695, %v948_v9 }
 0x40f   : > { %1019 = vmax.xlane.f32.xlu1 %v1018_v42  ;;  %2177 = vpow2.f32 %v951_v12 }
 0x412   : > { %v488_v15 = vpop.xlane.xlu2 %487 }
 0x413   : > { %2179 = vrcp.f32 %v488_v15  ;;  %1022 = vmax.xlane.f32.xlu0 %v1021_v16 }
 0x415   : > { %v503_v6 = vpop.permute.xlu0 %502  ;;  %v2657_v3 = vpop.eup %2177 }
 0x416   : > { %515 = vmatpush.bf16.msrb.mxu0 %v503_v6  ;;  %v956_v27 = vsel %vm473_vm3, %v2657_v3, 0.0 }
 0x417   : > { %818 = vrot.lane.b32.xlu2 %v2655_v17, %s2322_s24 }
 0x419   : > { %v2180_v20 = vpop.eup %2179 }
 0x41a   : > { %v494_v25 = vmul.f32 %v2180_v20, %v2590_v19  ;;  %v650_v26 = vpop.permute.xlu2 %649 }
 0x41b   : > { %662 = vmatpush.bf16.msrb.mxu3 %v650_v26  ;;  %957 = vadd.xlane.f32.xlu0 %v956_v27 }
 0x41c   : > { %v496_v28 = vpack.c.bf16 %v495_v23, %v494_v25 }
 0x41e   : > { %1903 = vmatmul.msk.bf16.vlgmr.msrb.gmra.mxu0 %vm473_vm3, %v496_v28 }
 0x440   : > { %v706_v34 = vpop.xlane.xlu0 %705 }
 0x441   : > { %v710_v35 = vsub.f32 %v2603_v24, %v706_v34 }
 0x443   : > { %v712_v38 = vmul.f32 1.442695, %v710_v35 }
 0x445   : > { %2181 = vpow2.f32 %v712_v38 }
 0x446   : > { %2183 = vpow2.f32 %v949_v39 }
 0x44b   : > { %v2668_v8 = vpop.eup %2181 }
 0x44c   : > { %v716_v19 = vsel %vm473_vm3, %v2668_v8, 0.0  ;;  %v2672_v41 = vpop.eup %2183 }
 0x44d   : > { %717 = vadd.xlane.f32.xlu2 %v716_v19  ;;  %v953_v44 = vsel %vm473_vm3, %v2672_v41, 0.0 }
 0x453   : > { %v728_v63 = vpop.permute.xlu0 %727 }
 0x454   : > { %740 = vmatpush.bf16.msra.mxu0 %v728_v63 }
 0x455   : > { %954 = vadd.xlane.f32.xlu2 %v953_v44 }
 0x462   : > { %v640_v24 = vpop.xlane.xlu2 %639 }
 0x463   : > { %2185 = vrcp.f32 %v640_v24 }
 0x469   : > { %v2186_v49 = vpop.eup %2185 }
 0x46a   : > { %v709_v13 = vpop.xlane.xlu2 %708  ;;  %v643_v46 = vpop.xlane.xlu1 %642  ;;  %v646_v51 = vmul.f32 %v2186_v49, %v2609_v37 }
 0x46b   : > { %v711_v47 = vsub.f32 %v2614_v43, %v709_v13  ;;  %2187 = vrcp.f32 %v643_v46 }
 0x46d   : > { %v714_v48 = vmul.f32 1.442695, %v711_v47  ;;  %1041 = vrot.lane.b32.xlu2 %v2655_v17, %s2329_s21  ;;  %s1796_s21 = sshll.u32 %s3085_s16, 4  ;;  %s1797_s21 = int_to_ptr.vmem [resolvable:$true] %s1796_s21 }
 0x46f   : > { %2189 = vpow2.f32 %v714_v48 }
 0x471   : > { %v2188_v33 = vpop.eup %2187 }
 0x472   : > { %v647_v53 = vmul.f32 %v2188_v33, %v2616_v45  ;;  %v866_v55 = vpop.xlane.xlu2 %865  ;;  %v804_v56 = vpop.xlane.xlu1 %803 }
 0x473   : > { %v870_v57 = vsub.f32 %v2623_v50, %v866_v55 }
 0x474   : > { %v648_v59 = vpack.c.bf16 %v647_v53, %v646_v51 }
 0x475   : > { %v2190_v62 = vpop.eup %2189  ;;  %v872_v0 = vmul.f32 1.442695, %v870_v57 }
 0x476   : > { %1907 = vmatmul.msk.bf16.vlgmr.msrb.gmra.mxu3 %vm473_vm3, %v648_v59  ;;  %v719_v43 = vsel %vm473_vm3, %v2190_v62, 0.0 }
 0x477   : > { %2191 = vpow2.f32 %v872_v0  ;;  %720 = vadd.xlane.f32.xlu1 %v719_v43 }
 0x478   : > { %2193 = vrcp.f32 %v804_v56 }
 0x47a   : > { %v819_v4 = vpop.permute.xlu2 %818  ;;  %v869_v5 = vpop.xlane.xlu1 %868 }
 0x47b   : > { %v871_v7 = vsub.f32 %v2632_v58, %v869_v5  ;;  %831 = vmatpush.bf16.msra.mxu3 %v819_v4 }
 0x47d   : > { %v2685_v37 = vpop.eup %2191  ;;  %v874_v45 = vmul.f32 1.442695, %v871_v7 }
 0x47e   : > { %v807_v9 = vpop.xlane.xlu0 %806  ;;  %v876_v50 = vsel %vm473_vm3, %v2685_v37, 0.0  ;;  %v2194_v10 = vpop.eup %2193 }
 0x47f   : > { %2195 = vpow2.f32 %v874_v45  ;;  %877 = vadd.xlane.f32.xlu1 %v876_v50  ;;  %v810_v58 = vmul.f32 %v2194_v10, %v2625_v52 }
 0x480   : > { %2197 = vrcp.f32 %v807_v9 }
 0x485   : > { %v2196_v11 = vpop.eup %2195 }
 0x486   : > { %v2198_v30 = vpop.eup %2197  ;;  %v1023_v32 = vpop.xlane.xlu0 %1022  ;;  %v879_v12 = vsel %vm473_vm3, %v2196_v11, 0.0 }
 0x487   : > { %v811_v42 = vmul.f32 %v2198_v30, %v2636_v61  ;;  %v1025_v54 = vsub.f32 %v2649_v40, %v1023_v32  ;;  %880 = vadd.xlane.f32.xlu1 %v879_v12  ;;  %v1020_v61 = vpop.xlane.xlu1 %1019 }
 0x488   : > { %v1024_v40 = vsub.f32 %v2643_v2, %v1020_v61 }
 0x489   : > { %v812_v14 = vpack.c.bf16 %v811_v42, %v810_v58  ;;  %v1028_v15 = vmul.f32 1.442695, %v1025_v54  ;;  %v2005_v58 = vld [vmem:[%s3142_s4 + $0x8] sm:$0xff]  ;;  %v2004_v42 = vld [vmem:[%s3142_s4] sm:$0xff] }
 0x48a   : > { %v1026_v20 = vmul.f32 1.442695, %v1024_v40  ;;  %1106 = vmatpush.bf16.msra.mxu1 %v2005_v58 }
 0x48b   : > { %2199 = vpow2.f32 %v1028_v15  ;;  %1911 = vmatmul.msk.bf16.vlgmr.msra.gmra.mxu3 %vm473_vm3, %v812_v14 }
 0x48c   : > { %2201 = vpow2.f32 %v1026_v20 }
 0x48e   : > { %v958_v39 = vpop.xlane.xlu0 %957  ;;  %1107 = vmatpush.bf16.msra.mxu1 %v2004_v42 }
 0x491   : > { %v2694_v16 = vpop.eup %2199 }
 0x492   : > { %v1033_v6 = vsel %vm473_vm3, %v2694_v16, 0.0  ;;  %v2202_v23 = vpop.eup %2201 }
 0x493   : > { %1034 = vadd.xlane.f32.xlu0 %v1033_v6  ;;  %v1030_v25 = vsel %vm473_vm3, %v2202_v23, 0.0 }
 0x49b   : > { %v517_v18 = vpop.f32.mrf.mxu0 }
 0x49c   : > { %522 = vst.msk [vmem:[#allocation2] sm:$0xff] %vm452_vm1, %v517_v18 }
 0x4a0   : > { %887 = vrot.lane.b32.xlu1 %v2655_v17, %s2325_s29  ;;  %s2332_s29 = smov 24  }
 0x4a3   : > { %v519_v52 = vpop.f32.mrf.mxu0 }
 0x4a4   : > { %523 = vst.msk [vmem:[#allocation2 + $0x8] sm:$0xff] %vm452_vm1, %v519_v52 }
 0x4a7   : > { %964 = vrot.lane.b32.xlu0 %v2655_v17, %s2328_s22  ;;  %s1795_s22 = scalar_lea.hbm %s3146_s8, %s2019_s20 }
 0x4af   : > { %593 = vrot.lane.b32.xlu0 %v2596_v21, %s3147_s25 }
 0x4c0   : > { %v718_v26 = vpop.xlane.xlu2 %717 }
 0x4c1   : > { %2203 = vrcp.f32 %v718_v26 }
 0x4c7   : > { %v2204_v17 = vpop.eup %2203 }
 0x4c8   : > { %v724_v21 = vmul.f32 %v2204_v17, %v2668_v8  ;;  %v955_v19 = vpop.xlane.xlu2 %954 }
 0x4ca   : > { %1031 = vadd.xlane.f32.xlu1 %v1030_v25 }
 0x4d0   : > { %v1042_v48 = vpop.permute.xlu2 %1041 }
 0x4e3   : > { %595 = vrot.lane.b32.xlu1 %v2600_v22, %s3147_s25 }
 0x4ea   : > { %v721_v27 = vpop.xlane.xlu1 %720 }
 0x4eb   : > { %2205 = vrcp.f32 %v721_v27 }
 0x4f1   : > { %v2206_v28 = vpop.eup %2205 }
 0x4f2   : > { %v725_v34 = vmul.f32 %v2206_v28, %v2190_v62  ;;  %v878_v36 = vpop.xlane.xlu1 %877  ;;  %v314_v28 = vld [vmem:[%s2457_s15] sm:$0xff]  }
 0x4f4   : > { %v726_v35 = vpack.c.bf16 %v725_v34, %v724_v21  ;;  %v1081_v21 = vperm.slane %v2442_v1, 3  ;;  %v318_v34 = vunpack.c.l.bf16 %v314_v28  ;;  %v316_v1 = vld [vmem:[%s2457_s15 + $0x8] sm:$0xff]  }
 0x4f6   : > { %1909 = vmatmul.msk.bf16.vlgmr.msra.gmra.mxu0 %vm473_vm3, %v726_v35 }
 0x4f9   : > { %v664_v2 = vpop.f32.mrf.mxu3 }
 0x4fa   : > { %671 = vrot.lane.b32.xlu0 %v664_v2, %s2331_s26  ;;  %v881_v22 = vpop.xlane.xlu1 %880 }
 0x4fb   : > { %2207 = vrcp.f32 %v881_v22  ;;  %v319_v22 = vunpack.c.h.bf16 %v314_v28 }
 0x4fc   : > { %2209 = vrcp.f32 %v878_v36 }
 0x4fd   : > { %2211 = vrcp.f32 %v955_v19 }
 0x4fe   : > { %2213 = vrcp.f32 %v958_v39 }
 0x501   : > { %v666_v38 = vpop.f32.mrf.mxu3  ;;  %v2208_v63 = vpop.eup %2207 }
 0x502   : > { %673 = vrot.lane.b32.xlu2 %v666_v38, %s2331_s26  ;;  %v2210_v44 = vpop.eup %2209  ;;  %v885_v24 = vmul.f32 %v2208_v63, %v2196_v11 }
 0x503   : > { %v884_v46 = vmul.f32 %v2210_v44, %v2685_v37  ;;  %v2212_v49 = vpop.eup %2211  ;;  %v2333_v44 = vmov 0  }
 0x504   : > { %v2214_v51 = vpop.eup %2213  ;;  %v961_v55 = vmul.f32 %v2212_v49, %v2672_v41  ;;  %2080 = vset.pattern.permute.xlu1 %v2333_v44  ;;  %2086 = vset.pattern.permute.xlu0 %v2333_v44 }
 0x505   : > { %v886_v33 = vpack.c.bf16 %v885_v24, %v884_v46  ;;  %v962_v56 = vmul.f32 %v2214_v51, %v2657_v3  ;;  %2092 = vset.pattern.permute.xlu2 %v2333_v44  ;;  %v320_v24 = vunpack.c.l.bf16 %v316_v1 }
 0x506   : > { %v1035_v13 = vpop.xlane.xlu0 %1034 }
 0x507   : > { %v963_v59 = vpack.c.bf16 %v962_v56, %v961_v55  ;;  %2215 = vrcp.f32 %v1035_v13 }
 0x50d   : > { %v2216_v43 = vpop.eup %2215 }
 0x50e   : > { %v833_v8 = vpop.f32.mrf.mxu3  ;;  %v1039_v41 = vmul.f32 %v2216_v43, %v2694_v16 }
 0x50f   : > { %838 = vst.msk [vmem:[#allocation2 + $0x10] sm:$0xff] %vm452_vm1, %v833_v8 }
 0x512   : > { %v888_v47 = vpop.permute.xlu1 %887 }
 0x513   : > { %900 = vmatpush.bf16.msrb.mxu0 %v888_v47 }
 0x516   : > { %v835_v53 = vpop.f32.mrf.mxu3  ;;  %1913 = vmatmul.msk.bf16.vlgmr.msrb.gmra.mxu0 %vm473_vm3, %v886_v33  ;;  %v321_v33 = vunpack.c.h.bf16 %v316_v1 }
 0x517   : > { %1054 = vmatpush.bf16.msra.mxu0 %v1042_v48  ;;  %839 = vst.msk [vmem:[#allocation2 + $0x18] sm:$0xff] %vm452_vm1, %v835_v53  ;;  %v2334_v48 = vmov 32.0  }
 0x519   : > { %v965_v57 = vpop.permute.xlu0 %964 }
 0x51a   : > { %977 = vmatpush.bf16.msrb.mxu3 %v965_v57 }
 0x51d   : > { %1915 = vmatmul.msk.bf16.vlgmr.msrb.gmra.mxu3 %vm473_vm3, %v963_v59  ;;  %v2754_v59 = vshrl.u32 %v323_v29, 7 }
 0x51f   : > { %v2758_v43 = vadd.s32 8, %v2754_v59  ;;  %vm332_vm8 = vcmp.lt.s32.totalorder %v2754_v59, %v2490_v31  ;;  %v1257_v42 = vrot.slane %v2754_v59, 1  ;;  %vm1259_vm11 = vcmp.lt.s32.totalorder %v2754_v59, 7 }
 0x520   : > { %vm1254_vm1 = vcmp.lt.s32.totalorder %v2754_v59, 1  ;;  %vm343_vm4 = vcmp.lt.s32.totalorder %v2754_v59, %v2562_v60 }
 0x521   : > { %v594_v62 = vpop.permute.xlu0 %593  ;;  %vm333_vm9 = vcmp.lt.s32.totalorder %v2758_v43, %v2490_v31 }
 0x522   : > { %600 = vst.msk [vmem:[#allocation2] sm:$0xff] %vm599_vm5, %v594_v62 }
 0x53d   : > { %v1032_v0 = vpop.xlane.xlu1 %1031 }
 0x53e   : > { %2217 = vrcp.f32 %v1032_v0 }
 0x53f   : > { %2219 = vrcp.f32 %v2334_v48 }
 0x544   : > { %v2218_v4 = vpop.eup %2217 }
 0x545   : > { %v1038_v5 = vmul.f32 %v2218_v4, %v2202_v23  ;;  %v2220_v53 = vpop.eup %2219 }
 0x546   : > { %v1136_v57 = vmul.f32 32.0, %v2220_v53  ;;  %vm1140_vm10 = vweird.f32 %v2220_v53 }
 0x547   : > { %v1040_v7 = vpack.c.bf16 %v1039_v41, %v1038_v5  ;;  %v2335_v5 = vmov 0.0  }
 0x548   : > { %v1137_v0 = vsub.f32 1.0, %v1136_v57  ;;  %v2768_v29 = vsel %vm333_vm9, 1.0, %v2335_v5 }
 0x549   : > { %1917 = vmatmul.msk.bf16.vlgmr.msra.gmra.mxu0 %vm473_vm3, %v1040_v7  ;;  %v2765_v7 = vsel %vm332_vm8, 1.0, %v2335_v5 }
 0x54a   : > { %v1138_v4 = vmul.f32 %v2220_v53, %v1137_v0 }
 0x54c   : > { %v1139_v41 = vadd.f32 %v2220_v53, %v1138_v4 }
 0x555   : > { %v596_v3 = vpop.permute.xlu1 %595 }
 0x556   : > { %601 = vst.msk [vmem:[#allocation2 + $0x8] sm:$0xff] %vm599_vm5, %v596_v3  ;;  %v2081_v3 = vpack.i.bf16 %v2768_v29, %v2765_v7 }
 0x55c   : > { %v674_v37 = vpop.permute.xlu2 %673 }
 0x55d   : > { %679 = vst.msk [vmem:[#allocation2 + $0x8] sm:$0xff] %vm677_vm6, %v674_v37  ;;  %v2772_v37 = vsel %vm1140_vm10, %v2220_v53, %v1139_v41 }
 0x56c   : > { %v672_v45 = vpop.permute.xlu0 %671 }
 0x56d   : > { %678 = vst.msk [vmem:[#allocation2] sm:$0xff] %vm677_vm6, %v672_v45 }
 0x573   : > { %v742_v9 = vpop.f32.mrf.mxu0 }
 0x574   : > { %749 = vrot.lane.b32.xlu0 %v742_v9, %s2332_s29 }
 0x57b   : > { %v744_v50 = vpop.f32.mrf.mxu0 }
 0x57c   : > { %751 = vrot.lane.b32.xlu2 %v744_v50, %s2332_s29 }
 0x593   : > { %v902_v10 = vpop.f32.mrf.mxu0 }
 0x594   : > { %909 = vrot.lane.b32.xlu0 %v902_v10, %s3147_s25 }
 0x59b   : > { %v904_v11 = vpop.f32.mrf.mxu0 }
 0x59c   : > { %911 = vrot.lane.b32.xlu2 %v904_v11, %s3147_s25 }
 0x5a0   : > { %v979_v30 = vpop.f32.mrf.mxu3 }
 0x5a1   : > { %986 = vrot.lane.b32.xlu1 %v979_v30, %s2331_s26 }
 0x5a8   : > { %v981_v32 = vpop.f32.mrf.mxu3 }
 0x5a9   : > { %988 = vrot.lane.b32.xlu0 %v981_v32, %s2331_s26  ;;  %s1798_s26 = sshll.u32 %s1795_s22, 4  ;;  %s1799_s26 = int_to_ptr.hbm [resolvable:$true] %s1798_s26 }
 0x5c6   : > { %v1056_v12 = vpop.f32.mrf.mxu0 }
 0x5c7   : > { %1063 = vrot.lane.b32.xlu2 %v1056_v12, %s2332_s29 }
 0x5ce   : > { %v1058_v54 = vpop.f32.mrf.mxu0 }
 0x5cf   : > { %1065 = vrot.lane.b32.xlu1 %v1058_v54, %s2332_s29  ;;  %v1258_v54 = vrot.slane %v2758_v43, 1  ;;  %s308_s29 = scalar_lea.vmem %s3140_s2, %s2450_s27 }
 0x5d6   : > { %v752_v14 = vpop.permute.xlu2 %751 }
 0x5d7   : > { %757 = vst.msk [vmem:[#allocation2 + $0x8] sm:$0xff] %vm755_vm7, %v752_v14  ;;  %v1276_v14 = vadd.s32 1, %v2754_v59 }
 0x5de   : > { %v1072_v6 = vld [vmem:[#allocation2 + $0x8] sm:$0xff] }
 0x5e6   : > { %v750_v15 = vpop.permute.xlu0 %749 }
 0x5e7   : > { %756 = vst.msk [vmem:[#allocation2] sm:$0xff] %vm755_vm7, %v750_v15  ;;  %v1277_v15 = vadd.s32 1, %v2758_v43 }
 0x5ee   : > { %v1071_v16 = vld [vmem:[#allocation2] sm:$0xff] }
 0x5ef   : > { %v1075_v18 = vpack.c.bf16 %v1072_v6, %v1071_v16  ;;  %v1260_v16 = vsel %vm1259_vm11, %v1257_v42, %v1258_v54  ;;  %v1261_v6 = vsel %vm1259_vm11, %v1258_v54, %v1257_v42 }
 0x5f0   : > { %vm1284_vm12 = vcmp.eq.s32.totalorder %v1260_v16, %v1276_v14  ;;  %vm1285_vm13 = vcmp.eq.s32.totalorder %v1261_v6, %v1277_v15 }
 0x5f1   : > { %1926 = vmatmul.msk.bf16.vlgmr.msra.gmra.mxu1 %vm375_vm0, %v1075_v18  ;;  %v1936_v18 = vsel %vm1284_vm12, 1.0, %v2335_v5 }
 0x5f6   : > { %v912_v52 = vpop.permute.xlu2 %911 }
 0x5f7   : > { %916 = vst.msk [vmem:[#allocation2 + $0x18] sm:$0xff] %vm599_vm5, %v912_v52  ;;  %v1937_v52 = vsel %vm1285_vm13, 1.0, %v2335_v5 }
 0x606   : > { %v910_v61 = vpop.permute.xlu0 %909 }
 0x607   : > { %915 = vst.msk [vmem:[#allocation2 + $0x10] sm:$0xff] %vm599_vm5, %v910_v61  ;;  %v1928_v61 = vadd.s32 4294967295, %v2754_v59  ;;  %vm344_vm5 = vcmp.lt.s32.totalorder %v2758_v43, %v2562_v60 }
 0x609   : > { %vm1270_vm14 = vcmp.eq.s32.totalorder %v1260_v16, %v1928_v61 }
 0x613   : > { %v987_v40 = vpop.permute.xlu1 %986 }
 0x614   : > { %992 = vst.msk [vmem:[#allocation2 + $0x10] sm:$0xff] %vm677_vm6, %v987_v40  ;;  %v1929_v40 = vadd.s32 4294967295, %v2758_v43 }
 0x616   : > { %vm1271_vm15 = vcmp.eq.s32.totalorder %v1261_v6, %v1929_v40 }
 0x61b   : > { %v989_v20 = vpop.permute.xlu0 %988 }
 0x61c   : > { %993 = vst.msk [vmem:[#allocation2 + $0x18] sm:$0xff] %vm677_vm6, %v989_v20  ;;  %v2098_v20 = vpack.i.bf16 %v1937_v52, %v1936_v18 }
 0x621   : > { %v1064_v23 = vpop.permute.xlu2 %1063 }
 0x622   : > { %1069 = vst.msk [vmem:[#allocation2 + $0x10] sm:$0xff] %vm755_vm7, %v1064_v23  ;;  %v1932_v23 = vsel %vm1270_vm14, 1.0, %v2335_v5 }
 0x629   : > { %v1073_v26 = vld [vmem:[#allocation2 + $0x10] sm:$0xff] }
 0x641   : > { %v1066_v25 = vpop.permute.xlu1 %1065 }
 0x642   : > { %1070 = vst.msk [vmem:[#allocation2 + $0x18] sm:$0xff] %vm755_vm7, %v1066_v25  ;;  %v1933_v25 = vsel %vm1271_vm15, 1.0, %v2335_v5 }
 0x649   : > { %v1074_v27 = vld [vmem:[#allocation2 + $0x18] sm:$0xff] }
 0x64a   : > { %v1076_v17 = vpack.c.bf16 %v1074_v27, %v1073_v26  ;;  %v2108_v26 = vpack.i.bf16 %v1933_v25, %v1932_v23 }
 0x64c   : > { %1927 = vmatmul.msk.bf16.gmra.mxu1 %vm375_vm0, %v1076_v17 }
 0x66e   : > { %v1109_v35 = vpop.f32.mrf.mxu1 }
 0x66f   : > { %v1110_v2 = vadd.f32 %v1109_v35, %v1081_v21 }
 0x671   : > { %v1119_v36 = vadd.f32 %v1110_v2, %v318_v34 }
 0x673   : > { %v1123_v38 = vsel %vm375_vm0, %v1119_v36, 0.0 }
 0x674   : > { %1124 = vadd.xlane.f32.xlu0 %v1123_v38  ;;  %v1252_v38 = vrot.slane %v2754_v59, 7 }
 0x676   : > { %v1111_v39 = vpop.f32.mrf.mxu1 }
 0x677   : > { %v1112_v19 = vadd.f32 %v1111_v39, %v1081_v21 }
 0x679   : > { %v1120_v63 = vadd.f32 %v1112_v19, %v319_v22  ;;  %v1253_v22 = vrot.slane %v2758_v43, 7 }
 0x67b   : > { %v1126_v8 = vsel %vm375_vm0, %v1120_v63, 0.0  ;;  %v1255_v19 = vsel %vm1254_vm1, %v1252_v38, %v1253_v22 }
 0x67c   : > { %1127 = vadd.xlane.f32.xlu2 %v1126_v8  ;;  %vm1279_vm3 = vcmp.eq.s32.totalorder %v1255_v19, %v1277_v15  ;;  %vm1265_vm7 = vcmp.eq.s32.totalorder %v1255_v19, %v1929_v40 }
 0x67d   : > { %v1935_v1 = vsel %vm1279_vm3, 1.0, %v2335_v5  ;;  %v1931_v48 = vsel %vm1265_vm7, 1.0, %v2335_v5  ;;  %vm1406_vm7 = vcmask 523264  }
 0x6c9   : > { %v1114_v13 = vpop.f32.mrf.mxu1 }
 0x6ca   : > { %v1115_v46 = vadd.f32 %v1114_v13, %v1081_v21  ;;  %v2827_v13 = vsel %vm343_vm4, 1.0, %v2335_v5 }
 0x6cc   : > { %v1121_v47 = vadd.f32 %v1115_v46, %v320_v24  ;;  %v2830_v46 = vsel %vm344_vm5, 1.0, %v2335_v5 }
 0x6ce   : > { %v1129_v49 = vsel %vm375_vm0, %v1121_v47, 0.0 }
 0x6cf   : > { %1130 = vadd.xlane.f32.xlu1 %v1129_v49  ;;  %v2087_v49 = vpack.i.bf16 %v2830_v46, %v2827_v13 }
 0x6d1   : > { %v1116_v51 = vpop.f32.mrf.mxu1 }
 0x6d2   : > { %v1117_v55 = vadd.f32 %v1116_v51, %v1081_v21 }
 0x6d4   : > { %v1122_v56 = vadd.f32 %v1117_v55, %v321_v33 }
 0x6d6   : > { %v1132_v62 = vsel %vm375_vm0, %v1122_v56, 0.0 }
 0x6d7   : > { %1133 = vadd.xlane.f32.xlu0 %v1132_v62 }
 0x6e7   : > { %v1125_v45 = vpop.xlane.xlu0 %1124 }
 0x6e8   : > { %v1142_v9 = vmul.f32 %v2772_v37, %v1125_v45  ;;  %2082 = vperm.xlu1 %2080, %v2081_v3  }
 0x6ea   : > { %v2775_v50 = vsub.f32 %v1119_v36, %v1142_v9 }
 0x6ec   : > { %v1150_v31 = vmul.f32 %v2775_v50, %v2775_v50 }
 0x6ee   : > { %v1154_v10 = vsel %vm375_vm0, %v1150_v31, 0.0 }
 0x6ef   : > { %1155 = vadd.xlane.f32.xlu2 %v1154_v10  ;;  %v1128_v11 = vpop.xlane.xlu2 %1127 }
 0x6f0   : > { %v1143_v30 = vmul.f32 %v2772_v37, %v1128_v11 }
 0x6f2   : > { %v2781_v32 = vsub.f32 %v1120_v63, %v1143_v30  ;;  %v1256_v63 = vsel %vm1254_vm1, %v1253_v22, %v1252_v38  ;;  %v2841_v30 = vld [vmem:[%s3143_s5] sm:$0xff] }
 0x6f3   : > { %vm1278_vm2 = vcmp.eq.s32.totalorder %v1256_v63, %v1276_v14  ;;  %vm1264_vm6 = vcmp.eq.s32.totalorder %v1256_v63, %v1928_v61  ;;  %v2848_v14 = vperm.slane %v2841_v30, 5 }
 0x6f4   : > { %v1151_v12 = vmul.f32 %v2781_v32, %v2781_v32  ;;  %v1934_v44 = vsel %vm1278_vm2, 1.0, %v2335_v5 }
 0x6f5   : > { %v2093_v24 = vpack.i.bf16 %v1935_v1, %v1934_v44 }
 0x6f6   : > { %v1157_v58 = vsel %vm375_vm0, %v1151_v12, 0.0  ;;  %v2844_v12 = vperm.slane %v2841_v30, 4 }
 0x712   : > { %1158 = vadd.xlane.f32.xlu1 %v1157_v58 }
 0x72b   : > { %2099 = vperm.xlu1 %2080, %v2098_v20  }
 0x733   : > { %2109 = vperm.xlu1 %2080, %v2108_v26  }
 0x742   : > { %v1131_v27 = vpop.xlane.xlu1 %1130 }
 0x743   : > { %v1144_v17 = vmul.f32 %v2772_v37, %v1131_v27 }
 0x745   : > { %v2802_v28 = vsub.f32 %v1121_v47, %v1144_v17  ;;  %v1930_v47 = vsel %vm1264_vm6, 1.0, %v2335_v5 }
 0x746   : > { %v2103_v33 = vpack.i.bf16 %v1931_v48, %v1930_v47 }
 0x747   : > { %v1152_v21 = vmul.f32 %v2802_v28, %v2802_v28 }
 0x749   : > { %v1160_v34 = vsel %vm375_vm0, %v1152_v21, 0.0 }
 0x74a   : > { %1161 = vadd.xlane.f32.xlu0 %v1160_v34  ;;  %v1134_v35 = vpop.xlane.xlu0 %1133 }
 0x74b   : > { %v1145_v2 = vmul.f32 %v2772_v37, %v1134_v35 }
 0x74d   : > { %v2808_v36 = vsub.f32 %v1122_v56, %v1145_v2 }
 0x74f   : > { %v1153_v39 = vmul.f32 %v2808_v36, %v2808_v36 }
 0x751   : > { %v1163_v8 = vsel %vm375_vm0, %v1153_v39, 0.0 }
 0x752   : > { %1164 = vadd.xlane.f32.xlu2 %v1163_v8 }
 0x75a   : > { %v2083_v55 = vpop.permute.xlu1 %2082 }
 0x75b   : > { %v2084_v18 = vunpack.i.l.bf16 %v2083_v55  ;;  %v2085_v40 = vunpack.i.h.bf16 %v2083_v55 }
 0x75e   : > { %2088 = vperm.xlu0 %2086, %v2087_v49  }
 0x762   : > { %v1156_v51 = vpop.xlane.xlu2 %1155 }
 0x763   : > { %v1166_v60 = vmul.f32 %v1156_v51, %v2772_v37 }
 0x765   : > { %v1170_v53 = vadd.f32 1e-05, %v1166_v60 }
 0x767   : > { %2221 = vrsqrt.f32 %v1170_v53  ;;  %vm1180_vm9 = vweird.f32 %v1170_v53 }
 0x76a   : > { %2094 = vperm.xlu2 %2092, %v2093_v24  }
 0x76d   : > { %v2222_v56 = vpop.eup %2221 }
 0x76e   : > { %v1175_v57 = vmul.f32 %v2222_v56, %v1170_v53  ;;  %vm1181_vm8 = vweird.f32 %v2222_v56 }
 0x76f   : > { %vm1182_vm10 = vmor %vm1180_vm9, %vm1181_vm8  ;;  %vm1462_vm8 = vcmask 785408  }
 0x770   : > { %v1176_v62 = vmul.f32 %v2222_v56, %v1175_v57 }
 0x772   : > { %2104 = vperm.xlu2 %2092, %v2103_v33   ;;  %v1177_v4 = vmul.f32 0.5, %v1176_v62 }
 0x774   : > { %v1178_v5 = vsub.f32 1.5, %v1177_v4 }
 0x776   : > { %v1179_v3 = vmul.f32 %v2222_v56, %v1178_v5 }
 0x778   : > { %v1183_v31 = vsel %vm1182_vm10, %v2222_v56, %v1179_v3 }
 0x779   : > { %v1214_v58 = vmul.f32 %v1183_v31, %v2775_v50 }
 0x77b   : > { %v1219_v15 = vmul.f32 %v2844_v12, %v1214_v58 }
 0x77d   : > { %v1224_v52 = vadd.f32 %v2848_v14, %v1219_v15 }
 0x77f   : > { %v2855_v20 = vmul.f32 %v2084_v18, %v1224_v52 }
 0x781   : > { %v1290_v4 = vrot.slane %v2855_v20, 7 }
 0x785   : > { %v1159_v0 = vpop.xlane.xlu1 %1158 }
 0x786   : > { %v1167_v43 = vmul.f32 %v1159_v0, %v2772_v37 }
 0x788   : > { %v1171_v41 = vadd.f32 1e-05, %v1167_v43 }
 0x78a   : > { %2223 = vrsqrt.f32 %v1171_v41  ;;  %vm1190_vm13 = vweird.f32 %v1171_v41 }
 0x790   : > { %v2224_v45 = vpop.eup %2223 }
 0x791   : > { %v1185_v9 = vmul.f32 %v2224_v45, %v1171_v41  ;;  %vm1191_vm12 = vweird.f32 %v2224_v45 }
 0x792   : > { %vm1192_vm14 = vmor %vm1190_vm13, %vm1191_vm12 }
 0x793   : > { %v1186_v10 = vmul.f32 %v2224_v45, %v1185_v9  ;;  %v1298_v9 = vrot.slane %v2855_v20, 1 }
 0x795   : > { %v1187_v11 = vmul.f32 0.5, %v1186_v10 }
 0x797   : > { %v1188_v42 = vsub.f32 1.5, %v1187_v11 }
 0x799   : > { %v1189_v54 = vmul.f32 %v2224_v45, %v1188_v42 }
 0x79b   : > { %v1193_v16 = vsel %vm1192_vm14, %v2224_v45, %v1189_v54 }
 0x79c   : > { %v1215_v6 = vmul.f32 %v1193_v16, %v2781_v32 }
 0x79d   : > { %v2100_v8 = vpop.permute.xlu1 %2099 }
 0x79e   : > { %v1220_v61 = vmul.f32 %v2844_v12, %v1215_v6  ;;  %v2887_v16 = vunpack.i.l.bf16 %v2100_v8 }
 0x7a0   : > { %v1225_v50 = vadd.f32 %v2848_v14, %v1220_v61 }
 0x7a2   : > { %v2857_v23 = vmul.f32 %v2085_v40, %v1225_v50 }
 0x7a4   : > { %v2113_v25 = vpack.i.bf16 %v2857_v23, %v2855_v20  ;;  %v1291_v62 = vrot.slane %v2857_v23, 7  ;;  %v1299_v45 = vrot.slane %v2857_v23, 1 }
 0x7a5   : > { %v2110_v0 = vpop.permute.xlu1 %2109 }
 0x7a6   : > { %2114 = vrot.lane.b32.xlu2 %v2113_v25, %s2317_s28  ;;  %v2877_v31 = vunpack.i.h.bf16 %v2110_v0  ;;  %v1296_v10 = vsel %vm1254_vm1, %v1290_v4, %v1291_v62  ;;  %v2889_v6 = vunpack.i.l.bf16 %v2110_v0  ;;  %v1304_v52 = vsel %vm1259_vm11, %v1298_v9, %v1299_v45 }
 0x7bd   : > { %v1162_v26 = vpop.xlane.xlu0 %1161 }
 0x7be   : > { %v1168_v32 = vmul.f32 %v1162_v26, %v2772_v37 }
 0x7c0   : > { %v1172_v27 = vadd.f32 1e-05, %v1168_v32  ;;  %v2906_v32 = vunpack.i.h.bf16 %v2100_v8 }
 0x7c2   : > { %2225 = vrsqrt.f32 %v1172_v27  ;;  %vm1200_vm2 = vweird.f32 %v1172_v27 }
 0x7c5   : > { %v1165_v17 = vpop.xlane.xlu2 %1164 }
 0x7c6   : > { %v1169_v21 = vmul.f32 %v1165_v17, %v2772_v37 }
 0x7c8   : > { %v2226_v34 = vpop.eup %2225  ;;  %v1173_v35 = vadd.f32 1e-05, %v1169_v21 }
 0x7c9   : > { %v1195_v2 = vmul.f32 %v2226_v34, %v1172_v27  ;;  %vm1201_vm15 = vweird.f32 %v2226_v34 }
 0x7ca   : > { %2227 = vrsqrt.f32 %v1173_v35  ;;  %vm1202_vm3 = vmor %vm1200_vm2, %vm1201_vm15  ;;  %vm1210_vm5 = vweird.f32 %v1173_v35 }
 0x7cb   : > { %v1196_v38 = vmul.f32 %v2226_v34, %v1195_v2 }
 0x7cd   : > { %v1197_v22 = vmul.f32 0.5, %v1196_v38  ;;  %v2095_v39 = vpop.permute.xlu2 %2094 }
 0x7ce   : > { %v2896_v61 = vunpack.i.l.bf16 %v2095_v39 }
 0x7cf   : > { %v1198_v19 = vsub.f32 1.5, %v1197_v22 }
 0x7d0   : > { %v2228_v63 = vpop.eup %2227  ;;  %v2089_v48 = vpop.permute.xlu0 %2088 }
 0x7d1   : > { %v1199_v44 = vmul.f32 %v2226_v34, %v1198_v19  ;;  %v1205_v1 = vmul.f32 %v2228_v63, %v1173_v35  ;;  %v2090_v60 = vunpack.i.l.bf16 %v2089_v48  ;;  %vm1211_vm4 = vweird.f32 %v2228_v63 }
 0x7d2   : > { %vm1212_vm6 = vmor %vm1210_vm5, %vm1211_vm4  ;;  %v2091_v58 = vunpack.i.h.bf16 %v2089_v48 }
 0x7d3   : > { %v1203_v24 = vsel %vm1202_vm3, %v2226_v34, %v1199_v44  ;;  %v1206_v47 = vmul.f32 %v2228_v63, %v1205_v1  ;;  %v1330_v34 = vmul.f32 %v2889_v6, %v1304_v52 }
 0x7d4   : > { %v1216_v49 = vmul.f32 %v1203_v24, %v2802_v28 }
 0x7d5   : > { %v1207_v33 = vmul.f32 0.5, %v1206_v47  ;;  %v2105_v55 = vpop.permute.xlu2 %2104 }
 0x7d6   : > { %v1221_v51 = vmul.f32 %v2844_v12, %v1216_v49  ;;  %v2871_v41 = vunpack.i.h.bf16 %v2105_v55  ;;  %v2898_v40 = vunpack.i.l.bf16 %v2105_v55 }
 0x7d7   : > { %v1208_v53 = vsub.f32 1.5, %v1207_v33 }
 0x7d8   : > { %v1226_v56 = vadd.f32 %v2848_v14, %v1221_v51 }
 0x7d9   : > { %v1209_v57 = vmul.f32 %v2228_v63, %v1208_v53 }
 0x7da   : > { %v2868_v43 = vmul.f32 %v2090_v60, %v1226_v56 }
 0x7db   : > { %v1213_v28 = vsel %vm1212_vm6, %v2228_v63, %v1209_v57 }
 0x7dc   : > { %v1217_v5 = vmul.f32 %v1213_v28, %v2808_v36  ;;  %v1300_v3 = vrot.slane %v2868_v43, 1  ;;  %v1292_v42 = vrot.slane %v2868_v43, 7  ;;  %v1317_v36 = vmul.f32 %v2871_v41, %v1296_v10 }
 0x7de   : > { %v1222_v11 = vmul.f32 %v2844_v12, %v1217_v5  ;;  %v1303_v54 = vsel %vm1259_vm11, %v1299_v45, %v1300_v3  ;;  %v2894_v12 = vunpack.i.h.bf16 %v2095_v39  ;;  %v1295_v26 = vsel %vm1254_vm1, %v1291_v62, %v1292_v42  ;;  %v2011_v5 = vld [vmem:[%s3144_s6 + $0x28] sm:$0xff]  ;;  %v2009_v45 = vld [vmem:[%s3144_s6 + $0x18] sm:$0xff] }
 0x7df   : > { %v1331_v15 = vmul.f32 %v2877_v31, %v1303_v54  ;;  %v1363_v2 = vmul.f32 %v2906_v32, %v1303_v54  ;;  %v1318_v38 = vmul.f32 %v2898_v40, %v1295_v26  ;;  %v1350_v22 = vmul.f32 %v2896_v61, %v1295_v26  ;;  %1471 = vmatpush.bf16.msra.mxu3 %v2011_v5 }
 0x7e0   : > { %v1227_v18 = vadd.f32 %v2848_v14, %v1222_v11  ;;  %v1362_v14 = vmul.f32 %v2887_v16, %v1304_v52  ;;  %v1349_v35 = vmul.f32 %v2894_v12, %v1296_v10  ;;  %v2007_v10 = vld [vmem:[%s3144_s6 + $0x8] sm:$0xff]  ;;  %v2006_v11 = vld [vmem:[%s3144_s6] sm:$0xff] }
 0x7e1   : > { %v2900_v50 = vadd.f32 %v1331_v15, %v1317_v36 }
 0x7e2   : > { %v2902_v25 = vmul.f32 %v2091_v58, %v1227_v18  ;;  %v1367_v53 = vadd.f32 %v1363_v2, %v1349_v35 }
 0x7e4   : > { %v1293_v27 = vrot.slane %v2902_v25, 7  ;;  %v1301_v17 = vrot.slane %v2902_v25, 1  ;;  %v2123_v21 = vpack.i.bf16 %v2902_v25, %v2868_v43 }
 0x7e6   : > { %2124 = vrot.lane.b32.xlu1 %v2123_v21, %s2317_s28  ;;  %v1297_v39 = vsel %vm1254_vm1, %v1293_v27, %v1290_v4  ;;  %v1294_v19 = vsel %vm1254_vm1, %v1292_v42, %v1293_v27  ;;  %v1302_v63 = vsel %vm1259_vm11, %v1300_v3, %v1301_v17  ;;  %v1305_v8 = vsel %vm1259_vm11, %v1301_v17, %v1298_v9  ;;  %v2010_v3 = vld [vmem:[%s3144_s6 + $0x20] sm:$0xff]  ;;  %v2008_v9 = vld [vmem:[%s3144_s6 + $0x10] sm:$0xff] }
 0x7e7   : > { %v1316_v44 = vmul.f32 %v2898_v40, %v1297_v39  ;;  %v1348_v1 = vmul.f32 %v2896_v61, %v1297_v39  ;;  %v1332_v24 = vmul.f32 %v2889_v6, %v1302_v63  ;;  %v1333_v47 = vmul.f32 %v2877_v31, %v1305_v8  ;;  %1472 = vmatpush.bf16.msra.mxu3 %v2010_v3 }
 0x7e8   : > { %v1351_v48 = vmul.f32 %v2894_v12, %v1294_v19  ;;  %v1364_v49 = vmul.f32 %v2887_v16, %v1302_v63  ;;  %v1365_v33 = vmul.f32 %v2906_v32, %v1305_v8  ;;  %v1319_v51 = vmul.f32 %v2871_v41, %v1294_v19 }
 0x7e9   : > { %v1366_v60 = vadd.f32 %v1362_v14, %v1348_v1  ;;  %v1334_v55 = vadd.f32 %v1330_v34, %v1316_v44  ;;  %v1336_v56 = vadd.f32 %v1332_v24, %v1318_v38  ;;  %v1425_v24 = vperm.slane %v2841_v30, 6 }
 0x7ea   : > { %v1368_v57 = vadd.f32 %v1364_v49, %v1350_v22  ;;  %v1369_v62 = vadd.f32 %v1365_v33, %v1351_v48  ;;  %v1337_v0 = vadd.f32 %v1333_v47, %v1319_v51 }
 0x7eb   : > { %v2118_v4 = vpack.i.bf16 %v1367_v53, %v1366_v60  ;;  %1473 = vmatpush.bf16.msra.mxu3 %v2009_v45 }
 0x7ec   : > { %v2128_v28 = vpack.i.bf16 %v1369_v62, %v1368_v57 }
 0x7ed   : > { %2119 = vrot.lane.b32.xlu0 %v2118_v4, %s2322_s24 }
 0x7ee   : > { %2129 = vrot.lane.b32.xlu2 %v2128_v28, %s2322_s24 }
 0x7ef   : > { %1474 = vmatpush.bf16.msra.mxu3 %v2008_v9 }
 0x7f3   : > { %1475 = vmatpush.bf16.msra.mxu3 %v2007_v10 }
 0x7f7   : > { %1476 = vmatpush.bf16.msra.mxu3 %v2006_v11 }
 0x800   : > { %v2115_v58 = vpop.permute.xlu2 %2114 }
 0x801   : > { %v2117_v21 = vunpack.i.h.bf16 %v2115_v58  ;;  %v2116_v34 = vunpack.i.l.bf16 %v2115_v58 }
 0x803   : > { %v1402_v39 = vsel %vm375_vm0, %v1334_v55, %v2116_v34  ;;  %v1403_v19 = vsel %vm375_vm0, %v2900_v50, %v2117_v21 }
 0x848   : > { %v2130_v42 = vpop.permute.xlu2 %2129 }
 0x849   : > { %v2132_v18 = vunpack.i.h.bf16 %v2130_v42  ;;  %v2131_v52 = vunpack.i.l.bf16 %v2130_v42 }
 0x858   : > { %v2125_v54 = vpop.permute.xlu1 %2124 }
 0x859   : > { %v2127_v36 = vunpack.i.h.bf16 %v2125_v54  ;;  %v2126_v15 = vunpack.i.l.bf16 %v2125_v54 }
 0x85b   : > { %v1404_v26 = vsel %vm375_vm0, %v1336_v56, %v2126_v15  ;;  %v1405_v14 = vsel %vm375_vm0, %v1337_v0, %v2127_v36 }
 0x85c   : > { %v1409_v27 = vsel %vm1406_vm7, %v1404_v26, %v2131_v52  ;;  %v1410_v17 = vsel %vm1406_vm7, %v1405_v14, %v2132_v18 }
 0x85d   : > { %v1412_v35 = vpack.c.bf16 %v1410_v17, %v1409_v27 }
 0x85f   : > { %v2120_v2 = vpop.permute.xlu0 %2119 }
 0x860   : > { %v2122_v38 = vunpack.i.h.bf16 %v2120_v2  ;;  %v2121_v22 = vunpack.i.l.bf16 %v2120_v2 }
 0x862   : > { %v1407_v63 = vsel %vm1406_vm7, %v1402_v39, %v2121_v22  ;;  %v1408_v8 = vsel %vm1406_vm7, %v1403_v19, %v2122_v38 }
 0x863   : > { %v1411_v44 = vpack.c.bf16 %v1408_v8, %v1407_v63 }
 0x865   : > { %1962 = vmatmul.msk.bf16.vlgmr.msra.gmra.mxu3 %vm1462_vm8, %v1411_v44 }
 0x875   : > { %1963 = vmatmul.msk.bf16.gmra.mxu3 %vm1462_vm8, %v1412_v35 }
 0x8e8   : > { %v1478_v1 = vpop.f32.mrf.mxu3 }
 0x8e9   : > { %v1479_v47 = vadd.f32 %v1478_v1, %v1425_v24 }
 0x8eb   : > { %v1488_v33 = vmax.f32 %v1479_v47, 0.0 }
 0x8ed   : > { %v1492_v56 = vrot.slane %v1488_v33, 7  ;;  %v1500_v28 = vrot.slane %v1488_v33, 1 }
 0x8f0   : > { %v1480_v48 = vpop.f32.mrf.mxu3 }
 0x8f1   : > { %v1481_v49 = vadd.f32 %v1480_v48, %v1425_v24 }
 0x8f3   : > { %v1489_v51 = vmax.f32 %v1481_v49, 0.0 }
 0x8f5   : > { %v2133_v60 = vpack.i.bf16 %v1489_v51, %v1488_v33  ;;  %v1493_v53 = vrot.slane %v1489_v51, 7  ;;  %v1501_v62 = vrot.slane %v1489_v51, 1 }
 0x8f7   : > { %2134 = vrot.lane.b32.xlu0 %v2133_v60, %s2317_s28  ;;  %v1498_v4 = vsel %vm1254_vm1, %v1492_v56, %v1493_v53  ;;  %v1506_v58 = vsel %vm1259_vm11, %v1500_v28, %v1501_v62 }
 0x8f8   : > { %v1483_v50 = vpop.f32.mrf.mxu3  ;;  %v1509_v9 = vmul.f32 %v2871_v41, %v1498_v4  ;;  %v1512_v15 = vmul.f32 %v2889_v6, %v1506_v58  ;;  %v1521_v14 = vmul.f32 %v2894_v12, %v1498_v4  ;;  %v1524_v27 = vmul.f32 %v2887_v16, %v1506_v58 }
 0x8f9   : > { %v1484_v55 = vadd.f32 %v1483_v50, %v1425_v24 }
 0x8fb   : > { %v1490_v57 = vmax.f32 %v1484_v55, 0.0 }
 0x8fd   : > { %v1502_v0 = vrot.slane %v1490_v57, 1  ;;  %v1494_v5 = vrot.slane %v1490_v57, 7 }
 0x8ff   : > { %v1505_v3 = vsel %vm1259_vm11, %v1501_v62, %v1502_v0  ;;  %v1497_v36 = vsel %vm1254_vm1, %v1493_v53, %v1494_v5 }
 0x900   : > { %v1485_v45 = vpop.f32.mrf.mxu3  ;;  %v1513_v10 = vmul.f32 %v2877_v31, %v1505_v3  ;;  %v1525_v17 = vmul.f32 %v2906_v32, %v1505_v3  ;;  %v1510_v21 = vmul.f32 %v2898_v40, %v1497_v36  ;;  %v1522_v34 = vmul.f32 %v2896_v61, %v1497_v36 }
 0x901   : > { %v1486_v11 = vadd.f32 %v1485_v45, %v1425_v24 }
 0x902   : > { %v1517_v42 = vadd.f32 %v1513_v10, %v1509_v9  ;;  %v1529_v49 = vadd.f32 %v1525_v17, %v1521_v14 }
 0x903   : > { %v1491_v54 = vmax.f32 %v1486_v11, 0.0 }
 0x905   : > { %v1495_v18 = vrot.slane %v1491_v54, 7  ;;  %v1503_v52 = vrot.slane %v1491_v54, 1  ;;  %v2143_v26 = vpack.i.bf16 %v1491_v54, %v1490_v57 }
 0x907   : > { %2144 = vrot.lane.b32.xlu2 %v2143_v26, %s2317_s28  ;;  %v1499_v35 = vsel %vm1254_vm1, %v1495_v18, %v1492_v56  ;;  %v1496_v2 = vsel %vm1254_vm1, %v1494_v5, %v1495_v18  ;;  %v1504_v38 = vsel %vm1259_vm11, %v1502_v0, %v1503_v52  ;;  %v1507_v22 = vsel %vm1259_vm11, %v1503_v52, %v1500_v28  ;;  %s2264_s28 = sshra.s32 %s1799_s26, 4  ;;  %s2265_s28 = int_to_ptr.hbm [resolvable:$true] %s2264_s28 }
 0x908   : > { %v1508_v39 = vmul.f32 %v2898_v40, %v1499_v35  ;;  %v1520_v19 = vmul.f32 %v2896_v61, %v1499_v35  ;;  %v1514_v63 = vmul.f32 %v2889_v6, %v1504_v38  ;;  %v1515_v8 = vmul.f32 %v2877_v31, %v1507_v22  ;;  %v2017_v31 = vld [vmem:[%s3145_s7 + $0x28] sm:$0xff]  ;;  %v2014_v6 = vld [vmem:[%s3145_s7 + $0x10] sm:$0xff]  ;;  %s2266_s25 = scalar_lea.hbm %s2265_s28, 32  ;;  %p2271_p0 = scmp.lt.s32.totalorder %s2265_s28, %s3146_s8 }
 0x909   : > { %v1523_v44 = vmul.f32 %v2894_v12, %v1496_v2  ;;  %v1526_v1 = vmul.f32 %v2887_v16, %v1504_v38  ;;  %v1527_v24 = vmul.f32 %v2906_v32, %v1507_v22  ;;  %v1511_v47 = vmul.f32 %v2871_v41, %v1496_v2  ;;  %1631 = vmatpush.bf16.msra.mxu2 %v2017_v31  ;;  %v2016_v41 = vld [vmem:[%s3145_s7 + $0x20] sm:$0xff]  ;;  %v2015_v16 = vld [vmem:[%s3145_s7 + $0x18] sm:$0xff]  ;;  %v2013_v12 = vld [vmem:[%s3145_s7 + $0x8] sm:$0xff]  ;;  %p2267_p11 = scmp.ne.s32.totalorder %s2265_s28, %s2266_s25 }
 0x90a   : > { %v1528_v48 = vadd.f32 %v1524_v27, %v1520_v19  ;;  %v1518_v59 = vadd.f32 %v1514_v63, %v1510_v21  ;;  %v1516_v33 = vadd.f32 %v1512_v15, %v1508_v39  ;;  %v2012_v32 = vld [vmem:[%s3145_s7] sm:$0xff] }
 0x90b   : > { %v1530_v51 = vadd.f32 %v1526_v1, %v1522_v34  ;;  %v1531_v40 = vadd.f32 %v1527_v24, %v1523_v44  ;;  %v1519_v60 = vadd.f32 %v1515_v8, %v1511_v47  ;;  %p2268_p12 = pnand %p2267_p11, %p2423_p5 }
 0x90c   : > { %v2138_v61 = vpack.i.bf16 %v1529_v49, %v1528_v48 }
 0x90d   : > { %v2148_v50 = vpack.i.bf16 %v1531_v40, %v1530_v51  ;;  %1632 = vmatpush.bf16.msra.mxu2 %v2016_v41  ;;  %p2269_p13 = pneg %p2268_p12 }
 0x90e   : > { %2139 = vrot.lane.b32.xlu1 %v2138_v61, %s2322_s24 }
 0x90f   : > { %2149 = vrot.lane.b32.xlu0 %v2148_v50, %s2322_s24 }
 0x911   : > { %1633 = vmatpush.bf16.msra.mxu2 %v2015_v16 }
 0x915   : > { %1634 = vmatpush.bf16.msra.mxu2 %v2014_v6 }
 0x919   : > { %1635 = vmatpush.bf16.msra.mxu2 %v2013_v12 }
 0x91d   : > { %1636 = vmatpush.bf16.msra.mxu2 %v2012_v32 }
 0x961   : > { %v2145_v55 = vpop.permute.xlu2 %2144 }
 0x962   : > { %v2147_v62 = vunpack.i.h.bf16 %v2145_v55  ;;  %v2146_v0 = vunpack.i.l.bf16 %v2145_v55  ;;  %v3066_v55 = vld [vmem:[%s308_s29 + $0x1] ss:$0 sm:$0xff] }
 0x964   : > { %v1566_v58 = vsel %vm375_vm0, %v1518_v59, %v2146_v0  ;;  %v1567_v54 = vsel %vm375_vm0, %v1519_v60, %v2147_v62 }
 0x969   : > { %v2135_v53 = vpop.permute.xlu0 %2134 }
 0x96a   : > { %v2137_v56 = vunpack.i.h.bf16 %v2135_v53  ;;  %v2136_v57 = vunpack.i.l.bf16 %v2135_v53  ;;  %v3064_v53 = vld [vmem:[%s308_s29] ss:$0 sm:$0xff] }
 0x96c   : > { %v1564_v45 = vsel %vm375_vm0, %v1516_v33, %v2136_v57  ;;  %v1565_v9 = vsel %vm375_vm0, %v1517_v42, %v2137_v56  ;;  %v1586_v42 = vperm.slane %v2841_v30, 7 }
 0x980   : > { %v2140_v4 = vpop.permute.xlu1 %2139 }
 0x981   : > { %v2142_v28 = vunpack.i.h.bf16 %v2140_v4  ;;  %v2141_v5 = vunpack.i.l.bf16 %v2140_v4  ;;  %v2150_v3 = vpop.permute.xlu0 %2149 }
 0x982   : > { %v2152_v10 = vunpack.i.h.bf16 %v2150_v3  ;;  %v2151_v11 = vunpack.i.l.bf16 %v2150_v3 }
 0x983   : > { %v1568_v36 = vsel %vm1406_vm7, %v1564_v45, %v2141_v5  ;;  %v1569_v15 = vsel %vm1406_vm7, %v1565_v9, %v2142_v28 }
 0x984   : > { %v1572_v18 = vpack.c.bf16 %v1569_v15, %v1568_v36  ;;  %v1570_v52 = vsel %vm1406_vm7, %v1566_v58, %v2151_v11  ;;  %v1571_v26 = vsel %vm1406_vm7, %v1567_v54, %v2152_v10  ;;  %v313_v54 = vld [vmem:[%s3143_s5 + $0x8] sm:$0xff] }
 0x985   : > { %v1573_v14 = vpack.c.bf16 %v1571_v26, %v1570_v52  ;;  %v1740_v26 = vperm.slane %v313_v54, 0 }
 0x986   : > { %1988 = vmatmul.msk.bf16.vlgmr.msra.gmra.mxu2 %vm1462_vm8, %v1572_v18 }
 0x996   : > { %1989 = vmatmul.msk.bf16.gmra.mxu2 %vm1462_vm8, %v1573_v14 }
 0xa09   : > { %v1638_v27 = vpop.f32.mrf.mxu2 }
 0xa0a   : > { %v1639_v17 = vadd.f32 %v1638_v27, %v1586_v42 }
 0xa0c   : > { %v1648_v21 = vadd.f32 %v1639_v17, %v2855_v20  ;;  %v1745_v17 = vperm.slane %v313_v54, 1 }
 0xa0e   : > { %v1652_v34 = vsel %vm375_vm0, %v1648_v21, 0.0 }
 0xa0f   : > { %1653 = vadd.xlane.f32.xlu1 %v1652_v34 }
 0xa11   : > { %v1640_v35 = vpop.f32.mrf.mxu2 }
 0xa12   : > { %v1641_v2 = vadd.f32 %v1640_v35, %v1586_v42 }
 0xa14   : > { %v1649_v38 = vadd.f32 %v1641_v2, %v2857_v23 }
 0xa16   : > { %v1655_v22 = vsel %vm375_vm0, %v1649_v38, 0.0 }
 0xa17   : > { %1656 = vadd.xlane.f32.xlu2 %v1655_v22 }
 0xa19   : > { %v1643_v39 = vpop.f32.mrf.mxu2 }
 0xa1a   : > { %v1644_v19 = vadd.f32 %v1643_v39, %v1586_v42 }
 0xa1c   : > { %v1650_v63 = vadd.f32 %v1644_v19, %v2868_v43 }
 0xa1e   : > { %v1658_v30 = vsel %vm375_vm0, %v1650_v63, 0.0 }
 0xa1f   : > { %1659 = vadd.xlane.f32.xlu0 %v1658_v30 }
 0xa21   : > { %v1645_v8 = vpop.f32.mrf.mxu2 }
 0xa22   : > { %v1646_v44 = vadd.f32 %v1645_v8, %v1586_v42 }
 0xa24   : > { %v1651_v20 = vadd.f32 %v1646_v44, %v2902_v25 }
 0xa26   : > { %v1661_v23 = vsel %vm375_vm0, %v1651_v20, 0.0 }
 0xa27   : > { %1662 = vadd.xlane.f32.xlu2 %v1661_v23 }
 0xa82   : > { %v1654_v1 = vpop.xlane.xlu1 %1653 }
 0xa83   : > { %v1664_v24 = vmul.f32 %v1654_v1, %v2772_v37 }
 0xa85   : > { %v1668_v47 = vsub.f32 %v1648_v21, %v1664_v24 }
 0xa87   : > { %v1672_v48 = vmul.f32 %v1668_v47, %v1668_v47 }
 0xa89   : > { %v1676_v43 = vsel %vm375_vm0, %v1672_v48, 0.0 }
 0xa8a   : > { %v1657_v49 = vpop.xlane.xlu2 %1656  ;;  %1677 = vadd.xlane.f32.xlu1 %v1676_v43 }
 0xa8b   : > { %v1665_v59 = vmul.f32 %v1657_v49, %v2772_v37 }
 0xa8d   : > { %v3047_v33 = vsub.f32 %v1649_v38, %v1665_v59 }
 0xa8f   : > { %v1673_v51 = vmul.f32 %v3047_v33, %v3047_v33 }
 0xa91   : > { %v1679_v25 = vsel %vm375_vm0, %v1673_v51, 0.0 }
 0xa92   : > { %1680 = vadd.xlane.f32.xlu2 %v1679_v25  ;;  %v1660_v40 = vpop.xlane.xlu0 %1659 }
 0xa93   : > { %v1666_v60 = vmul.f32 %v1660_v40, %v2772_v37 }
 0xa95   : > { %v3053_v61 = vsub.f32 %v1650_v63, %v1666_v60 }
 0xa97   : > { %v1674_v50 = vmul.f32 %v3053_v61, %v3053_v61 }
 0xa99   : > { %v1682_v31 = vsel %vm375_vm0, %v1674_v50, 0.0 }
 0xa9a   : > { %v1663_v41 = vpop.xlane.xlu2 %1662  ;;  %1683 = vadd.xlane.f32.xlu0 %v1682_v31 }
 0xa9b   : > { %v1667_v16 = vmul.f32 %v1663_v41, %v2772_v37 }
 0xa9d   : > { %v3059_v6 = vsub.f32 %v1651_v20, %v1667_v16 }
 0xa9f   : > { %v1675_v12 = vmul.f32 %v3059_v6, %v3059_v6 }
 0xaa1   : > { %v1685_v32 = vsel %vm375_vm0, %v1675_v12, 0.0 }
 0xaa2   : > { %1686 = vadd.xlane.f32.xlu1 %v1685_v32 }
 0xaaa   : > { %1756 = vrot.lane.b32.xlu2 %v3064_v53, %s2321_s23 }
 0xaae   : > { %1772 = vrot.lane.b32.xlu0 %v3066_v55, %s2321_s23  ;;  %s2270_s23 = scalar_lea.hbm %s3146_s8, 64 }
 0xaaf   : > { %p2272_p1 = scmp.lt.s32.totalorder %s2270_s23, %s2266_s25 }
 0xab1   : > { %p2273_p2 = por %p2272_p1, %p2271_p0 }
 0xab3   : > { %p2274_p3 = pnand %p2273_p2, %p2269_p13 }
 0xafd   : > { %v1678_v56 = vpop.xlane.xlu1 %1677 }
 0xafe   : > { %v1688_v57 = vmul.f32 %v1678_v56, %v2772_v37 }
 0xb00   : > { %v1692_v62 = vadd.f32 1e-05, %v1688_v57 }
 0xb02   : > { %2229 = vrsqrt.f32 %v1692_v62  ;;  %vm1702_vm1 = vweird.f32 %v1692_v62 }
 0xb05   : > { %v1681_v0 = vpop.xlane.xlu2 %1680 }
 0xb06   : > { %v1689_v4 = vmul.f32 %v1681_v0, %v2772_v37 }
 0xb08   : > { %v2230_v28 = vpop.eup %2229  ;;  %v1693_v5 = vadd.f32 1e-05, %v1689_v4 }
 0xb09   : > { %v1697_v3 = vmul.f32 %v2230_v28, %v1692_v62  ;;  %vm1703_vm11 = vweird.f32 %v2230_v28 }
 0xb0a   : > { %2231 = vrsqrt.f32 %v1693_v5  ;;  %vm1704_vm9 = vmor %vm1702_vm1, %vm1703_vm11  ;;  %vm1712_vm12 = vweird.f32 %v1693_v5 }
 0xb0b   : > { %v1698_v45 = vmul.f32 %v2230_v28, %v1697_v3 }
 0xb0d   : > { %v1699_v9 = vmul.f32 0.5, %v1698_v45  ;;  %v1684_v10 = vpop.xlane.xlu0 %1683  ;;  %v1757_v8 = vpop.permute.xlu2 %1756 }
 0xb0e   : > { %v1690_v11 = vmul.f32 %v1684_v10, %v2772_v37 }
 0xb0f   : > { %v1700_v58 = vsub.f32 1.5, %v1699_v9 }
 0xb10   : > { %v2232_v36 = vpop.eup %2231  ;;  %v1694_v15 = vadd.f32 1e-05, %v1690_v11 }
 0xb11   : > { %v1701_v18 = vmul.f32 %v2230_v28, %v1700_v58  ;;  %v1707_v52 = vmul.f32 %v2232_v36, %v1693_v5  ;;  %vm1713_vm10 = vweird.f32 %v2232_v36 }
 0xb12   : > { %2233 = vrsqrt.f32 %v1694_v15  ;;  %vm1714_vm13 = vmor %vm1712_vm12, %vm1713_vm10  ;;  %vm1722_vm15 = vweird.f32 %v1694_v15 }
 0xb13   : > { %v1705_v14 = vsel %vm1704_vm9, %v2230_v28, %v1701_v18  ;;  %v1708_v42 = vmul.f32 %v2232_v36, %v1707_v52 }
 0xb14   : > { %v1736_v27 = vmul.f32 %v1705_v14, %v1668_v47 }
 0xb15   : > { %v1709_v21 = vmul.f32 0.5, %v1708_v42  ;;  %v1687_v34 = vpop.xlane.xlu1 %1686 }
 0xb16   : > { %v1691_v35 = vmul.f32 %v1687_v34, %v2772_v37  ;;  %v1741_v2 = vmul.f32 %v1740_v26, %v1736_v27 }
 0xb17   : > { %v1710_v38 = vsub.f32 1.5, %v1709_v21 }
 0xb18   : > { %v2234_v22 = vpop.eup %2233  ;;  %v1695_v39 = vadd.f32 1e-05, %v1691_v35  ;;  %v1746_v19 = vadd.f32 %v1745_v17, %v1741_v2 }
 0xb19   : > { %v1711_v63 = vmul.f32 %v2232_v36, %v1710_v38  ;;  %v1717_v30 = vmul.f32 %v2234_v22, %v1694_v15  ;;  %vm1723_vm14 = vweird.f32 %v2234_v22 }
 0xb1a   : > { %2235 = vrsqrt.f32 %v1695_v39  ;;  %v1754_v44 = vmul.f32 %v3064_v53, %v1746_v19  ;;  %vm1724_vm2 = vmor %vm1722_vm15, %vm1723_vm14  ;;  %vm1732_vm4 = vweird.f32 %v1695_v39 }
 0xb1b   : > { %v1715_v20 = vsel %vm1714_vm13, %v2232_v36, %v1711_v63  ;;  %v1718_v23 = vmul.f32 %v2234_v22, %v1717_v30 }
 0xb1c   : > { %v1737_v37 = vmul.f32 %v1715_v20, %v3047_v33  ;;  %v1759_v1 = vadd.f32 %v1757_v8, %v1754_v44 }
 0xb1d   : > { %v1719_v24 = vmul.f32 0.5, %v1718_v23 }
 0xb1e   : > { %v1742_v47 = vmul.f32 %v1740_v26, %v1737_v37  ;;  %v1761_v48 = vmul.f32 %v2765_v7, %v1759_v1 }
 0xb1f   : > { %v1720_v43 = vsub.f32 1.5, %v1719_v24 }
 0xb20   : > { %v2236_v49 = vpop.eup %2235  ;;  %v1747_v59 = vadd.f32 %v1745_v17, %v1742_v47  ;;  %1763 = vst.msk [vmem:[%s3085_s16] sm:$0xff] %vm375_vm0, %v1761_v48 }
 0xb21   : > { %v1721_v51 = vmul.f32 %v2234_v22, %v1720_v43  ;;  %v1727_v25 = vmul.f32 %v2236_v49, %v1695_v39  ;;  %vm1733_vm3 = vweird.f32 %v2236_v49 }
 0xb22   : > { %v1755_v33 = vmul.f32 %v3064_v53, %v1747_v59  ;;  %v1773_v53 = vpop.permute.xlu0 %1772  ;;  %vm1734_vm5 = vmor %vm1732_vm4, %vm1733_vm3 }
 0xb23   : > { %v1725_v40 = vsel %vm1724_vm2, %v2234_v22, %v1721_v51  ;;  %v1728_v60 = vmul.f32 %v2236_v49, %v1727_v25 }
 0xb24   : > { %v1760_v50 = vadd.f32 %v1757_v8, %v1755_v33  ;;  %v1738_v7 = vmul.f32 %v1725_v40, %v3053_v61 }
 0xb25   : > { %v1729_v31 = vmul.f32 0.5, %v1728_v60 }
 0xb26   : > { %v1762_v41 = vmul.f32 %v2768_v29, %v1760_v50  ;;  %v1743_v16 = vmul.f32 %v1740_v26, %v1738_v7 }
 0xb27   : > { %v1730_v12 = vsub.f32 1.5, %v1729_v31 }
 0xb28   : > { %1764 = vst.msk [vmem:[%s3085_s16 + $0x8] sm:$0xff] %vm375_vm0, %v1762_v41  ;;  %v1748_v32 = vadd.f32 %v1745_v17, %v1743_v16 }
 0xb29   : > { %v1731_v56 = vmul.f32 %v2236_v49, %v1730_v12 }
 0xb2a   : > { %v1770_v57 = vmul.f32 %v3066_v55, %v1748_v32 }
 0xb2b   : > { %v1735_v62 = vsel %vm1734_vm5, %v2236_v49, %v1731_v56 }
 0xb2c   : > { %v1739_v61 = vmul.f32 %v1735_v62, %v3059_v6  ;;  %v1775_v29 = vadd.f32 %v1773_v53, %v1770_v57 }
 0xb2e   : > { %v1744_v0 = vmul.f32 %v1740_v26, %v1739_v61  ;;  %v1777_v4 = vmul.f32 %v2827_v13, %v1775_v29 }
 0xb30   : > { %v1749_v28 = vadd.f32 %v1745_v17, %v1744_v0  ;;  %1991 = vst.msk [vmem:[%s3085_s16 + $0x10] sm:$0xff] %vm375_vm0, %v1777_v4 }
 0xb32   : > { %v1771_v5 = vmul.f32 %v3066_v55, %v1749_v28 }
 0xb34   : > { %v1776_v3 = vadd.f32 %v1773_v53, %v1771_v5 }
 0xb36   : > { %v1778_v6 = vmul.f32 %v2830_v46, %v1776_v3 }
 0xb38   : > { %1992 = vst.msk [vmem:[%s3085_s16 + $0x18] sm:$0xff] %vm375_vm0, %v1778_v6 }
 0xb39   : > { %2277 = shalt.err (!%p2274_p3)
}
 0xb3a   : > { %s2336_s30 = smov 128   ;;  %s3150_s16 = smov 8  }
 0xb3b   : > { %2020 = dma.vmem_to_hbm [thread:$0]  (%p2423_p5), %s1797_s21, 512, %s1799_s26, %s1783_s0, %s2336_s30, %s2336_s30, %s3150_s16  }
 0xb3c PF: > { %p2026_p4 = scmp.ge.s32.totalorder %s2314_s12, 2  ;;  %s1813_s15 = sand.u32 1, %s2302_s9  }
 0xb3d   : > { %s1814_s24 = scalar_lea.sflag [#allocation6], %s1813_s15 }
 0xb3e   : > { %p2023_p7 = pnand %p2026_p4, %p2427_p6 }
 0xb40   : > { %p2024_p8 = pneg %p2023_p7 }
 0xb42   : > { %2297 = dma.done.wait (%p2024_p8), %s1814_s24, 512  }
 0xb43   : > { %2299 = vsyncadd (%p2024_p8), %s1814_s24, 4294966784  ;;  %p26_p9 = scmp.ge.s32.totalorder %s2410_s14, 4   ;;  %s3151_s9 = smov %s2306_s10 }
 0xb44   : > { %s3152_s10 = smov %s2310_s11  ;;  %s3153_s11 = smov %s2421_s17 }
 0xb45   : > { %s3154_s12 = smov %s2410_s14  ;;  %28 = sbr.rel (!%p26_p9) target bundleno = 9 (0x9), region = 88 }
 0xb4a   :  { %1820 = vsyncpa [#allocation6], 1 }
 0xb4b   :  { %1822 = vsyncpa [#allocation6 + $0x1], 1 }

// kernel: tpu_custom_call.1
= control target key start
LH: loop header
LB: loop body
LE: loop exit
PB: predicated region body
PF: predicated region fallthrough
CT: control target
= control target key end

     0   :  { %s2234_s30 = smov [#allocation4]   ;;  %s2966_s0 = inlined_call_operand.vmem [shape: s32[4], index: 0, kind: input, shape index: {}]   ;;  %s2967_s1 = inlined_call_operand.vmem [shape: bf16[4,16,32], index: 1, kind: input, shape index: {}]   ;;  %s2968_s2 = inlined_call_operand.vmem [shape: f32[4,1,64], index: 2, kind: input, shape index: {}]   ;;  %s2969_s3 = inlined_call_operand.vmem [shape: bf16[32,96], index: 3, kind: input, shape index: {}]   ;;  %s2970_s4 = inlined_call_operand.vmem [shape: bf16[32,32], index: 4, kind: input, shape index: {}]   ;;  %s2971_s5 = inlined_call_operand.vmem [shape: f32[16,32], index: 5, kind: input, shape index: {}]   ;;  %s2972_s6 = inlined_call_operand.vmem [shape: bf16[96,32], index: 6, kind: input, shape index: {}]   ;;  %s2973_s7 = inlined_call_operand.vmem [shape: bf16[96,32], index: 7, kind: input, shape index: {}]   ;;  %s2974_s8 = inlined_call_operand.hbm [shape: f32[4,16,32], index: 8, kind: output, shape index: {}]  }
   0x1   :  { %s14_s29 = sshll.u32 %s2966_s0, 4  ;;  %s15_s29 = int_to_ptr.vmem [resolvable:$true] %s14_s29 }
   0x2   :  { %17 = dma.vmem_to_smem %s15_s29, 16, %s2234_s30, [#allocation3] }
   0x3   :  { %2212 = dma.done.wait [#allocation3], 16 }
   0x4   :  { %2213 = vsyncadd [#allocation3], 4294967280 }
   0x5   :  { %20 = sfence }
   0x6   :  { %21 = vsyncpa [#allocation6], 0 }
   0x7   :  { %23 = vsyncpa [#allocation6 + $0x1], 0  ;;  %s2303_s9 = smov 0   ;;  %s2305_s10 = smov 0  }
   0x8   :  { %s2307_s11 = smov 0   ;;  %s2309_s12 = smov 0  }
   0x9 LB: > { %s2324_s0 = sadd.s32 4294967295, %s2232_s12   ;;  %s1810_s13 = sadd.s32 4294967294, %s2232_s12   ;;  %s2232_s12 = sphi %s2309_s12, %s2980_s12   ;;  %s2228_s11 = sphi %s2307_s11, %s2979_s11   ;;  %s2224_s10 = sphi %s2305_s10, %s2978_s10   ;;  %s2220_s9 = sphi %s2303_s9, %s2977_s9  }
   0xa   : > { %s2328_s14 = sadd.s32 1, %s2232_s12   ;;  %s193_s15 = sadd.s32 1, %s2228_s11 }
   0xb   : > { %s190_s16 = ssub.s32 %s2232_s12, %s2328_s14  ;;  %p203_p0 = scmp.ne.s32.totalorder %s2228_s11, %s2224_s10 }
   0xc   : > { %p191_p1 = scmp.eq.s32.totalorder %s190_s16, 0  ;;  %p204_p2 = scmp.eq.s32.totalorder %s2324_s0, 1 }
   0xd   : > { %p209_p3 = scmp.ne.s32.totalorder %s2224_s10, %s2220_s9  ;;  %p210_p4 = scmp.eq.s32.totalorder %s1810_s13, 1 }
   0xe   : > { %s2339_s17 = scalar_select %p191_p1, %s2228_s11, %s193_s15  }
   0xf   : > { %p2341_p5 = por %p204_p2, %p203_p0  ;;  %p2345_p6 = por %p210_p4, %p209_p3 }
  0x10   : > { %p1813_p7 = scmp.ge.s32.totalorder %s2232_s12, 1  ;;  %p261_p8 = scmp.lt.s32.totalorder %s2232_s12, 3 }
  0x12   : > { %p262_p9 = pnand %p1813_p7, %p261_p8 }
  0x13   : > { %s2355_s22 = sshll.u32 (!%p262_p9), %s2324_s0, 1  ;;  %s2235_s28 = smov (!%p262_p9), 32  }
  0x14   : > { %265 = sbr.rel (%p262_p9) target bundleno = 2848 (0xb20), region = 48  ;;  %p299_p10 = scmp.lt.s32.totalorder (!%p262_p9), %s2355_s22, 3 }
  0x15   : > { %s2236_s16 = smov (!%p262_p9), 88   ;;  %s2237_s20 = smov (!%p262_p9), 120  }
  0x16   : > { %s328_s21 = sld [smem:[#allocation4 + %s2355_s22]] (!%p262_p9)  ;;  %s2239_s23 = smov (!%p262_p9), 96  }
  0x17   : > { %s2240_s24 = smov (!%p262_p9), 64   ;;  %s2241_s25 = smov (!%p262_p9), 72  }
  0x18   : > { %s2242_s26 = smov (!%p262_p9), 104   ;;  %s2244_s30 = smov (!%p262_p9), 80  }
  0x19   : > { %v1935_v0 = vld [vmem:[%s2969_s3 + $0x8] sm:$0xff]  ;;  %v2360_v1 = vld [vmem:[%s2971_s5] sm:$0xff]  ;;  %s2368_s27 = scalar_select %p299_p10, %s2355_s22, 3  ;;  %vm375_vm0 = vcmask 261120   ;;  %vm452_vm1 = vcmask 64512   ;;  %v323_v29 = vlaneseq  ;;  %vm473_vm3 = vcmask 130048  }
  0x1a   : > { %v414_v2 = vperm.slane %v2360_v1, 1  ;;  %388 = vmatpush.bf16.msra.mxu0 %v1935_v0  ;;  %v1934_v3 = vld [vmem:[%s2969_s3] sm:$0xff]  ;;  %v2382_v6 = vperm.slane %v2360_v1, 0  ;;  %v2238_v32 = vmov -1e+09   ;;  %v427_v41 = vperm.slane %v2360_v1, 2 }
  0x1b   : > { %s1931_s29 = sshll.u32 %s2368_s27, 3  ;;  %v2406_v30 = vand.u32 127, %v323_v29  ;;  %s2245_s13 = smov 112   ;;  %vm599_vm5 = vcmask 130112   ;;  %vm677_vm6 = vcmask 195712   ;;  %vm755_vm7 = vcmask 261312  }
  0x1c   : > { %416 = vrot.lane.b32.xlu0 %v414_v2, %s2235_s28  ;;  %s2375_s15 = scalar_lea.vmem %s2967_s1, %s1931_s29  ;;  %v2408_v31 = vstv %s328_s21  ;;  %s2243_s29 = smov 56  }
  0x1d   : > { %v1932_v4 = vld [vmem:[%s2375_s15] sm:$0xff]  ;;  %v1933_v5 = vld [vmem:[%s2375_s15 + $0x8] sm:$0xff]  ;;  %vm330_vm2 = vcmp.lt.s32.totalorder %v2406_v30, %v2408_v31  ;;  %s2247_s21 = smov 40  }
  0x1e   : > { %389 = vmatpush.bf16.msra.mxu0 %v1934_v3  ;;  %v2413_v33 = vsel %vm330_vm2, 0.0, %v2238_v32 }
  0x21   : > { %1840 = vmatmul.msk.bf16.vlgmr.msra.gmra.mxu0 %vm375_vm0, %v1932_v4 }
  0x31   : > { %1841 = vmatmul.msk.bf16.gmra.mxu0 %vm375_vm0, %v1933_v5 }
  0x8e   : > { %v417_v8 = vpop.permute.xlu0 %416 }
  0x9e   : > { %v2384_v7 = vpop.f32.mrf.mxu0 }
  0x9f   : > { %v402_v9 = vadd.f32 %v2382_v6, %v2384_v7  ;;  %v419_v10 = vadd.f32 %v417_v8, %v2384_v7 }
  0xa1   : > { %v406_v11 = vmul.f32 0.35355338, %v402_v9  ;;  %v423_v13 = vpack.c.bf16 %v419_v10, %v419_v10 }
  0xa3   : > { %v410_v16 = vpack.c.bf16 %v406_v11, %v406_v11  ;;  %v447_v19 = vunpack.c.l.b16 %v423_v13 }
  0xa5   : > { %v442_v22 = vunpack.c.l.b16 %v410_v16 }
  0xa6   : > { %v2389_v12 = vpop.f32.mrf.mxu0 }
  0xa7   : > { %v403_v14 = vadd.f32 %v2382_v6, %v2389_v12  ;;  %v420_v15 = vadd.f32 %v417_v8, %v2389_v12 }
  0xa9   : > { %v407_v17 = vmul.f32 0.35355338, %v403_v14  ;;  %v424_v18 = vpack.c.bf16 %v420_v15, %v420_v15 }
  0xab   : > { %v411_v20 = vpack.c.bf16 %v407_v17, %v407_v17  ;;  %v448_v21 = vunpack.c.l.b16 %v424_v18 }
  0xad   : > { %v443_v23 = vunpack.c.l.b16 %v411_v20  ;;  %v2394_v24 = vpack.c.b16 %v448_v21, %v447_v19 }
  0xae   : > { %v2419_v40 = vpop.f32.mrf.mxu0 }
  0xaf   : > { %v2396_v25 = vpack.c.b16 %v443_v23, %v442_v22  ;;  %526 = vrot.lane.b32.xlu0 %v2394_v24, %s2236_s16  ;;  %v421_v44 = vadd.f32 %v417_v8, %v2419_v40  ;;  %v404_v3 = vadd.f32 %v2382_v6, %v2419_v40 }
  0xb1   : > { %524 = vrot.lane.b32.xlu1 %v2396_v25, %s2237_s20  ;;  %v425_v46 = vpack.c.bf16 %v421_v44, %v421_v44  ;;  %v408_v5 = vmul.f32 0.35355338, %v404_v3 }
  0xb3   : > { %v765_v48 = vunpack.c.l.b16 %v425_v46 }
  0xb6   : > { %v2424_v42 = vpop.f32.mrf.mxu0 }
  0xb7   : > { %v422_v43 = vadd.f32 %v417_v8, %v2424_v42  ;;  %v405_v4 = vadd.f32 %v2382_v6, %v2424_v42  ;;  %v412_v8 = vpack.c.bf16 %v408_v5, %v408_v5 }
  0xb9   : > { %v426_v45 = vpack.c.bf16 %v422_v43, %v422_v43  ;;  %v760_v11 = vunpack.c.l.b16 %v412_v8 }
  0xbb   : > { %v766_v47 = vunpack.c.l.b16 %v426_v45 }
  0xbd   : > { %v767_v49 = vpack.c.b16 %v766_v47, %v765_v48 }
 0x121   : > { %v527_v26 = vpop.permute.xlu0 %526 }
 0x122   : > { %v532_v27 = vsel %vm452_vm1, %v527_v26, 0 }
 0x123   : > { %541 = vmatpush.bf16.xpose.msra.mxu3 %v532_v27  ;;  %v525_v28 = vpop.permute.xlu1 %524 }
 0x12a   : > { %1844 = vmatmul.msk.bf16.vlgmr.msra.gmra.mxu3 %vm452_vm1, %v525_v28 }
 0x1ad   : > { %v543_v34 = vpop.f32.mrf.mxu3 }
 0x1ae   : > { %v544_v35 = vadd.f32 %v543_v34, %v2413_v33 }
 0x1b0   : > { %v548_v36 = vsel %vm473_vm3, %v544_v35, -inf }
 0x1b1   : > { %549 = vmax.xlane.f32.xlu1 %v548_v36 }
 0x1b5   : > { %v545_v37 = vpop.f32.mrf.mxu3 }
 0x1b6   : > { %v546_v38 = vadd.f32 %v545_v37, %v2413_v33 }
 0x1b8   : > { %v551_v39 = vsel %vm473_vm3, %v546_v38, -inf }
 0x1b9   : > { %552 = vmax.xlane.f32.xlu2 %v551_v39 }
 0x1ca   : > { %450 = vrot.lane.b32.xlu1 %v2394_v24, %s2239_s23 }
 0x1d1   : > { %429 = vrot.lane.b32.xlu2 %v427_v41, %s2240_s24 }
 0x1d2   : > { %682 = vrot.lane.b32.xlu1 %v2394_v24, %s2241_s25 }
 0x1da   : > { %680 = vrot.lane.b32.xlu1 %v2396_v25, %s2242_s26 }
 0x1e2   : > { %842 = vrot.lane.b32.xlu1 %v767_v49, %s2236_s16  ;;  %s338_s16 = sadd.s32 1, %s2355_s22  ;;  %s2246_s22 = smov 48  }
 0x1ea   : > { %996 = vrot.lane.b32.xlu1 %v767_v49, %s2241_s25  ;;  %s2248_s25 = smov 8  }
 0x224   : > { %v550_v53 = vpop.xlane.xlu1 %549 }
 0x225   : > { %v554_v10 = vsub.f32 %v544_v35, %v550_v53 }
 0x227   : > { %v556_v13 = vmul.f32 1.442695, %v554_v10 }
 0x22c   : > { %v553_v50 = vpop.xlane.xlu2 %552 }
 0x22d   : > { %v555_v51 = vsub.f32 %v546_v38, %v553_v50 }
 0x22f   : > { %v558_v52 = vmul.f32 1.442695, %v555_v51 }
 0x231   : > { %2073 = vpow2.f32 %v558_v52 }
 0x232   : > { %2075 = vpow2.f32 %v556_v13 }
 0x234   : > { %v2433_v54 = vpop.permute.xlu2 %429 }
 0x235   : > { %v432_v55 = vadd.f32 %v2433_v54, %v2384_v7  ;;  %v433_v56 = vadd.f32 %v2433_v54, %v2389_v12  ;;  %v409_v7 = vmul.f32 0.35355338, %v405_v4 }
 0x237   : > { %v2074_v57 = vpop.eup %2073  ;;  %v436_v58 = vpack.c.bf16 %v432_v55, %v432_v55  ;;  %v437_v59 = vpack.c.bf16 %v433_v56, %v433_v56  ;;  %v413_v9 = vpack.c.bf16 %v409_v7, %v409_v7 }
 0x238   : > { %v563_v60 = vsel %vm473_vm3, %v2074_v57, 0.0  ;;  %v2076_v15 = vpop.eup %2075 }
 0x239   : > { %v499_v61 = vunpack.c.l.b16 %v436_v58  ;;  %v500_v62 = vunpack.c.l.b16 %v437_v59  ;;  %564 = vadd.xlane.f32.xlu2 %v563_v60  ;;  %v761_v12 = vunpack.c.l.b16 %v413_v9  ;;  %v560_v16 = vsel %vm473_vm3, %v2076_v15, 0.0 }
 0x23b   : > { %v2440_v63 = vpack.c.b16 %v500_v62, %v499_v61  ;;  %v762_v14 = vpack.c.b16 %v761_v12, %v760_v11 }
 0x23c   : > { %v451_v0 = vpop.permute.xlu1 %450 }
 0x23d   : > { %571 = vrot.lane.b32.xlu0 %v2440_v63, %s2243_s29  ;;  %v457_v2 = vsel %vm452_vm1, %v451_v0, 0 }
 0x23e   : > { %466 = vmatpush.bf16.xpose.msra.mxu1 %v457_v2 }
 0x244   : > { %v683_v17 = vpop.permute.xlu1 %682 }
 0x245   : > { %1842 = vmatmul.msk.bf16.vlgmr.msra.gmra.mxu1 %vm452_vm1, %v2396_v25  ;;  %v688_v19 = vsel %vm452_vm1, %v683_v17, 0 }
 0x24c   : > { %v681_v28 = vpop.permute.xlu1 %680 }
 0x251   : > { %604 = vrot.lane.b32.xlu2 %v2394_v24, %s2244_s30 }
 0x254   : > { %v843_v39 = vpop.permute.xlu1 %842 }
 0x255   : > { %v848_v43 = vsel %vm452_vm1, %v843_v39, 0 }
 0x259   : > { %919 = vrot.lane.b32.xlu2 %v767_v49, %s2244_s30 }
 0x25c   : > { %v997_v45 = vpop.permute.xlu1 %996 }
 0x25d   : > { %v1002_v48 = vsel %vm452_vm1, %v997_v45, 0 }
 0x261   : > { %994 = vrot.lane.b32.xlu2 %v762_v14, %s2242_s26  ;;  %s2249_s26 = smov 16  }
 0x267   : > { %561 = vadd.xlane.f32.xlu0 %v560_v16 }
 0x27b   : > { %602 = vrot.lane.b32.xlu0 %v2396_v25, %s2245_s13 }
 0x283   : > { %768 = vrot.lane.b32.xlu0 %v767_v49, %s2239_s23 }
 0x28b   : > { %840 = vrot.lane.b32.xlu0 %v762_v14, %s2237_s20  ;;  %s339_s20 = sld [smem:[#allocation4 + %s338_s16]] }
 0x291   : > { %v2480_v60 = vstv %s339_s20  ;;  %s2866_s20 = scalar_lea.vmem %s2968_s2, %s2368_s27 }
 0x292   : > { %vm341_vm4 = vcmp.lt.s32.totalorder %v2406_v30, %v2480_v60 }
 0x293   : > { %917 = vrot.lane.b32.xlu0 %v762_v14, %s2245_s13  ;;  %v2487_v3 = vsel %vm341_vm4, 0.0, %v2238_v32 }
 0x2ac   : > { %v565_v6 = vpop.xlane.xlu2 %564 }
 0x2ad   : > { %2077 = vrcp.f32 %v565_v6 }
 0x2af   : > { %v572_v18 = vpop.permute.xlu0 %571 }
 0x2b0   : > { %584 = vmatpush.bf16.msra.mxu2 %v572_v18 }
 0x2b3   : > { %v2078_v35 = vpop.eup %2077 }
 0x2b4   : > { %697 = vmatpush.bf16.xpose.msrb.mxu2 %v688_v19  ;;  %v605_v20 = vpop.permute.xlu2 %604  ;;  %v569_v38 = vmul.f32 %v2078_v35, %v2074_v57 }
 0x2b5   : > { %v610_v21 = vsel %vm452_vm1, %v605_v20, 0 }
 0x2b6   : > { %619 = vmatpush.bf16.xpose.msrb.mxu1 %v610_v21 }
 0x2bc   : > { %v920_v46 = vpop.permute.xlu2 %919 }
 0x2bd   : > { %v925_v50 = vsel %vm452_vm1, %v920_v46, 0 }
 0x2c2   : > { %v468_v22 = vpop.f32.mrf.mxu1 }
 0x2c3   : > { %v2460_v23 = vadd.f32 %v468_v22, %v2413_v33 }
 0x2c4   : > { %v995_v53 = vpop.permute.xlu2 %994 }
 0x2c5   : > { %v474_v24 = vsel %vm473_vm3, %v2460_v23, -inf }
 0x2c6   : > { %475 = vmax.xlane.f32.xlu1 %v474_v24 }
 0x2ca   : > { %v470_v25 = vpop.f32.mrf.mxu1 }
 0x2cb   : > { %v471_v26 = vadd.f32 %v470_v25, %v2413_v33 }
 0x2cd   : > { %v477_v27 = vsel %vm473_vm3, %v471_v26, -inf }
 0x2ce   : > { %478 = vmax.xlane.f32.xlu0 %v477_v27 }
 0x2da   : > { %v562_v34 = vpop.xlane.xlu0 %561 }
 0x2db   : > { %2079 = vrcp.f32 %v562_v34 }
 0x2e1   : > { %v2080_v36 = vpop.eup %2079 }
 0x2e2   : > { %v568_v37 = vmul.f32 %v2080_v36, %v2076_v15 }
 0x2e4   : > { %v570_v41 = vpack.c.bf16 %v569_v38, %v568_v37 }
 0x2e6   : > { %1845 = vmatmul.msk.bf16.vlgmr.msra.gmra.mxu2 %vm473_vm3, %v570_v41 }
 0x2e7   : > { %857 = vmatpush.bf16.xpose.msra.mxu2 %v848_v43 }
 0x2ed   : > { %v603_v44 = vpop.permute.xlu0 %602 }
 0x2ee   : > { %1846 = vmatmul.msk.bf16.vlgmr.msrb.gmra.mxu1 %vm452_vm1, %v603_v44 }
 0x2f5   : > { %v769_v47 = vpop.permute.xlu0 %768 }
 0x2f6   : > { %v774_v49 = vsel %vm452_vm1, %v769_v47, 0  ;;  %1848 = vmatmul.msk.bf16.vlgmr.msrb.gmra.mxu2 %vm452_vm1, %v681_v28 }
 0x2f7   : > { %1011 = vmatpush.bf16.xpose.msrb.mxu2 %v1002_v48  ;;  %783 = vmatpush.bf16.xpose.msra.mxu1 %v774_v49 }
 0x2fd   : > { %v841_v51 = vpop.permute.xlu0 %840 }
 0x2fe   : > { %1850 = vmatmul.msk.bf16.vlgmr.msra.gmra.mxu1 %vm452_vm1, %v762_v14 }
 0x2ff   : > { %934 = vmatpush.bf16.xpose.msrb.mxu1 %v925_v50 }
 0x305   : > { %v918_v52 = vpop.permute.xlu0 %917 }
 0x306   : > { %1852 = vmatmul.msk.bf16.vlgmr.msra.gmra.mxu2 %vm452_vm1, %v841_v51 }
 0x30e   : > { %1854 = vmatmul.msk.bf16.vlgmr.msrb.gmra.mxu1 %vm452_vm1, %v918_v52 }
 0x316   : > { %1856 = vmatmul.msk.bf16.vlgmr.msrb.gmra.mxu2 %vm452_vm1, %v995_v53 }
 0x339   : > { %v476_v32 = vpop.xlane.xlu1 %475 }
 0x33a   : > { %v480_v14 = vsub.f32 %v2460_v23, %v476_v32 }
 0x33c   : > { %v482_v16 = vmul.f32 1.442695, %v480_v14 }
 0x341   : > { %v479_v58 = vpop.xlane.xlu0 %478 }
 0x342   : > { %v481_v62 = vsub.f32 %v471_v26, %v479_v58 }
 0x344   : > { %v484_v2 = vmul.f32 1.442695, %v481_v62  ;;  %v434_v62 = vadd.f32 %v2433_v54, %v2419_v40 }
 0x346   : > { %2081 = vpow2.f32 %v484_v2 }
 0x347   : > { %2083 = vpow2.f32 %v482_v16 }
 0x34c   : > { %v2491_v8 = vpop.eup %2081 }
 0x34d   : > { %v489_v30 = vsel %vm473_vm3, %v2491_v8, 0.0  ;;  %v2508_v19 = vpop.eup %2083 }
 0x34e   : > { %v486_v20 = vsel %vm473_vm3, %v2508_v19, 0.0 }
 0x369   : > { %v2514_v21 = vpop.f32.mrf.mxu2 }
 0x36b   : > { %v621_v55 = vpop.f32.mrf.mxu1 }
 0x36c   : > { %v622_v56 = vadd.f32 %v621_v55, %v2413_v33 }
 0x36e   : > { %v626_v57 = vsel %vm473_vm3, %v622_v56, -inf }
 0x36f   : > { %627 = vmax.xlane.f32.xlu2 %v626_v57 }
 0x371   : > { %v2518_v22 = vpop.f32.mrf.mxu2 }
 0x373   : > { %v623_v59 = vpop.f32.mrf.mxu1 }
 0x374   : > { %v624_v61 = vadd.f32 %v623_v59, %v2413_v33 }
 0x376   : > { %v629_v0 = vsel %vm473_vm3, %v624_v61, -inf }
 0x377   : > { %630 = vmax.xlane.f32.xlu1 %v629_v0  ;;  %v435_v0 = vadd.f32 %v2433_v54, %v2424_v42 }
 0x379   : > { %v699_v23 = vpop.f32.mrf.mxu2 }
 0x37a   : > { %v2521_v24 = vadd.f32 %v699_v23, %v2413_v33 }
 0x37b   : > { %v785_v4 = vpop.f32.mrf.mxu1 }
 0x37c   : > { %v786_v5 = vadd.f32 %v785_v4, %v2487_v3  ;;  %v704_v25 = vsel %vm473_vm3, %v2521_v24, -inf }
 0x37e   : > { %v790_v7 = vsel %vm473_vm3, %v786_v5, -inf }
 0x37f   : > { %791 = vmax.xlane.f32.xlu1 %v790_v7 }
 0x381   : > { %v701_v27 = vpop.f32.mrf.mxu2 }
 0x382   : > { %v2532_v43 = vadd.f32 %v701_v27, %v2413_v33 }
 0x383   : > { %v787_v9 = vpop.f32.mrf.mxu1 }
 0x384   : > { %v788_v10 = vadd.f32 %v787_v9, %v2487_v3  ;;  %v707_v47 = vsel %vm473_vm3, %v2532_v43, -inf }
 0x386   : > { %v793_v11 = vsel %vm473_vm3, %v788_v10, -inf }
 0x387   : > { %794 = vmax.xlane.f32.xlu0 %v793_v11  ;;  %490 = vadd.xlane.f32.xlu1 %v489_v30  ;;  %v439_v11 = vpack.c.bf16 %v435_v0, %v435_v0 }
 0x389   : > { %v859_v38 = vpop.f32.mrf.mxu2  ;;  %v816_v14 = vunpack.c.l.b16 %v439_v11 }
 0x38a   : > { %v2541_v50 = vadd.f32 %v859_v38, %v2487_v3 }
 0x38b   : > { %v936_v12 = vpop.f32.mrf.mxu1 }
 0x38c   : > { %v2498_v13 = vadd.f32 %v936_v12, %v2487_v3  ;;  %v864_v55 = vsel %vm473_vm3, %v2541_v50, -inf }
 0x38e   : > { %v941_v15 = vsel %vm473_vm3, %v2498_v13, -inf }
 0x38f   : > { %942 = vmax.xlane.f32.xlu0 %v941_v15 }
 0x391   : > { %v861_v49 = vpop.f32.mrf.mxu2 }
 0x392   : > { %v2550_v58 = vadd.f32 %v861_v49, %v2487_v3 }
 0x393   : > { %v938_v6 = vpop.f32.mrf.mxu1 }
 0x394   : > { %v2504_v17 = vadd.f32 %v938_v6, %v2487_v3  ;;  %v867_v59 = vsel %vm473_vm3, %v2550_v58, -inf }
 0x396   : > { %v944_v18 = vsel %vm473_vm3, %v2504_v17, -inf }
 0x397   : > { %945 = vmax.xlane.f32.xlu2 %v944_v18 }
 0x399   : > { %v1013_v57 = vpop.f32.mrf.mxu2 }
 0x39a   : > { %v2561_v2 = vadd.f32 %v1013_v57, %v2487_v3 }
 0x39c   : > { %v1018_v42 = vsel %vm473_vm3, %v2561_v2, -inf }
 0x39f   : > { %487 = vadd.xlane.f32.xlu2 %v486_v20 }
 0x3a1   : > { %v1015_v7 = vpop.f32.mrf.mxu2 }
 0x3a2   : > { %v2567_v40 = vadd.f32 %v1015_v7, %v2487_v3 }
 0x3a3   : > { %502 = vrot.lane.b32.xlu0 %v2440_v63, %s2240_s24 }
 0x3a4   : > { %v1021_v16 = vsel %vm473_vm3, %v2567_v40, -inf }
 0x3b7   : > { %649 = vrot.lane.b32.xlu2 %v2440_v63, %s2246_s22 }
 0x3cd   : > { %705 = vmax.xlane.f32.xlu0 %v704_v25 }
 0x3e1   : > { %727 = vrot.lane.b32.xlu0 %v2440_v63, %s2247_s21 }
 0x3e2   : > { %v628_v26 = vpop.xlane.xlu2 %627 }
 0x3e3   : > { %v632_v28 = vsub.f32 %v622_v56, %v628_v26 }
 0x3e5   : > { %v634_v34 = vmul.f32 1.442695, %v632_v28 }
 0x3e7   : > { %2085 = vpow2.f32 %v634_v34 }
 0x3ea   : > { %v631_v35 = vpop.xlane.xlu1 %630 }
 0x3eb   : > { %v633_v36 = vsub.f32 %v624_v61, %v631_v35 }
 0x3ed   : > { %v2527_v37 = vpop.eup %2085  ;;  %v636_v39 = vmul.f32 1.442695, %v633_v36 }
 0x3ee   : > { %v638_v41 = vsel %vm473_vm3, %v2527_v37, 0.0 }
 0x3ef   : > { %2087 = vpow2.f32 %v636_v39  ;;  %639 = vadd.xlane.f32.xlu2 %v638_v41 }
 0x3f2   : > { %v792_v63 = vpop.xlane.xlu1 %791 }
 0x3f3   : > { %v796_v44 = vsub.f32 %v786_v5, %v792_v63 }
 0x3f5   : > { %v2534_v45 = vpop.eup %2087  ;;  %v798_v46 = vmul.f32 1.442695, %v796_v44 }
 0x3f6   : > { %v641_v48 = vsel %vm473_vm3, %v2534_v45, 0.0 }
 0x3f7   : > { %2089 = vpow2.f32 %v798_v46  ;;  %708 = vmax.xlane.f32.xlu2 %v707_v47  ;;  %642 = vadd.xlane.f32.xlu1 %v641_v48 }
 0x3fa   : > { %v795_v33 = vpop.xlane.xlu0 %794  ;;  %v491_v30 = vpop.xlane.xlu1 %490 }
 0x3fb   : > { %v797_v51 = vsub.f32 %v788_v10, %v795_v33  ;;  %v438_v10 = vpack.c.bf16 %v434_v62, %v434_v62 }
 0x3fd   : > { %v2543_v52 = vpop.eup %2089  ;;  %v800_v53 = vmul.f32 1.442695, %v797_v51  ;;  %v815_v54 = vunpack.c.l.b16 %v438_v10 }
 0x3fe   : > { %v802_v56 = vsel %vm473_vm3, %v2543_v52, 0.0 }
 0x3ff   : > { %865 = vmax.xlane.f32.xlu2 %v864_v55  ;;  %803 = vadd.xlane.f32.xlu1 %v802_v56  ;;  %2091 = vpow2.f32 %v800_v53 }
 0x400   : > { %2093 = vrcp.f32 %v491_v30 }
 0x402   : > { %v943_v32 = vpop.xlane.xlu0 %942 }
 0x403   : > { %v947_v36 = vsub.f32 %v2498_v13, %v943_v32 }
 0x405   : > { %v2554_v61 = vpop.eup %2091  ;;  %v949_v39 = vmul.f32 1.442695, %v947_v36 }
 0x406   : > { %v805_v5 = vsel %vm473_vm3, %v2554_v61, 0.0  ;;  %v2094_v18 = vpop.eup %2093 }
 0x407   : > { %868 = vmax.xlane.f32.xlu1 %v867_v59  ;;  %v495_v23 = vmul.f32 %v2094_v18, %v2491_v8 }
 0x40a   : > { %v946_v4 = vpop.xlane.xlu2 %945 }
 0x40b   : > { %v948_v9 = vsub.f32 %v2504_v17, %v946_v4  ;;  %806 = vadd.xlane.f32.xlu0 %v805_v5  ;;  %v2573_v17 = vpack.c.b16 %v816_v14, %v815_v54 }
 0x40d   : > { %v951_v12 = vmul.f32 1.442695, %v948_v9 }
 0x40f   : > { %1019 = vmax.xlane.f32.xlu1 %v1018_v42  ;;  %2095 = vpow2.f32 %v951_v12 }
 0x412   : > { %v488_v15 = vpop.xlane.xlu2 %487 }
 0x413   : > { %2097 = vrcp.f32 %v488_v15  ;;  %1022 = vmax.xlane.f32.xlu0 %v1021_v16 }
 0x415   : > { %v503_v6 = vpop.permute.xlu0 %502  ;;  %v2575_v3 = vpop.eup %2095 }
 0x416   : > { %515 = vmatpush.bf16.msrb.mxu0 %v503_v6  ;;  %v956_v27 = vsel %vm473_vm3, %v2575_v3, 0.0 }
 0x417   : > { %818 = vrot.lane.b32.xlu2 %v2573_v17, %s2240_s24 }
 0x419   : > { %v2098_v20 = vpop.eup %2097 }
 0x41a   : > { %v494_v25 = vmul.f32 %v2098_v20, %v2508_v19  ;;  %v650_v26 = vpop.permute.xlu2 %649 }
 0x41b   : > { %662 = vmatpush.bf16.msrb.mxu3 %v650_v26  ;;  %957 = vadd.xlane.f32.xlu0 %v956_v27 }
 0x41c   : > { %v496_v28 = vpack.c.bf16 %v495_v23, %v494_v25 }
 0x41e   : > { %1843 = vmatmul.msk.bf16.vlgmr.msrb.gmra.mxu0 %vm473_vm3, %v496_v28 }
 0x440   : > { %v706_v34 = vpop.xlane.xlu0 %705 }
 0x441   : > { %v710_v35 = vsub.f32 %v2521_v24, %v706_v34 }
 0x443   : > { %v712_v38 = vmul.f32 1.442695, %v710_v35 }
 0x445   : > { %2099 = vpow2.f32 %v712_v38 }
 0x446   : > { %2101 = vpow2.f32 %v949_v39 }
 0x44b   : > { %v2586_v8 = vpop.eup %2099 }
 0x44c   : > { %v716_v19 = vsel %vm473_vm3, %v2586_v8, 0.0  ;;  %v2590_v41 = vpop.eup %2101 }
 0x44d   : > { %717 = vadd.xlane.f32.xlu2 %v716_v19  ;;  %v953_v44 = vsel %vm473_vm3, %v2590_v41, 0.0 }
 0x453   : > { %v728_v63 = vpop.permute.xlu0 %727 }
 0x454   : > { %740 = vmatpush.bf16.msra.mxu0 %v728_v63 }
 0x455   : > { %954 = vadd.xlane.f32.xlu2 %v953_v44 }
 0x462   : > { %v640_v24 = vpop.xlane.xlu2 %639 }
 0x463   : > { %2103 = vrcp.f32 %v640_v24 }
 0x469   : > { %v2104_v49 = vpop.eup %2103 }
 0x46a   : > { %v709_v13 = vpop.xlane.xlu2 %708  ;;  %v643_v46 = vpop.xlane.xlu1 %642  ;;  %v646_v51 = vmul.f32 %v2104_v49, %v2527_v37 }
 0x46b   : > { %v711_v47 = vsub.f32 %v2532_v43, %v709_v13  ;;  %2105 = vrcp.f32 %v643_v46 }
 0x46d   : > { %v714_v48 = vmul.f32 1.442695, %v711_v47  ;;  %1041 = vrot.lane.b32.xlu2 %v2573_v17, %s2247_s21  ;;  %s1951_s21 = sshll.u32 %s2324_s0, 5 }
 0x46f   : > { %2107 = vpow2.f32 %v714_v48 }
 0x471   : > { %v2106_v33 = vpop.eup %2105 }
 0x472   : > { %v647_v53 = vmul.f32 %v2106_v33, %v2534_v45  ;;  %v866_v55 = vpop.xlane.xlu2 %865  ;;  %v804_v56 = vpop.xlane.xlu1 %803 }
 0x473   : > { %v870_v57 = vsub.f32 %v2541_v50, %v866_v55 }
 0x474   : > { %v648_v59 = vpack.c.bf16 %v647_v53, %v646_v51 }
 0x475   : > { %v2108_v62 = vpop.eup %2107  ;;  %v872_v0 = vmul.f32 1.442695, %v870_v57 }
 0x476   : > { %1847 = vmatmul.msk.bf16.vlgmr.msrb.gmra.mxu3 %vm473_vm3, %v648_v59  ;;  %v719_v43 = vsel %vm473_vm3, %v2108_v62, 0.0 }
 0x477   : > { %2109 = vpow2.f32 %v872_v0  ;;  %720 = vadd.xlane.f32.xlu1 %v719_v43 }
 0x478   : > { %2111 = vrcp.f32 %v804_v56 }
 0x47a   : > { %v819_v4 = vpop.permute.xlu2 %818  ;;  %v869_v5 = vpop.xlane.xlu1 %868 }
 0x47b   : > { %v871_v7 = vsub.f32 %v2550_v58, %v869_v5  ;;  %831 = vmatpush.bf16.msra.mxu3 %v819_v4 }
 0x47d   : > { %v2603_v37 = vpop.eup %2109  ;;  %v874_v45 = vmul.f32 1.442695, %v871_v7 }
 0x47e   : > { %v807_v9 = vpop.xlane.xlu0 %806  ;;  %v876_v50 = vsel %vm473_vm3, %v2603_v37, 0.0  ;;  %v2112_v10 = vpop.eup %2111 }
 0x47f   : > { %2113 = vpow2.f32 %v874_v45  ;;  %877 = vadd.xlane.f32.xlu1 %v876_v50  ;;  %v810_v58 = vmul.f32 %v2112_v10, %v2543_v52 }
 0x480   : > { %2115 = vrcp.f32 %v807_v9 }
 0x485   : > { %v2114_v11 = vpop.eup %2113 }
 0x486   : > { %v2116_v30 = vpop.eup %2115  ;;  %v1023_v32 = vpop.xlane.xlu0 %1022  ;;  %v879_v12 = vsel %vm473_vm3, %v2114_v11, 0.0 }
 0x487   : > { %v811_v42 = vmul.f32 %v2116_v30, %v2554_v61  ;;  %v1025_v54 = vsub.f32 %v2567_v40, %v1023_v32  ;;  %880 = vadd.xlane.f32.xlu1 %v879_v12  ;;  %v1020_v61 = vpop.xlane.xlu1 %1019 }
 0x488   : > { %v1024_v40 = vsub.f32 %v2561_v2, %v1020_v61 }
 0x489   : > { %v812_v14 = vpack.c.bf16 %v811_v42, %v810_v58  ;;  %v1028_v15 = vmul.f32 1.442695, %v1025_v54  ;;  %v1937_v58 = vld [vmem:[%s2970_s4 + $0x8] sm:$0xff]  ;;  %v1936_v42 = vld [vmem:[%s2970_s4] sm:$0xff] }
 0x48a   : > { %v1026_v20 = vmul.f32 1.442695, %v1024_v40  ;;  %1106 = vmatpush.bf16.msra.mxu1 %v1937_v58 }
 0x48b   : > { %2117 = vpow2.f32 %v1028_v15  ;;  %1851 = vmatmul.msk.bf16.vlgmr.msra.gmra.mxu3 %vm473_vm3, %v812_v14 }
 0x48c   : > { %2119 = vpow2.f32 %v1026_v20 }
 0x48e   : > { %v958_v39 = vpop.xlane.xlu0 %957  ;;  %1107 = vmatpush.bf16.msra.mxu1 %v1936_v42 }
 0x491   : > { %v2612_v16 = vpop.eup %2117 }
 0x492   : > { %v1033_v6 = vsel %vm473_vm3, %v2612_v16, 0.0  ;;  %v2120_v23 = vpop.eup %2119 }
 0x493   : > { %1034 = vadd.xlane.f32.xlu0 %v1033_v6  ;;  %v1030_v25 = vsel %vm473_vm3, %v2120_v23, 0.0 }
 0x49b   : > { %v517_v18 = vpop.f32.mrf.mxu0 }
 0x49c   : > { %522 = vst.msk [vmem:[#allocation2] sm:$0xff] %vm452_vm1, %v517_v18 }
 0x4a0   : > { %887 = vrot.lane.b32.xlu1 %v2573_v17, %s2243_s29  ;;  %s2250_s29 = smov 24  }
 0x4a3   : > { %v519_v52 = vpop.f32.mrf.mxu0 }
 0x4a4   : > { %523 = vst.msk [vmem:[#allocation2 + $0x8] sm:$0xff] %vm452_vm1, %v519_v52 }
 0x4a7   : > { %964 = vrot.lane.b32.xlu0 %v2573_v17, %s2246_s22 }
 0x4af   : > { %593 = vrot.lane.b32.xlu0 %v2514_v21, %s2248_s25 }
 0x4c0   : > { %v718_v26 = vpop.xlane.xlu2 %717 }
 0x4c1   : > { %2121 = vrcp.f32 %v718_v26 }
 0x4c7   : > { %v2122_v17 = vpop.eup %2121 }
 0x4c8   : > { %v724_v21 = vmul.f32 %v2122_v17, %v2586_v8  ;;  %v955_v19 = vpop.xlane.xlu2 %954 }
 0x4ca   : > { %1031 = vadd.xlane.f32.xlu1 %v1030_v25 }
 0x4d0   : > { %v1042_v48 = vpop.permute.xlu2 %1041 }
 0x4e3   : > { %595 = vrot.lane.b32.xlu1 %v2518_v22, %s2248_s25 }
 0x4ea   : > { %v721_v27 = vpop.xlane.xlu1 %720 }
 0x4eb   : > { %2123 = vrcp.f32 %v721_v27 }
 0x4f1   : > { %v2124_v28 = vpop.eup %2123 }
 0x4f2   : > { %v725_v34 = vmul.f32 %v2124_v28, %v2108_v62  ;;  %v878_v36 = vpop.xlane.xlu1 %877  ;;  %v314_v28 = vld [vmem:[%s2375_s15] sm:$0xff]  }
 0x4f4   : > { %v726_v35 = vpack.c.bf16 %v725_v34, %v724_v21  ;;  %v1081_v21 = vperm.slane %v2360_v1, 3  ;;  %v318_v34 = vunpack.c.l.bf16 %v314_v28  ;;  %v2251_v1 = vmov 32.0  }
 0x4f6   : > { %1849 = vmatmul.msk.bf16.vlgmr.msra.gmra.mxu0 %vm473_vm3, %v726_v35 }
 0x4f9   : > { %v664_v2 = vpop.f32.mrf.mxu3 }
 0x4fa   : > { %671 = vrot.lane.b32.xlu0 %v664_v2, %s2249_s26  ;;  %v881_v22 = vpop.xlane.xlu1 %880 }
 0x4fb   : > { %2125 = vrcp.f32 %v881_v22  ;;  %v319_v22 = vunpack.c.h.bf16 %v314_v28 }
 0x4fc   : > { %2127 = vrcp.f32 %v878_v36 }
 0x4fd   : > { %2129 = vrcp.f32 %v955_v19 }
 0x4fe   : > { %2131 = vrcp.f32 %v958_v39 }
 0x501   : > { %v666_v38 = vpop.f32.mrf.mxu3  ;;  %v2126_v63 = vpop.eup %2125 }
 0x502   : > { %673 = vrot.lane.b32.xlu2 %v666_v38, %s2249_s26  ;;  %v2128_v44 = vpop.eup %2127  ;;  %v885_v24 = vmul.f32 %v2126_v63, %v2114_v11 }
 0x503   : > { %v884_v46 = vmul.f32 %v2128_v44, %v2603_v37  ;;  %v2130_v49 = vpop.eup %2129  ;;  %v316_v44 = vld [vmem:[%s2375_s15 + $0x8] sm:$0xff]  }
 0x504   : > { %v2132_v51 = vpop.eup %2131  ;;  %v961_v55 = vmul.f32 %v2130_v49, %v2590_v41  ;;  %v321_v49 = vunpack.c.h.bf16 %v316_v44 }
 0x505   : > { %v886_v33 = vpack.c.bf16 %v885_v24, %v884_v46  ;;  %v962_v56 = vmul.f32 %v2132_v51, %v2575_v3  ;;  %v320_v24 = vunpack.c.l.bf16 %v316_v44 }
 0x506   : > { %v1035_v13 = vpop.xlane.xlu0 %1034 }
 0x507   : > { %v963_v59 = vpack.c.bf16 %v962_v56, %v961_v55  ;;  %2133 = vrcp.f32 %v1035_v13 }
 0x50d   : > { %v2134_v43 = vpop.eup %2133 }
 0x50e   : > { %v833_v8 = vpop.f32.mrf.mxu3  ;;  %v1039_v41 = vmul.f32 %v2134_v43, %v2612_v16 }
 0x50f   : > { %838 = vst.msk [vmem:[#allocation2 + $0x10] sm:$0xff] %vm452_vm1, %v833_v8 }
 0x512   : > { %v888_v47 = vpop.permute.xlu1 %887 }
 0x513   : > { %900 = vmatpush.bf16.msrb.mxu0 %v888_v47 }
 0x516   : > { %v835_v53 = vpop.f32.mrf.mxu3  ;;  %1853 = vmatmul.msk.bf16.vlgmr.msrb.gmra.mxu0 %vm473_vm3, %v886_v33 }
 0x517   : > { %1054 = vmatpush.bf16.msra.mxu0 %v1042_v48  ;;  %839 = vst.msk [vmem:[#allocation2 + $0x18] sm:$0xff] %vm452_vm1, %v835_v53 }
 0x519   : > { %v965_v57 = vpop.permute.xlu0 %964 }
 0x51a   : > { %977 = vmatpush.bf16.msrb.mxu3 %v965_v57 }
 0x51d   : > { %1855 = vmatmul.msk.bf16.vlgmr.msrb.gmra.mxu3 %vm473_vm3, %v963_v59  ;;  %v2252_v59 = vmov 0  }
 0x51e   : > { %2013 = vset.pattern.permute.xlu1 %v2252_v59  ;;  %2019 = vset.pattern.permute.xlu0 %v2252_v59 }
 0x51f   : > { %2025 = vset.pattern.permute.xlu2 %v2252_v59 }
 0x521   : > { %v594_v62 = vpop.permute.xlu0 %593 }
 0x522   : > { %600 = vst.msk [vmem:[#allocation2] sm:$0xff] %vm599_vm5, %v594_v62 }
 0x53d   : > { %v1032_v0 = vpop.xlane.xlu1 %1031 }
 0x53e   : > { %2135 = vrcp.f32 %v1032_v0 }
 0x53f   : > { %2137 = vrcp.f32 %v2251_v1  ;;  %v2720_v1 = vld [vmem:[%s2971_s5] sm:$0xff] }
 0x544   : > { %v2136_v4 = vpop.eup %2135 }
 0x545   : > { %v1038_v5 = vmul.f32 %v2136_v4, %v2120_v23  ;;  %v2138_v51 = vpop.eup %2137 }
 0x546   : > { %v1136_v56 = vmul.f32 32.0, %v2138_v51  ;;  %vm1140_vm8 = vweird.f32 %v2138_v51 }
 0x547   : > { %v1040_v7 = vpack.c.bf16 %v1039_v41, %v1038_v5 }
 0x548   : > { %v1137_v62 = vsub.f32 1.0, %v1136_v56 }
 0x549   : > { %1857 = vmatmul.msk.bf16.vlgmr.msra.gmra.mxu0 %vm473_vm3, %v1040_v7 }
 0x54a   : > { %v1138_v0 = vmul.f32 %v2138_v51, %v1137_v62 }
 0x54c   : > { %v1139_v43 = vadd.f32 %v2138_v51, %v1138_v0 }
 0x54e   : > { %v2672_v4 = vsel %vm1140_vm8, %v2138_v51, %v1139_v43 }
 0x555   : > { %v596_v3 = vpop.permute.xlu1 %595 }
 0x556   : > { %601 = vst.msk [vmem:[#allocation2 + $0x8] sm:$0xff] %vm599_vm5, %v596_v3 }
 0x55c   : > { %v674_v37 = vpop.permute.xlu2 %673 }
 0x55d   : > { %679 = vst.msk [vmem:[#allocation2 + $0x8] sm:$0xff] %vm677_vm6, %v674_v37 }
 0x56c   : > { %v672_v45 = vpop.permute.xlu0 %671 }
 0x56d   : > { %678 = vst.msk [vmem:[#allocation2] sm:$0xff] %vm677_vm6, %v672_v45 }
 0x573   : > { %v742_v9 = vpop.f32.mrf.mxu0 }
 0x574   : > { %749 = vrot.lane.b32.xlu0 %v742_v9, %s2250_s29 }
 0x57b   : > { %v744_v50 = vpop.f32.mrf.mxu0 }
 0x57c   : > { %751 = vrot.lane.b32.xlu2 %v744_v50, %s2250_s29 }
 0x593   : > { %v902_v10 = vpop.f32.mrf.mxu0 }
 0x594   : > { %909 = vrot.lane.b32.xlu0 %v902_v10, %s2248_s25 }
 0x59b   : > { %v904_v11 = vpop.f32.mrf.mxu0 }
 0x59c   : > { %911 = vrot.lane.b32.xlu2 %v904_v11, %s2248_s25 }
 0x5a0   : > { %v979_v30 = vpop.f32.mrf.mxu3 }
 0x5a1   : > { %986 = vrot.lane.b32.xlu1 %v979_v30, %s2249_s26  ;;  %v326_v30 = vshrl.u32 %v323_v29, 7 }
 0x5a3   : > { %vm332_vm9 = vcmp.lt.s32.totalorder %v326_v30, %v2408_v31  ;;  %vm343_vm12 = vcmp.lt.s32.totalorder %v326_v30, %v2480_v60  ;;  %vm1252_vm14 = vcmp.gt.s32.totalorder %v326_v30, 0 }
 0x5a8   : > { %v981_v32 = vpop.f32.mrf.mxu3 }
 0x5a9   : > { %988 = vrot.lane.b32.xlu0 %v981_v32, %s2249_s26  ;;  %v327_v32 = vadd.s32 8, %v326_v30 }
 0x5ab   : > { %vm333_vm10 = vcmp.lt.s32.totalorder %v327_v32, %v2408_v31  ;;  %vm344_vm11 = vcmp.lt.s32.totalorder %v327_v32, %v2480_v60  ;;  %vm1259_vm13 = vcmp.lt.s32.totalorder %v327_v32, 15 }
 0x5c6   : > { %v1056_v12 = vpop.f32.mrf.mxu0 }
 0x5c7   : > { %1063 = vrot.lane.b32.xlu2 %v1056_v12, %s2250_s29  ;;  %v2253_v12 = vmov 0.0  }
 0x5c8   : > { %v2689_v58 = vsel %vm332_vm9, 1.0, %v2253_v12  ;;  %v2691_v42 = vsel %vm333_vm10, 1.0, %v2253_v12  ;;  %v1869_v28 = vsel %vm1259_vm13, 1.0, %v2253_v12  ;;  %vm1268_vm13 = vcmask 1040384  }
 0x5ce   : > { %v1058_v54 = vpop.f32.mrf.mxu0 }
 0x5cf   : > { %1065 = vrot.lane.b32.xlu1 %v1058_v54, %s2250_s29  ;;  %v2014_v54 = vpack.i.bf16 %v2691_v42, %v2689_v58  ;;  %s1735_s29 = scalar_lea.hbm %s2974_s8, %s1951_s21 }
 0x5d0   : > { %s1738_s13 = sshll.u32 %s1735_s29, 4  ;;  %s1739_s13 = int_to_ptr.hbm [resolvable:$true] %s1738_s13 }
 0x5d1   : > { %s2182_s16 = sshra.s32 %s1739_s13, 4  ;;  %s2183_s16 = int_to_ptr.hbm [resolvable:$true] %s2182_s16 }
 0x5d2   : > { %p2189_p0 = scmp.lt.s32.totalorder %s2183_s16, %s2974_s8 }
 0x5d6   : > { %v752_v14 = vpop.permute.xlu2 %751 }
 0x5d7   : > { %757 = vst.msk [vmem:[#allocation2 + $0x8] sm:$0xff] %vm755_vm7, %v752_v14  ;;  %v2696_v14 = vsel %vm344_vm11, 1.0, %v2253_v12 }
 0x5de   : > { %v1072_v6 = vld [vmem:[#allocation2 + $0x8] sm:$0xff] }
 0x5e6   : > { %v750_v15 = vpop.permute.xlu0 %749 }
 0x5e7   : > { %756 = vst.msk [vmem:[#allocation2] sm:$0xff] %vm755_vm7, %v750_v15 }
 0x5ee   : > { %v1071_v16 = vld [vmem:[#allocation2] sm:$0xff] }
 0x5ef   : > { %v1075_v18 = vpack.c.bf16 %v1072_v6, %v1071_v16 }
 0x5f1   : > { %1866 = vmatmul.msk.bf16.vlgmr.msra.gmra.mxu1 %vm375_vm0, %v1075_v18 }
 0x5f6   : > { %v912_v52 = vpop.permute.xlu2 %911 }
 0x5f7   : > { %916 = vst.msk [vmem:[#allocation2 + $0x18] sm:$0xff] %vm599_vm5, %v912_v52 }
 0x606   : > { %v910_v61 = vpop.permute.xlu0 %909 }
 0x607   : > { %915 = vst.msk [vmem:[#allocation2 + $0x10] sm:$0xff] %vm599_vm5, %v910_v61 }
 0x613   : > { %v987_v40 = vpop.permute.xlu1 %986 }
 0x614   : > { %992 = vst.msk [vmem:[#allocation2 + $0x10] sm:$0xff] %vm677_vm6, %v987_v40 }
 0x61b   : > { %v989_v20 = vpop.permute.xlu0 %988 }
 0x61c   : > { %993 = vst.msk [vmem:[#allocation2 + $0x18] sm:$0xff] %vm677_vm6, %v989_v20 }
 0x621   : > { %v1064_v23 = vpop.permute.xlu2 %1063 }
 0x622   : > { %1069 = vst.msk [vmem:[#allocation2 + $0x10] sm:$0xff] %vm755_vm7, %v1064_v23  ;;  %v2712_v23 = vsel %vm343_vm12, 1.0, %v2253_v12  ;;  %vm1295_vm12 = vcmask 1046528  }
 0x629   : > { %v1073_v26 = vld [vmem:[#allocation2 + $0x10] sm:$0xff] }
 0x641   : > { %v1066_v25 = vpop.permute.xlu1 %1065 }
 0x642   : > { %1070 = vst.msk [vmem:[#allocation2 + $0x18] sm:$0xff] %vm755_vm7, %v1066_v25  ;;  %v2020_v25 = vpack.i.bf16 1.0, %v2712_v23 }
 0x649   : > { %v1074_v27 = vld [vmem:[#allocation2 + $0x18] sm:$0xff] }
 0x64a   : > { %v1076_v17 = vpack.c.bf16 %v1074_v27, %v1073_v26 }
 0x64c   : > { %1867 = vmatmul.msk.bf16.gmra.mxu1 %vm375_vm0, %v1076_v17 }
 0x66e   : > { %v1109_v35 = vpop.f32.mrf.mxu1 }
 0x66f   : > { %v1110_v2 = vadd.f32 %v1109_v35, %v1081_v21  ;;  %v1868_v35 = vsel %vm1252_vm14, 1.0, %v2253_v12  ;;  %vm1354_vm14 = vcmask 523264  }
 0x671   : > { %v1119_v36 = vadd.f32 %v1110_v2, %v318_v34 }
 0x673   : > { %v1123_v38 = vsel %vm375_vm0, %v1119_v36, 0.0 }
 0x674   : > { %1124 = vadd.xlane.f32.xlu0 %v1123_v38  ;;  %v2026_v38 = vpack.i.bf16 1.0, %v1868_v35 }
 0x676   : > { %v1111_v39 = vpop.f32.mrf.mxu1 }
 0x677   : > { %v1112_v19 = vadd.f32 %v1111_v39, %v1081_v21 }
 0x679   : > { %v1120_v63 = vadd.f32 %v1112_v19, %v319_v22 }
 0x67b   : > { %v1126_v8 = vsel %vm375_vm0, %v1120_v63, 0.0 }
 0x67c   : > { %1127 = vadd.xlane.f32.xlu2 %v1126_v8 }
 0x6c9   : > { %v1114_v13 = vpop.f32.mrf.mxu1 }
 0x6ca   : > { %v1115_v46 = vadd.f32 %v1114_v13, %v1081_v21 }
 0x6cc   : > { %v1121_v47 = vadd.f32 %v1115_v46, %v320_v24 }
 0x6ce   : > { %v1129_v48 = vsel %vm375_vm0, %v1121_v47, 0.0 }
 0x6cf   : > { %1130 = vadd.xlane.f32.xlu1 %v1129_v48  ;;  %v1218_v48 = vperm.slane %v2720_v1, 4 }
 0x6d1   : > { %v1116_v33 = vpop.f32.mrf.mxu1 }
 0x6d2   : > { %v1117_v53 = vadd.f32 %v1116_v33, %v1081_v21 }
 0x6d4   : > { %v1122_v55 = vadd.f32 %v1117_v53, %v321_v49 }
 0x6d6   : > { %v1132_v57 = vsel %vm375_vm0, %v1122_v55, 0.0 }
 0x6d7   : > { %1133 = vadd.xlane.f32.xlu0 %v1132_v57 }
 0x6e7   : > { %v1125_v41 = vpop.xlane.xlu0 %1124 }
 0x6e8   : > { %v1142_v5 = vmul.f32 %v2672_v4, %v1125_v41 }
 0x6ea   : > { %v2675_v7 = vsub.f32 %v1119_v36, %v1142_v5 }
 0x6ec   : > { %v1150_v3 = vmul.f32 %v2675_v7, %v2675_v7 }
 0x6ee   : > { %v1154_v37 = vsel %vm375_vm0, %v1150_v3, 0.0 }
 0x6ef   : > { %v1128_v45 = vpop.xlane.xlu2 %1127  ;;  %1155 = vadd.xlane.f32.xlu2 %v1154_v37 }
 0x6f0   : > { %v1143_v9 = vmul.f32 %v2672_v4, %v1128_v45 }
 0x6f2   : > { %v2681_v50 = vsub.f32 %v1120_v63, %v1143_v9 }
 0x6f4   : > { %v1151_v10 = vmul.f32 %v2681_v50, %v2681_v50 }
 0x6f6   : > { %v1157_v11 = vsel %vm375_vm0, %v1151_v10, 0.0 }
 0x6f7   : > { %1158 = vadd.xlane.f32.xlu1 %v1157_v11 }
 0x710   : > { %2015 = vperm.xlu1 %2013, %v2014_v54  }
 0x718   : > { %1245 = vperm.xlu1 %2013, %v2696_v14  }
 0x742   : > { %v1131_v15 = vpop.xlane.xlu1 %1130 }
 0x743   : > { %v1144_v29 = vmul.f32 %v2672_v4, %v1131_v15 }
 0x745   : > { %v2700_v16 = vsub.f32 %v1121_v47, %v1144_v29 }
 0x747   : > { %v1152_v31 = vmul.f32 %v2700_v16, %v2700_v16 }
 0x749   : > { %v1160_v6 = vsel %vm375_vm0, %v1152_v31, 0.0 }
 0x74a   : > { %1161 = vadd.xlane.f32.xlu0 %v1160_v6  ;;  %v1134_v18 = vpop.xlane.xlu0 %1133 }
 0x74b   : > { %v1145_v52 = vmul.f32 %v2672_v4, %v1134_v18 }
 0x74d   : > { %v2706_v61 = vsub.f32 %v1122_v55, %v1145_v52  ;;  %v1223_v55 = vperm.slane %v2720_v1, 5 }
 0x74f   : > { %v1153_v40 = vmul.f32 %v2706_v61, %v2706_v61 }
 0x751   : > { %v1163_v20 = vsel %vm375_vm0, %v1153_v40, 0.0 }
 0x752   : > { %1164 = vadd.xlane.f32.xlu2 %v1163_v20 }
 0x75e   : > { %2021 = vperm.xlu0 %2019, %v2020_v25  }
 0x762   : > { %v1156_v26 = vpop.xlane.xlu2 %1155 }
 0x763   : > { %v1166_v27 = vmul.f32 %v1156_v26, %v2672_v4 }
 0x765   : > { %v1170_v17 = vadd.f32 1e-05, %v1166_v27 }
 0x767   : > { %2139 = vrsqrt.f32 %v1170_v17  ;;  %vm1180_vm1 = vweird.f32 %v1170_v17 }
 0x76a   : > { %v1159_v21 = vpop.xlane.xlu1 %1158  ;;  %1315 = vperm.xlu2 %2025, %v1869_v28  }
 0x76b   : > { %v1167_v34 = vmul.f32 %v1159_v21, %v2672_v4 }
 0x76d   : > { %v2140_v2 = vpop.eup %2139  ;;  %v1171_v60 = vadd.f32 1e-05, %v1167_v34 }
 0x76e   : > { %v1175_v36 = vmul.f32 %v2140_v2, %v1170_v17  ;;  %vm1181_vm15 = vweird.f32 %v2140_v2 }
 0x76f   : > { %2141 = vrsqrt.f32 %v1171_v60  ;;  %vm1182_vm2 = vmor %vm1180_vm1, %vm1181_vm15  ;;  %vm1190_vm4 = vweird.f32 %v1171_v60  ;;  %vm1410_vm15 = vcmask 785408  }
 0x770   : > { %v1176_v22 = vmul.f32 %v2140_v2, %v1175_v36 }
 0x772   : > { %v1177_v39 = vmul.f32 0.5, %v1176_v22  ;;  %2027 = vperm.xlu2 %2025, %v2026_v38  }
 0x774   : > { %v1178_v19 = vsub.f32 1.5, %v1177_v39 }
 0x775   : > { %v2142_v63 = vpop.eup %2141 }
 0x776   : > { %v1179_v8 = vmul.f32 %v2140_v2, %v1178_v19  ;;  %v1185_v44 = vmul.f32 %v2142_v63, %v1171_v60  ;;  %vm1191_vm3 = vweird.f32 %v2142_v63 }
 0x777   : > { %vm1192_vm5 = vmor %vm1190_vm4, %vm1191_vm3 }
 0x778   : > { %v1186_v24 = vmul.f32 %v2142_v63, %v1185_v44  ;;  %v1183_v13 = vsel %vm1182_vm2, %v2140_v2, %v1179_v8 }
 0x779   : > { %v1214_v49 = vmul.f32 %v1183_v13, %v2675_v7 }
 0x77a   : > { %v1187_v46 = vmul.f32 0.5, %v1186_v24 }
 0x77b   : > { %v1219_v56 = vmul.f32 %v1218_v48, %v1214_v49 }
 0x77c   : > { %v1188_v47 = vsub.f32 1.5, %v1187_v46 }
 0x77d   : > { %v1224_v41 = vadd.f32 %v1223_v55, %v1219_v56 }
 0x77e   : > { %v1189_v33 = vmul.f32 %v2142_v63, %v1188_v47 }
 0x780   : > { %v1193_v51 = vsel %vm1192_vm5, %v2142_v63, %v1189_v33 }
 0x781   : > { %v1215_v53 = vmul.f32 %v1193_v51, %v2681_v50 }
 0x782   : > { %v2016_v57 = vpop.permute.xlu1 %2015 }
 0x783   : > { %v1220_v59 = vmul.f32 %v1218_v48, %v1215_v53  ;;  %v2018_v62 = vunpack.i.h.bf16 %v2016_v57  ;;  %v2017_v0 = vunpack.i.l.bf16 %v2016_v57 }
 0x785   : > { %v1225_v43 = vadd.f32 %v1223_v55, %v1220_v59  ;;  %v2728_v3 = vmul.f32 %v2017_v0, %v1224_v41  ;;  %v1939_v0 = vld [vmem:[%s2972_s6 + $0x8] sm:$0xff] }
 0x787   : > { %v2726_v5 = vmul.f32 %v2018_v62, %v1225_v43  ;;  %v1296_v36 = vrot.slane %v2728_v3, 1  ;;  %v1940_v62 = vld [vmem:[%s2972_s6 + $0x10] sm:$0xff]  ;;  %v1938_v43 = vld [vmem:[%s2972_s6] sm:$0xff] }
 0x789   : > { %v2031_v7 = vpack.i.bf16 %v2726_v5, %v2728_v3  ;;  %v1297_v35 = vrot.slane %v2726_v5, 1 }
 0x78a   : > { %v1246_v13 = vpop.permute.xlu1 %1245 }
 0x78b   : > { %2032 = vrot.lane.b32.xlu1 %v2031_v7, %s2235_s28  ;;  %v1298_v19 = vsel %vm1295_vm12, %v1296_v36, %v1297_v35  ;;  %v1270_v7 = vrot.slane %v2726_v5, 7 }
 0x7bd   : > { %v1162_v37 = vpop.xlane.xlu0 %1161 }
 0x7be   : > { %v1168_v45 = vmul.f32 %v1162_v37, %v2672_v4  ;;  %v1269_v37 = vrot.slane %v2728_v3, 7 }
 0x7c0   : > { %v1172_v9 = vadd.f32 1e-05, %v1168_v45 }
 0x7c2   : > { %2143 = vrsqrt.f32 %v1172_v9  ;;  %vm1200_vm7 = vweird.f32 %v1172_v9 }
 0x7c5   : > { %v1165_v50 = vpop.xlane.xlu2 %1164 }
 0x7c6   : > { %v1169_v10 = vmul.f32 %v1165_v50, %v2672_v4 }
 0x7c8   : > { %v2144_v11 = vpop.eup %2143  ;;  %v1173_v30 = vadd.f32 1e-05, %v1169_v10 }
 0x7c9   : > { %v1195_v32 = vmul.f32 %v2144_v11, %v1172_v9  ;;  %vm1201_vm6 = vweird.f32 %v2144_v11 }
 0x7ca   : > { %2145 = vrsqrt.f32 %v1173_v30  ;;  %vm1202_vm8 = vmor %vm1200_vm7, %vm1201_vm6  ;;  %vm1210_vm10 = vweird.f32 %v1173_v30 }
 0x7cb   : > { %v1196_v12 = vmul.f32 %v2144_v11, %v1195_v32  ;;  %v1280_v32 = vsel %vm1268_vm13, 0.0, %v1269_v37 }
 0x7cd   : > { %v1197_v54 = vmul.f32 0.5, %v1196_v12  ;;  %v2744_v22 = vpop.permute.xlu2 %1315 }
 0x7cf   : > { %v1198_v15 = vsub.f32 1.5, %v1197_v54 }
 0x7d0   : > { %v2146_v29 = vpop.eup %2145  ;;  %v2022_v25 = vpop.permute.xlu0 %2021 }
 0x7d1   : > { %v1199_v31 = vmul.f32 %v2144_v11, %v1198_v15  ;;  %v1205_v6 = vmul.f32 %v2146_v29, %v1173_v30  ;;  %v2023_v27 = vunpack.i.l.bf16 %v2022_v25  ;;  %vm1211_vm9 = vweird.f32 %v2146_v29 }
 0x7d2   : > { %vm1212_vm11 = vmor %vm1210_vm10, %vm1211_vm9  ;;  %v2739_v2 = vunpack.i.h.bf16 %v2022_v25  ;;  %v1271_v30 = vsel %vm1268_vm13, %v1269_v37, %v1270_v7 }
 0x7d3   : > { %v1203_v18 = vsel %vm1202_vm8, %v2144_v11, %v1199_v31  ;;  %v1206_v52 = vmul.f32 %v2146_v29, %v1205_v6 }
 0x7d4   : > { %v1216_v40 = vmul.f32 %v1203_v18, %v2700_v16  ;;  %v1318_v8 = vmul.f32 %v2739_v2, %v1298_v19 }
 0x7d5   : > { %v1207_v20 = vmul.f32 0.5, %v1206_v52  ;;  %v2028_v41 = vpop.permute.xlu2 %2027 }
 0x7d6   : > { %v1221_v26 = vmul.f32 %v1218_v48, %v1216_v40  ;;  %v2782_v9 = vunpack.i.h.bf16 %v2028_v41  ;;  %v2784_v50 = vunpack.i.l.bf16 %v2028_v41 }
 0x7d7   : > { %v1208_v17 = vsub.f32 1.5, %v1207_v20 }
 0x7d8   : > { %v1226_v28 = vadd.f32 %v1223_v55, %v1221_v26  ;;  %v1292_v12 = vmul.f32 %v2782_v9, %v1271_v30  ;;  %v1291_v54 = vmul.f32 %v2784_v50, %v1280_v32 }
 0x7d9   : > { %v1209_v21 = vmul.f32 %v2146_v29, %v1208_v17 }
 0x7da   : > { %v2736_v34 = vmul.f32 %v2023_v27, %v1226_v28 }
 0x7db   : > { %v1213_v60 = vsel %vm1212_vm11, %v2146_v29, %v1209_v21 }
 0x7dc   : > { %v1217_v16 = vmul.f32 %v1213_v60, %v2706_v61  ;;  %v1299_v38 = vrot.slane %v2736_v34, 1  ;;  %v1943_v61 = vld [vmem:[%s2972_s6 + $0x28] sm:$0xff]  ;;  %v1272_v25 = vrot.slane %v2736_v34, 7 }
 0x7dd   : > { %1419 = vmatpush.bf16.msra.mxu3 %v1943_v61 }
 0x7de   : > { %v1222_v39 = vmul.f32 %v1218_v48, %v1217_v16  ;;  %v1300_v63 = vsel %vm1295_vm12, %v1297_v35, %v1299_v38  ;;  %v1942_v48 = vld [vmem:[%s2972_s6 + $0x20] sm:$0xff]  ;;  %v1273_v17 = vsel %vm1268_vm13, %v1270_v7, %v1272_v25 }
 0x7df   : > { %v1319_v44 = vmul.f32 %v2744_v22, %v1300_v63  ;;  %v1293_v60 = vmul.f32 %v2784_v50, %v1273_v17  ;;  %v1949_v17 = vld [vmem:[%s2973_s7 + $0x28] sm:$0xff] }
 0x7e0   : > { %v1227_v24 = vadd.f32 %v1223_v55, %v1222_v39  ;;  %v1941_v55 = vld [vmem:[%s2972_s6 + $0x18] sm:$0xff]  ;;  %1571 = vmatpush.bf16.msra.mxu2 %v1949_v17 }
 0x7e1   : > { %v2036_v46 = vpack.i.bf16 %v1319_v44, %v1318_v8  ;;  %1420 = vmatpush.bf16.msra.mxu3 %v1942_v48 }
 0x7e2   : > { %v2753_v47 = vmul.f32 %v1246_v13, %v1227_v24  ;;  %v1373_v13 = vperm.slane %v2720_v1, 6 }
 0x7e3   : > { %2037 = vrot.lane.b32.xlu2 %v2036_v46, %s2240_s24 }
 0x7e4   : > { %v1301_v49 = vrot.slane %v2753_v47, 1  ;;  %v2041_v33 = vpack.i.bf16 %v2753_v47, %v2736_v34  ;;  %v1274_v26 = vrot.slane %v2753_v47, 7 }
 0x7e5   : > { %1421 = vmatpush.bf16.msra.mxu3 %v1941_v55 }
 0x7e6   : > { %2042 = vrot.lane.b32.xlu0 %v2041_v33, %s2235_s28  ;;  %v1302_v51 = vsel %vm1295_vm12, %v1299_v38, %v1301_v49  ;;  %v1307_v53 = vsel %vm1295_vm12, %v1301_v49, 0.0  ;;  %v1275_v28 = vsel %vm1268_vm13, %v1272_v25, %v1274_v26 }
 0x7e7   : > { %v1320_v56 = vmul.f32 %v2739_v2, %v1302_v51  ;;  %v1321_v57 = vmul.f32 %v2744_v22, %v1307_v53  ;;  %v1294_v16 = vmul.f32 %v2782_v9, %v1275_v28  ;;  %v1948_v28 = vld [vmem:[%s2973_s7 + $0x20] sm:$0xff] }
 0x7e8   : > { %1572 = vmatpush.bf16.msra.mxu2 %v1948_v28 }
 0x7e9   : > { %v2046_v59 = vpack.i.bf16 %v1321_v57, %v1320_v56  ;;  %1422 = vmatpush.bf16.msra.mxu3 %v1940_v62 }
 0x7eb   : > { %2047 = vrot.lane.b32.xlu1 %v2046_v59, %s2240_s24 }
 0x7ed   : > { %1423 = vmatpush.bf16.msra.mxu3 %v1939_v0 }
 0x7f1   : > { %1424 = vmatpush.bf16.msra.mxu3 %v1938_v43 }
 0x7fd   : > { %v2033_v45 = vpop.permute.xlu1 %2032 }
 0x7fe   : > { %v2035_v10 = vunpack.i.h.bf16 %v2033_v45  ;;  %v2034_v11 = vunpack.i.l.bf16 %v2033_v45 }
 0x800   : > { %v1350_v6 = vsel %vm375_vm0, %v1291_v54, %v2034_v11  ;;  %v1351_v18 = vsel %vm375_vm0, %v1292_v12, %v2035_v10 }
 0x83d   : > { %v2038_v15 = vpop.permute.xlu2 %2037 }
 0x83e   : > { %v2040_v29 = vunpack.i.h.bf16 %v2038_v15  ;;  %v2039_v31 = vunpack.i.l.bf16 %v2038_v15 }
 0x840   : > { %v1356_v52 = vsel %vm1354_vm14, %v1351_v18, %v2040_v29  ;;  %v1355_v40 = vsel %vm1354_vm14, %v1350_v6, %v2039_v31 }
 0x841   : > { %v1359_v20 = vpack.c.bf16 %v1356_v52, %v1355_v40 }
 0x843   : > { %1894 = vmatmul.msk.bf16.vlgmr.msra.gmra.mxu3 %vm1410_vm15, %v1359_v20 }
 0x858   : > { %v2043_v27 = vpop.permute.xlu0 %2042 }
 0x859   : > { %v2045_v21 = vunpack.i.h.bf16 %v2043_v27  ;;  %v2044_v35 = vunpack.i.l.bf16 %v2043_v27 }
 0x85b   : > { %v1352_v19 = vsel %vm375_vm0, %v1293_v60, %v2044_v35  ;;  %v1353_v63 = vsel %vm375_vm0, %v1294_v16, %v2045_v21  ;;  %v1947_v21 = vld [vmem:[%s2973_s7 + $0x18] sm:$0xff]  ;;  %v1944_v35 = vld [vmem:[%s2973_s7] sm:$0xff] }
 0x85c   : > { %1573 = vmatpush.bf16.msra.mxu2 %v1947_v21 }
 0x85d   : > { %v2048_v36 = vpop.permute.xlu1 %2047 }
 0x85e   : > { %v2050_v38 = vunpack.i.h.bf16 %v2048_v36  ;;  %v2049_v39 = vunpack.i.l.bf16 %v2048_v36 }
 0x860   : > { %v1357_v8 = vsel %vm1354_vm14, %v1352_v19, %v2049_v39  ;;  %v1358_v44 = vsel %vm1354_vm14, %v1353_v63, %v2050_v38 }
 0x861   : > { %v1360_v24 = vpack.c.bf16 %v1358_v44, %v1357_v8 }
 0x863   : > { %1895 = vmatmul.msk.bf16.gmra.mxu3 %vm1410_vm15, %v1360_v24 }
 0x8c6   : > { %v1426_v61 = vpop.f32.mrf.mxu3 }
 0x8c7   : > { %v1427_v46 = vadd.f32 %v1426_v61, %v1373_v13 }
 0x8c9   : > { %v1436_v49 = vmax.f32 %v1427_v46, 0.0 }
 0x8cb   : > { %v1444_v53 = vrot.slane %v1436_v49, 7  ;;  %v1460_v43 = vrot.slane %v1436_v49, 1 }
 0x8cd   : > { %v1455_v16 = vsel %vm1268_vm13, 0.0, %v1444_v53 }
 0x8ce   : > { %v1428_v48 = vpop.f32.mrf.mxu3  ;;  %v1456_v39 = vmul.f32 %v2784_v50, %v1455_v16 }
 0x8cf   : > { %v1429_v33 = vadd.f32 %v1428_v48, %v1373_v13 }
 0x8d1   : > { %v1437_v51 = vmax.f32 %v1429_v33, 0.0 }
 0x8d3   : > { %v1445_v55 = vrot.slane %v1437_v51, 7  ;;  %v2051_v56 = vpack.i.bf16 %v1437_v51, %v1436_v49  ;;  %v1461_v62 = vrot.slane %v1437_v51, 1 }
 0x8d5   : > { %v1446_v57 = vsel %vm1268_vm13, %v1444_v53, %v1445_v55  ;;  %2052 = vrot.lane.b32.xlu2 %v2051_v56, %s2235_s28  ;;  %v1462_v45 = vsel %vm1295_vm12, %v1460_v43, %v1461_v62 }
 0x8d6   : > { %v1472_v32 = vmul.f32 %v2739_v2, %v1462_v45  ;;  %v1457_v19 = vmul.f32 %v2782_v9, %v1446_v57 }
 0x8e6   : > { %v1431_v59 = vpop.f32.mrf.mxu3 }
 0x8e7   : > { %v1432_v0 = vadd.f32 %v1431_v59, %v1373_v13 }
 0x8e9   : > { %v1438_v41 = vmax.f32 %v1432_v0, 0.0 }
 0x8eb   : > { %v1447_v7 = vrot.slane %v1438_v41, 7  ;;  %v1463_v37 = vrot.slane %v1438_v41, 1 }
 0x8ed   : > { %v1448_v10 = vsel %vm1268_vm13, %v1445_v55, %v1447_v7  ;;  %v1464_v11 = vsel %vm1295_vm12, %v1461_v62, %v1463_v37 }
 0x8ee   : > { %v1433_v30 = vpop.f32.mrf.mxu3  ;;  %v1473_v12 = vmul.f32 %v1464_v11, %v2744_v22  ;;  %v1458_v33 = vmul.f32 %v2784_v50, %v1448_v10  ;;  %v1526_v50 = vperm.slane %v2720_v1, 7 }
 0x8ef   : > { %v1434_v54 = vadd.f32 %v1433_v30, %v1373_v13 }
 0x8f0   : > { %v2056_v15 = vpack.i.bf16 %v1473_v12, %v1472_v32 }
 0x8f1   : > { %v1439_v29 = vmax.f32 %v1434_v54, 0.0 }
 0x8f2   : > { %2057 = vrot.lane.b32.xlu0 %v2056_v15, %s2240_s24 }
 0x8f3   : > { %v1449_v31 = vrot.slane %v1439_v29, 7  ;;  %v1465_v6 = vrot.slane %v1439_v29, 1  ;;  %v2061_v18 = vpack.i.bf16 %v1439_v29, %v1438_v41 }
 0x8f5   : > { %v1450_v52 = vsel %vm1268_vm13, %v1447_v7, %v1449_v31  ;;  %2062 = vrot.lane.b32.xlu1 %v2061_v18, %s2235_s28  ;;  %v1466_v40 = vsel %vm1295_vm12, %v1463_v37, %v1465_v6  ;;  %v1471_v20 = vsel %vm1295_vm12, %v1465_v6, 0.0  ;;  %s295_s28 = sand.u32 1, %s2224_s10  }
 0x8f6   : > { %v1474_v25 = vmul.f32 %v2739_v2, %v1466_v40  ;;  %v1475_v26 = vmul.f32 %v1471_v20, %v2744_v22  ;;  %v1946_v2 = vld [vmem:[%s2973_s7 + $0x10] sm:$0xff]  ;;  %v1945_v22 = vld [vmem:[%s2973_s7 + $0x8] sm:$0xff]  ;;  %v1459_v56 = vmul.f32 %v2782_v9, %v1450_v52  ;;  %s1814_s15 = sshll.u32 %s295_s28, 5  ;;  %s1723_s0 = scalar_lea.sflag [#allocation6], %s295_s28 }
 0x8f7   : > { %1574 = vmatpush.bf16.msra.mxu2 %v1946_v2  ;;  %s2914_s22 = scalar_lea.vmem [#allocation5], %s1814_s15  ;;  %s2188_s15 = scalar_lea.hbm %s2974_s8, 64 }
 0x8f8   : > { %v2066_v27 = vpack.i.bf16 %v1475_v26, %v1474_v25  ;;  %s1736_s30 = sshll.u32 %s2914_s22, 4  ;;  %s1737_s30 = int_to_ptr.vmem [resolvable:$true] %s1736_s30 }
 0x8fa   : > { %2067 = vrot.lane.b32.xlu2 %v2066_v27, %s2240_s24 }
 0x8fb   : > { %1575 = vmatpush.bf16.msra.mxu2 %v1945_v22 }
 0x8ff   : > { %1576 = vmatpush.bf16.msra.mxu2 %v1944_v35 }
 0x92f   : > { %v2053_v60 = vpop.permute.xlu2 %2052 }
 0x930   : > { %v2055_v36 = vunpack.i.h.bf16 %v2053_v60  ;;  %v2054_v38 = vunpack.i.l.bf16 %v2053_v60 }
 0x932   : > { %v1504_v24 = vsel %vm375_vm0, %v1456_v39, %v2054_v38  ;;  %v1505_v61 = vsel %vm375_vm0, %v1457_v19, %v2055_v36  ;;  %v2891_v19 = vld [vmem:[%s2866_s20] ss:$0 sm:$0xff] }
 0x954   : > { %v2068_v13 = vpop.permute.xlu2 %2067 }
 0x955   : > { %v2070_v57 = vunpack.i.h.bf16 %v2068_v13  ;;  %v2069_v59 = vunpack.i.l.bf16 %v2068_v13 }
 0x964   : > { %v2058_v63 = vpop.permute.xlu0 %2057 }
 0x965   : > { %v2060_v8 = vunpack.i.h.bf16 %v2058_v63  ;;  %v2059_v44 = vunpack.i.l.bf16 %v2058_v63  ;;  %v2896_v63 = vld [vmem:[%s2866_s20 + $0x1] ss:$0 sm:$0xff]  ;;  %s2184_s20 = scalar_lea.hbm %s2183_s16, 32 }
 0x966   : > { %p2185_p11 = scmp.ne.s32.totalorder %s2183_s16, %s2184_s20  ;;  %p2190_p1 = scmp.lt.s32.totalorder %s2188_s15, %s2184_s20 }
 0x967   : > { %v1509_v46 = vsel %vm1354_vm14, %v1505_v61, %v2060_v8  ;;  %v1508_v48 = vsel %vm1354_vm14, %v1504_v24, %v2059_v44  ;;  %v2063_v49 = vpop.permute.xlu1 %2062 }
 0x968   : > { %v1512_v51 = vpack.c.bf16 %v1509_v46, %v1508_v48  ;;  %v2065_v53 = vunpack.i.h.bf16 %v2063_v49  ;;  %v2064_v55 = vunpack.i.l.bf16 %v2063_v49  ;;  %p2186_p12 = pnand %p2185_p11, %p2341_p5  ;;  %p2191_p2 = por %p2190_p1, %p2189_p0 }
 0x96a   : > { %v1506_v62 = vsel %vm375_vm0, %v1458_v33, %v2064_v55  ;;  %v1507_v0 = vsel %vm375_vm0, %v1459_v56, %v2065_v53  ;;  %1920 = vmatmul.msk.bf16.vlgmr.msra.gmra.mxu2 %vm1410_vm15, %v1512_v51  ;;  %p2187_p13 = pneg %p2186_p12 }
 0x96b   : > { %v1510_v43 = vsel %vm1354_vm14, %v1506_v62, %v2069_v59  ;;  %v1511_v41 = vsel %vm1354_vm14, %v1507_v0, %v2070_v57  ;;  %v313_v57 = vld [vmem:[%s2971_s5 + $0x8] sm:$0xff] }
 0x96c   : > { %v1513_v7 = vpack.c.bf16 %v1511_v41, %v1510_v43  ;;  %v1680_v41 = vperm.slane %v313_v57, 0  ;;  %p2192_p3 = pnand %p2191_p2, %p2187_p13 }
 0x97a   : > { %1921 = vmatmul.msk.bf16.gmra.mxu2 %vm1410_vm15, %v1513_v7 }
 0x9ed   : > { %v1578_v37 = vpop.f32.mrf.mxu2 }
 0x9ee   : > { %v1579_v45 = vadd.f32 %v1578_v37, %v1526_v50  ;;  %v1685_v37 = vperm.slane %v313_v57, 1 }
 0x9f0   : > { %v1588_v9 = vadd.f32 %v1579_v45, %v2728_v3 }
 0x9f2   : > { %v1592_v10 = vsel %vm375_vm0, %v1588_v9, 0.0 }
 0x9f3   : > { %1593 = vadd.xlane.f32.xlu0 %v1592_v10 }
 0x9f5   : > { %v1580_v11 = vpop.f32.mrf.mxu2 }
 0x9f6   : > { %v1581_v30 = vadd.f32 %v1580_v11, %v1526_v50 }
 0x9f8   : > { %v1589_v32 = vadd.f32 %v1581_v30, %v2726_v5 }
 0x9fa   : > { %v1595_v12 = vsel %vm375_vm0, %v1589_v32, 0.0 }
 0x9fb   : > { %1596 = vadd.xlane.f32.xlu1 %v1595_v12 }
 0x9fd   : > { %v1583_v54 = vpop.f32.mrf.mxu2 }
 0x9fe   : > { %v1584_v15 = vadd.f32 %v1583_v54, %v1526_v50 }
 0xa00   : > { %v1590_v29 = vadd.f32 %v1584_v15, %v2736_v34 }
 0xa02   : > { %v1598_v1 = vsel %vm375_vm0, %v1590_v29, 0.0 }
 0xa03   : > { %1599 = vadd.xlane.f32.xlu2 %v1598_v1 }
 0xa05   : > { %v1585_v31 = vpop.f32.mrf.mxu2 }
 0xa06   : > { %v1586_v6 = vadd.f32 %v1585_v31, %v1526_v50 }
 0xa08   : > { %v1591_v3 = vadd.f32 %v1586_v6, %v2753_v47 }
 0xa0a   : > { %v1601_v5 = vsel %vm375_vm0, %v1591_v3, 0.0 }
 0xa0b   : > { %1602 = vadd.xlane.f32.xlu2 %v1601_v5 }
 0xa66   : > { %v1594_v18 = vpop.xlane.xlu0 %1593 }
 0xa67   : > { %v1604_v52 = vmul.f32 %v1594_v18, %v2672_v4 }
 0xa69   : > { %v1608_v40 = vsub.f32 %v1588_v9, %v1604_v52 }
 0xa6b   : > { %v1612_v34 = vmul.f32 %v1608_v40, %v1608_v40 }
 0xa6d   : > { %v1616_v20 = vsel %vm375_vm0, %v1612_v34, 0.0 }
 0xa6e   : > { %v1597_v25 = vpop.xlane.xlu1 %1596  ;;  %1617 = vadd.xlane.f32.xlu0 %v1616_v20 }
 0xa6f   : > { %v1605_v26 = vmul.f32 %v1597_v25, %v2672_v4 }
 0xa71   : > { %v2873_v27 = vsub.f32 %v1589_v32, %v1605_v26 }
 0xa73   : > { %v1613_v47 = vmul.f32 %v2873_v27, %v2873_v27 }
 0xa75   : > { %v1619_v17 = vsel %vm375_vm0, %v1613_v47, 0.0 }
 0xa76   : > { %1620 = vadd.xlane.f32.xlu1 %v1619_v17  ;;  %v1600_v28 = vpop.xlane.xlu2 %1599 }
 0xa77   : > { %v1606_v21 = vmul.f32 %v1600_v28, %v2672_v4 }
 0xa79   : > { %v2879_v2 = vsub.f32 %v1590_v29, %v1606_v21 }
 0xa7b   : > { %v1614_v22 = vmul.f32 %v2879_v2, %v2879_v2 }
 0xa7d   : > { %v1622_v35 = vsel %vm375_vm0, %v1614_v22, 0.0 }
 0xa7e   : > { %1623 = vadd.xlane.f32.xlu2 %v1622_v35  ;;  %v1603_v60 = vpop.xlane.xlu2 %1602 }
 0xa7f   : > { %v1607_v16 = vmul.f32 %v1603_v60, %v2672_v4 }
 0xa81   : > { %v2885_v36 = vsub.f32 %v1591_v3, %v1607_v16 }
 0xa83   : > { %v1615_v38 = vmul.f32 %v2885_v36, %v2885_v36 }
 0xa85   : > { %v1625_v39 = vsel %vm375_vm0, %v1615_v38, 0.0 }
 0xa86   : > { %1626 = vadd.xlane.f32.xlu0 %v1625_v39 }
 0xa8f   : > { %1696 = vrot.lane.b32.xlu1 %v2891_v19, %s2239_s23 }
 0xa96   : > { %1712 = vrot.lane.b32.xlu2 %v2896_v63, %s2239_s23 }
 0xae1   : > { %v1618_v8 = vpop.xlane.xlu0 %1617 }
 0xae2   : > { %v1628_v44 = vmul.f32 %v1618_v8, %v2672_v4 }
 0xae4   : > { %v1632_v24 = vadd.f32 1e-05, %v1628_v44 }
 0xae6   : > { %2147 = vrsqrt.f32 %v1632_v24  ;;  %vm1642_vm2 = vweird.f32 %v1632_v24 }
 0xae9   : > { %v1621_v61 = vpop.xlane.xlu1 %1620 }
 0xaea   : > { %v1629_v13 = vmul.f32 %v1621_v61, %v2672_v4 }
 0xaec   : > { %v2148_v46 = vpop.eup %2147  ;;  %v1633_v48 = vadd.f32 1e-05, %v1629_v13 }
 0xaed   : > { %v1637_v49 = vmul.f32 %v2148_v46, %v1632_v24  ;;  %vm1643_vm1 = vweird.f32 %v2148_v46 }
 0xaee   : > { %2149 = vrsqrt.f32 %v1633_v48  ;;  %vm1644_vm3 = vmor %vm1642_vm2, %vm1643_vm1  ;;  %vm1652_vm5 = vweird.f32 %v1633_v48 }
 0xaef   : > { %v1638_v33 = vmul.f32 %v2148_v46, %v1637_v49 }
 0xaf1   : > { %v1639_v51 = vmul.f32 0.5, %v1638_v33  ;;  %v1624_v53 = vpop.xlane.xlu2 %1623 }
 0xaf2   : > { %v1630_v55 = vmul.f32 %v1624_v53, %v2672_v4 }
 0xaf3   : > { %v1640_v56 = vsub.f32 1.5, %v1639_v51 }
 0xaf4   : > { %v2150_v59 = vpop.eup %2149  ;;  %v1634_v62 = vadd.f32 1e-05, %v1630_v55 }
 0xaf5   : > { %v1641_v0 = vmul.f32 %v2148_v46, %v1640_v56  ;;  %v1647_v43 = vmul.f32 %v2150_v59, %v1633_v48  ;;  %vm1653_vm4 = vweird.f32 %v2150_v59 }
 0xaf6   : > { %2151 = vrsqrt.f32 %v1634_v62  ;;  %vm1654_vm6 = vmor %vm1652_vm5, %vm1653_vm4  ;;  %vm1662_vm8 = vweird.f32 %v1634_v62 }
 0xaf7   : > { %v1645_v7 = vsel %vm1644_vm3, %v2148_v46, %v1641_v0  ;;  %v1648_v50 = vmul.f32 %v2150_v59, %v1647_v43 }
 0xaf8   : > { %v1676_v45 = vmul.f32 %v1645_v7, %v1608_v40 }
 0xaf9   : > { %v1649_v9 = vmul.f32 0.5, %v1648_v50  ;;  %v1627_v10 = vpop.xlane.xlu0 %1626  ;;  %v1713_v8 = vpop.permute.xlu2 %1712 }
 0xafa   : > { %v1631_v11 = vmul.f32 %v1627_v10, %v2672_v4  ;;  %v1681_v30 = vmul.f32 %v1680_v41, %v1676_v45 }
 0xafb   : > { %v1650_v32 = vsub.f32 1.5, %v1649_v9 }
 0xafc   : > { %v2152_v12 = vpop.eup %2151  ;;  %v1635_v54 = vadd.f32 1e-05, %v1631_v11  ;;  %v1686_v15 = vadd.f32 %v1685_v37, %v1681_v30 }
 0xafd   : > { %v1651_v29 = vmul.f32 %v2150_v59, %v1650_v32  ;;  %v1657_v1 = vmul.f32 %v2152_v12, %v1634_v62  ;;  %vm1663_vm7 = vweird.f32 %v2152_v12 }
 0xafe   : > { %2153 = vrsqrt.f32 %v1635_v54  ;;  %v1694_v4 = vmul.f32 %v2891_v19, %v1686_v15  ;;  %vm1664_vm9 = vmor %vm1662_vm8, %vm1663_vm7  ;;  %vm1672_vm11 = vweird.f32 %v1635_v54 }
 0xaff   : > { %v1655_v31 = vsel %vm1654_vm6, %v2150_v59, %v1651_v29  ;;  %v1658_v6 = vmul.f32 %v2152_v12, %v1657_v1 }
 0xb00   : > { %v1677_v3 = vmul.f32 %v1655_v31, %v2873_v27 }
 0xb01   : > { %v1659_v5 = vmul.f32 0.5, %v1658_v6  ;;  %v1697_v18 = vpop.permute.xlu1 %1696 }
 0xb02   : > { %v1682_v52 = vmul.f32 %v1680_v41, %v1677_v3  ;;  %v1699_v40 = vadd.f32 %v1697_v18, %v1694_v4 }
 0xb03   : > { %v1660_v34 = vsub.f32 1.5, %v1659_v5 }
 0xb04   : > { %v2154_v20 = vpop.eup %2153  ;;  %v1687_v25 = vadd.f32 %v1685_v37, %v1682_v52  ;;  %v1701_v26 = vmul.f32 %v2689_v58, %v1699_v40 }
 0xb05   : > { %v1661_v47 = vmul.f32 %v2152_v12, %v1660_v34  ;;  %v1667_v17 = vmul.f32 %v2154_v20, %v1635_v54  ;;  %vm1673_vm10 = vweird.f32 %v2154_v20 }
 0xb06   : > { %v1695_v27 = vmul.f32 %v2891_v19, %v1687_v25  ;;  %1703 = vst.msk [vmem:[%s2914_s22] sm:$0xff] %vm375_vm0, %v1701_v26  ;;  %vm1674_vm12 = vmor %vm1672_vm11, %vm1673_vm10 }
 0xb07   : > { %v1665_v28 = vsel %vm1664_vm9, %v2152_v12, %v1661_v47  ;;  %v1668_v21 = vmul.f32 %v2154_v20, %v1667_v17 }
 0xb08   : > { %v1700_v22 = vadd.f32 %v1697_v18, %v1695_v27  ;;  %v1678_v35 = vmul.f32 %v1665_v28, %v2879_v2 }
 0xb09   : > { %v1669_v60 = vmul.f32 0.5, %v1668_v21 }
 0xb0a   : > { %v1702_v58 = vmul.f32 %v2691_v42, %v1700_v22  ;;  %v1683_v16 = vmul.f32 %v1680_v41, %v1678_v35 }
 0xb0b   : > { %v1670_v38 = vsub.f32 1.5, %v1669_v60 }
 0xb0c   : > { %1704 = vst.msk [vmem:[%s2914_s22 + $0x8] sm:$0xff] %vm375_vm0, %v1702_v58  ;;  %v1688_v39 = vadd.f32 %v1685_v37, %v1683_v16 }
 0xb0d   : > { %v1671_v19 = vmul.f32 %v2154_v20, %v1670_v38 }
 0xb0e   : > { %v1710_v44 = vmul.f32 %v2896_v63, %v1688_v39 }
 0xb0f   : > { %v1675_v24 = vsel %vm1674_vm12, %v2154_v20, %v1671_v19 }
 0xb10   : > { %v1679_v2 = vmul.f32 %v1675_v24, %v2885_v36  ;;  %v1715_v42 = vadd.f32 %v1713_v8, %v1710_v44 }
 0xb12   : > { %v1684_v61 = vmul.f32 %v1680_v41, %v1679_v2  ;;  %v1717_v13 = vmul.f32 %v2712_v23, %v1715_v42 }
 0xb14   : > { %v1689_v46 = vadd.f32 %v1685_v37, %v1684_v61  ;;  %1923 = vst.msk [vmem:[%s2914_s22 + $0x10] sm:$0xff] %vm375_vm0, %v1717_v13 }
 0xb16   : > { %v1711_v48 = vmul.f32 %v2896_v63, %v1689_v46 }
 0xb18   : > { %v1716_v49 = vadd.f32 %v1713_v8, %v1711_v48 }
 0xb1a   : > { %v1718_v36 = vmul.f32 %v2696_v14, %v1716_v49 }
 0xb1c   : > { %1924 = vst.msk [vmem:[%s2914_s22 + $0x18] sm:$0xff] %vm375_vm0, %v1718_v36 }
 0xb1d   : > { %2195 = shalt.err (!%p2192_p3)
}
 0xb1e   : > { %s2254_s28 = smov 128  }
 0xb1f   : > { %1952 = dma.vmem_to_hbm [thread:$0]  (%p2341_p5), %s1737_s30, 512, %s1739_s13, %s1723_s0, %s2254_s28, %s2254_s28, %s2248_s25  }
 0xb20 PF: > { %p1958_p4 = scmp.ge.s32.totalorder %s2232_s12, 2  ;;  %s1753_s22 = sand.u32 1, %s2220_s9  }
 0xb21   : > { %s1754_s26 = scalar_lea.sflag [#allocation6], %s1753_s22 }
 0xb22   : > { %p1955_p7 = pnand %p1958_p4, %p2345_p6 }
 0xb24   : > { %p1956_p8 = pneg %p1955_p7 }
 0xb26   : > { %2215 = dma.done.wait (%p1956_p8), %s1754_s26, 512  }
 0xb27   : > { %2217 = vsyncadd (%p1956_p8), %s1754_s26, 4294966784  ;;  %p26_p9 = scmp.ge.s32.totalorder %s2328_s14, 4   ;;  %s2977_s9 = smov %s2224_s10 }
 0xb28   : > { %s2978_s10 = smov %s2228_s11  ;;  %s2979_s11 = smov %s2339_s17 }
 0xb29   : > { %s2980_s12 = smov %s2328_s14  ;;  %28 = sbr.rel (!%p26_p9) target bundleno = 9 (0x9), region = 88 }
 0xb2e   :  { %1760 = vsyncpa [#allocation6], 1 }
 0xb2f   :  { %1762 = vsyncpa [#allocation6 + $0x1], 1 }

</bundles_post_ra>
